<compile_context>
chip_gen: v7x
topology: tpu7x:2x2x1
jax: 0.10.0
libtpu: 0.0.40
codegen_flags: <defaults>
</compile_context>

<pallas_src>
import math

import jax
import jax.numpy as jnp
from jax.experimental import pallas as pl
from jax.experimental.pallas import tpu as pltpu


def _make_self_attention_kernel(C, S, n_head, cpg, eps):
    hd = C // n_head
    inv_n = 1.0 / float(cpg * S)        # 1 / (channels_per_group * spatial)
    scale = 1.0 / math.sqrt(float(C))   # torch divides scores by sqrt(channel)

    def kernel(x_ref, gamma_ref, beta_ref, gmask_ref,
               wqkv_ref, wout_ref, bout_ref, o_ref):
        x = x_ref[0]                     # (C, S) f32

        # ---- GroupNorm --------------------------------------------------
        # Per-channel lane reductions, then a block-diagonal 0/1 "same group"
        # matvec to broadcast group sums back to every channel in the group.
        srow = jnp.sum(x, axis=1, keepdims=True)                            # (C, 1)
        srow2 = jnp.sum(x * x, axis=1, keepdims=True)                       # (C, 1)
        gmask = gmask_ref[...]                                              # (C, C)
        gsum = jnp.dot(gmask, srow, preferred_element_type=jnp.float32)     # (C, 1)
        gsq = jnp.dot(gmask, srow2, preferred_element_type=jnp.float32)     # (C, 1)
        mean = gsum * inv_n                                                 # (C, 1)
        var = gsq * inv_n - mean * mean                                     # (C, 1)
        w_c = jax.lax.rsqrt(var + eps) * gamma_ref[...]                     # (C, 1)
        b_c = beta_ref[...] - mean * w_c                                    # (C, 1)
        xn = x * w_c + b_c                                                  # (C, S)

        # ---- QKV projection (1x1 conv, no bias) -------------------------
        qkv = jnp.dot(wqkv_ref[...], xn,
                      preferred_element_type=jnp.float32)                   # (3C, S)

        # ---- per-head attention -----------------------------------------
        # torch layout: qkv.view(B, n_head, 3*hd, H, W).chunk(3, dim=2)
        # => head h uses rows [h*3*hd, h*3*hd + 3*hd) of the conv output.
        head_outs = []
        for h in range(n_head):
            base = h * 3 * hd
            q = qkv[base:base + hd, :] * scale          # (hd, S), scale folded in
            k = qkv[base + hd:base + 2 * hd, :]         # (hd, S)
            v = qkv[base + 2 * hd:base + 3 * hd, :]     # (hd, S)

            # scores[sq, sk] = sum_c q[c, sq] * k[c, sk]   (TN matmul on MXU)
            s = jax.lax.dot_general(
                q, k, (((0,), (0,)), ((), ())),
                preferred_element_type=jnp.float32)                         # (S, S)
            s = s - jnp.max(s, axis=-1, keepdims=True)
            p = jnp.exp(s)
            p = p * (1.0 / jnp.sum(p, axis=-1, keepdims=True))

            # out_h[c, sq] = sum_t v[c, t] * p[sq, t]   (NT matmul on MXU)
            o_h = jax.lax.dot_general(
                v, p, (((1,), (1,)), ((), ())),
                preferred_element_type=jnp.float32)                         # (hd, S)
            head_outs.append(o_h)

        attn_out = head_outs[0] if n_head == 1 else jnp.concatenate(
            head_outs, axis=0)                                              # (C, S)

        # ---- output projection (1x1 conv with bias) + residual -----------
        y = jnp.dot(wout_ref[...], attn_out,
                    preferred_element_type=jnp.float32)
        y = y + bout_ref[...] + x
        o_ref[0] = y.astype(o_ref.dtype)                # single lane-dense store

    return kernel


def self_attention(x, gamma, beta, w_qkv, w_out, b_out, *,
                   n_head=1, norm_groups=32, eps=1e-5):
    """Pallas equivalent of SelfAttention(in_channel, n_head, norm_groups).forward(x)."""
    B, C, H, W = x.shape
    assert C % n_head == 0 and C % norm_groups == 0
    S = H * W
    cpg = C // norm_groups

    x_f = x.reshape(B, C, S).astype(jnp.float32)
    gamma_c = gamma.reshape(C, 1).astype(jnp.float32)
    beta_c = beta.reshape(C, 1).astype(jnp.float32)
    w_qkv_f = w_qkv.reshape(3 * C, C).astype(jnp.float32)
    w_out_f = w_out.reshape(C, C).astype(jnp.float32)
    b_out_c = b_out.reshape(C, 1).astype(jnp.float32)

    # Block-diagonal "same group" 0/1 matrix for the GroupNorm reduction.
    grp = jnp.arange(C, dtype=jnp.int32) // cpg
    gmask = (grp[:, None] == grp[None, :]).astype(jnp.float32)              # (C, C)

    kernel = _make_self_attention_kernel(C, S, n_head, cpg, eps)

    # MXU flops: QKV (2*3C*C*S) + scores (2*C*S*S) + attn@V (2*C*S*S)
    #            + out proj (2*C*C*S), per batch element.
    flops = B * (8 * C * C * S + 4 * C * S * S)
    transcendentals = B * n_head * S * S
    bytes_accessed = (B * C * S * 4 * 2) + (5 * C * C + 3 * C) * 4

    out = pl.pallas_call(
        kernel,
        out_shape=jax.ShapeDtypeStruct((B, C, S), jnp.float32),
        grid=(B,),
        in_specs=[
            pl.BlockSpec((1, C, S), lambda b: (b, 0, 0)),      # x: per-batch block
            pl.BlockSpec((C, 1), lambda b: (0, 0)),            # gamma (constant)
            pl.BlockSpec((C, 1), lambda b: (0, 0)),            # beta  (constant)
            pl.BlockSpec((C, C), lambda b: (0, 0)),            # group mask (constant)
            pl.BlockSpec((3 * C, C), lambda b: (0, 0)),        # w_qkv (constant)
            pl.BlockSpec((C, C), lambda b: (0, 0)),            # w_out (constant)
            pl.BlockSpec((C, 1), lambda b: (0, 0)),            # b_out (constant)
        ],
        out_specs=pl.BlockSpec((1, C, S), lambda b: (b, 0, 0)),
        compiler_params=pltpu.CompilerParams(
            dimension_semantics=("parallel",),
            vmem_limit_bytes=64 * 1024 * 1024,
        ),
        cost_estimate=pl.CostEstimate(
            flops=int(flops),
            transcendentals=int(transcendentals),
            bytes_accessed=int(bytes_accessed),
        ),
    )(x_f, gamma_c, beta_c, gmask, w_qkv_f, w_out_f, b_out_c)

    return out.reshape(B, C, H, W).astype(x.dtype)


def self_attention_ref(x, gamma, beta, w_qkv, w_out, b_out, *,
                       n_head=1, norm_groups=32, eps=1e-5):
    """Pure-JAX reference mirroring the PyTorch forward exactly."""
    B, C, H, W = x.shape
    hd = C // n_head
    hp = jax.lax.Precision.HIGHEST

    # GroupNorm (biased variance, affine)
    xg = x.reshape(B, norm_groups, C // norm_groups, H, W)
    mean = xg.mean(axis=(2, 3, 4), keepdims=True)
    var = xg.var(axis=(2, 3, 4), keepdims=True)
    xn = (xg - mean) / jnp.sqrt(var + eps)
    xn = xn.reshape(B, C, H, W) * gamma.reshape(1, C, 1, 1) + beta.reshape(1, C, 1, 1)

    # 1x1 QKV conv (no bias)
    qkv = jnp.einsum('oc,bcs->bos', w_qkv, xn.reshape(B, C, H * W), precision=hp)
    qkv = qkv.reshape(B, n_head, 3 * hd, H, W)
    q, k, v = jnp.split(qkv, 3, axis=2)

    attn = jnp.einsum('bnchw,bncyx->bnhwyx', q, k, precision=hp) / math.sqrt(C)
    attn = attn.reshape(B, n_head, H, W, H * W)
    attn = jax.nn.softmax(attn, axis=-1)
    attn = attn.reshape(B, n_head, H, W, H, W)

    out = jnp.einsum('bnhwyx,bncyx->bnchw', attn, v, precision=hp)
    out = out.reshape(B, C, H * W)
    out = jnp.einsum('oc,bcs->bos', w_out, out, precision=hp) + b_out.reshape(1, C, 1)
    return out.reshape(B, C, H, W) + x


if __name__ == "__main__":
    B, C, H, W = 2, 64, 16, 16
    n_head = 2
    norm_groups = 32

    key = jax.random.PRNGKey(0)
    ks = jax.random.split(key, 6)
    x = jax.random.normal(ks[0], (B, C, H, W), jnp.float32)
    gamma = 1.0 + 0.1 * jax.random.normal(ks[1], (C,), jnp.float32)
    beta = 0.1 * jax.random.normal(ks[2], (C,), jnp.float32)
    w_qkv = jax.random.normal(ks[3], (3 * C, C), jnp.float32) / math.sqrt(C)
    w_out = jax.random.normal(ks[4], (C, C), jnp.float32) / math.sqrt(C)
    b_out = 0.1 * jax.random.normal(ks[5], (C,), jnp.float32)

    out = self_attention(x, gamma, beta, w_qkv, w_out, b_out,
                         n_head=n_head, norm_groups=norm_groups)
    out = jax.block_until_ready(out)

    ref = self_attention_ref(x, gamma, beta, w_qkv, w_out, b_out,
                             n_head=n_head, norm_groups=norm_groups)

    assert out.shape == x.shape, out.shape
    max_err = float(jnp.max(jnp.abs(out - ref)))
    assert jnp.allclose(out, ref, atol=2e-3, rtol=2e-3), f"mismatch vs reference, max_err={max_err}"

    print("KERNEL_OK")
</pallas_src>

<mosaic_0001>
module attributes {stable_mosaic.version = 11 : i64} {
  func.func @kernel(%arg0: i32, %arg1: memref<1x64x256xf32, #tpu.memory_space<vmem>>, %arg2: memref<64x1xf32, #tpu.memory_space<vmem>>, %arg3: memref<64x1xf32, #tpu.memory_space<vmem>>, %arg4: memref<64x64xf32, #tpu.memory_space<vmem>>, %arg5: memref<192x64xf32, #tpu.memory_space<vmem>>, %arg6: memref<64x64xf32, #tpu.memory_space<vmem>>, %arg7: memref<64x1xf32, #tpu.memory_space<vmem>>, %arg8: memref<1x64x256xf32, #tpu.memory_space<vmem>>) attributes {dimension_semantics = [#tpu.dimension_semantics<parallel>], iteration_bounds = array<i64: 2>, scalar_prefetch = 0 : i64, scratch_operands = 0 : i64, tpu.core_type = #tpu.core_type<tc>, window_params = [{transform_indices = @transform_0, window_bounds = array<i64: 1, 64, 256>}, {pipeline_mode = #tpu.pipeline_mode<synchronous>, transform_indices = @transform_1, window_bounds = array<i64: 64, 1>}, {pipeline_mode = #tpu.pipeline_mode<synchronous>, transform_indices = @transform_2, window_bounds = array<i64: 64, 1>}, {pipeline_mode = #tpu.pipeline_mode<synchronous>, transform_indices = @transform_3, window_bounds = array<i64: 64, 64>}, {pipeline_mode = #tpu.pipeline_mode<synchronous>, transform_indices = @transform_4, window_bounds = array<i64: 192, 64>}, {pipeline_mode = #tpu.pipeline_mode<synchronous>, transform_indices = @transform_5, window_bounds = array<i64: 64, 64>}, {pipeline_mode = #tpu.pipeline_mode<synchronous>, transform_indices = @transform_6, window_bounds = array<i64: 64, 1>}, {transform_indices = @transform_7, window_bounds = array<i64: 1, 64, 256>}]} {
    %c0 = arith.constant 0 : index
    %c0_0 = arith.constant 0 : index
    %c0_1 = arith.constant 0 : index
    %0 = vector.load %arg1[%c0, %c0_0, %c0_1] : memref<1x64x256xf32, #tpu.memory_space<vmem>>, vector<1x64x256xf32>
    %1 = vector.shape_cast %0 : vector<1x64x256xf32> to vector<64x256xf32>
    %cst = arith.constant dense<0.000000e+00> : vector<64xf32>
    %2 = vector.multi_reduction <add>, %1, %cst [1] : vector<64x256xf32> to vector<64xf32>
    %3 = vector.shape_cast %2 : vector<64xf32> to vector<64x1xf32>
    %4 = arith.mulf %1, %1 : vector<64x256xf32>
    %cst_2 = arith.constant dense<0.000000e+00> : vector<64xf32>
    %5 = vector.multi_reduction <add>, %4, %cst_2 [1] : vector<64x256xf32> to vector<64xf32>
    %6 = vector.shape_cast %5 : vector<64xf32> to vector<64x1xf32>
    %c0_3 = arith.constant 0 : index
    %c0_4 = arith.constant 0 : index
    %7 = vector.load %arg4[%c0_3, %c0_4] : memref<64x64xf32, #tpu.memory_space<vmem>>, vector<64x64xf32>
    %cst_5 = arith.constant dense<0.000000e+00> : vector<64x1xf32>
    %8 = tpu.matmul %7, %3, %cst_5 {dimension_numbers = #tpu.dot_dimension_numbers<[1], [0], [0], [1], [0, 0, 1, 1], [], []>} : vector<64x64xf32>, vector<64x1xf32>, vector<64x1xf32> -> vector<64x1xf32>
    %cst_6 = arith.constant dense<0.000000e+00> : vector<64x1xf32>
    %9 = tpu.matmul %7, %6, %cst_6 {dimension_numbers = #tpu.dot_dimension_numbers<[1], [0], [0], [1], [0, 0, 1, 1], [], []>} : vector<64x64xf32>, vector<64x1xf32>, vector<64x1xf32> -> vector<64x1xf32>
    %cst_7 = arith.constant 0.001953125 : f32
    %10 = vector.broadcast %cst_7 : f32 to vector<64x1xf32>
    %11 = arith.mulf %8, %10 : vector<64x1xf32>
    %cst_8 = arith.constant 0.001953125 : f32
    %12 = vector.broadcast %cst_8 : f32 to vector<64x1xf32>
    %13 = arith.mulf %9, %12 : vector<64x1xf32>
    %14 = arith.mulf %11, %11 : vector<64x1xf32>
    %15 = arith.subf %13, %14 : vector<64x1xf32>
    %cst_9 = arith.constant 9.99999974E-6 : f32
    %16 = vector.broadcast %cst_9 : f32 to vector<64x1xf32>
    %17 = arith.addf %15, %16 : vector<64x1xf32>
    %18 = math.rsqrt %17 : vector<64x1xf32>
    %c0_10 = arith.constant 0 : index
    %c0_11 = arith.constant 0 : index
    %19 = vector.load %arg2[%c0_10, %c0_11] : memref<64x1xf32, #tpu.memory_space<vmem>>, vector<64x1xf32>
    %20 = arith.mulf %18, %19 : vector<64x1xf32>
    %c0_12 = arith.constant 0 : index
    %c0_13 = arith.constant 0 : index
    %21 = vector.load %arg3[%c0_12, %c0_13] : memref<64x1xf32, #tpu.memory_space<vmem>>, vector<64x1xf32>
    %22 = arith.mulf %11, %20 : vector<64x1xf32>
    %23 = arith.subf %21, %22 : vector<64x1xf32>
    %24 = vector.broadcast %20 : vector<64x1xf32> to vector<64x256xf32>
    %25 = arith.mulf %1, %24 : vector<64x256xf32>
    %26 = vector.broadcast %23 : vector<64x1xf32> to vector<64x256xf32>
    %27 = arith.addf %25, %26 : vector<64x256xf32>
    %c0_14 = arith.constant 0 : index
    %c0_15 = arith.constant 0 : index
    %28 = vector.load %arg5[%c0_14, %c0_15] : memref<192x64xf32, #tpu.memory_space<vmem>>, vector<192x64xf32>
    %cst_16 = arith.constant dense<0.000000e+00> : vector<192x256xf32>
    %29 = tpu.matmul %28, %27, %cst_16 {dimension_numbers = #tpu.dot_dimension_numbers<[1], [0], [0], [1], [0, 0, 1, 1], [], []>} : vector<192x64xf32>, vector<64x256xf32>, vector<192x256xf32> -> vector<192x256xf32>
    %30 = vector.extract_strided_slice %29 {offsets = [0, 0], sizes = [32, 256], strides = [1, 1]} : vector<192x256xf32> to vector<32x256xf32>
    %cst_17 = arith.constant 1.250000e-01 : f32
    %31 = vector.broadcast %cst_17 : f32 to vector<32x256xf32>
    %32 = arith.mulf %30, %31 : vector<32x256xf32>
    %33 = vector.extract_strided_slice %29 {offsets = [32, 0], sizes = [32, 256], strides = [1, 1]} : vector<192x256xf32> to vector<32x256xf32>
    %34 = vector.extract_strided_slice %29 {offsets = [64, 0], sizes = [32, 256], strides = [1, 1]} : vector<192x256xf32> to vector<32x256xf32>
    %cst_18 = arith.constant dense<0.000000e+00> : vector<256x256xf32>
    %35 = tpu.matmul %32, %33, %cst_18 {dimension_numbers = #tpu.dot_dimension_numbers<[0], [0], [1], [1], [0, 1, 1, 1], [], []>} : vector<32x256xf32>, vector<32x256xf32>, vector<256x256xf32> -> vector<256x256xf32>
    %cst_19 = arith.constant dense<0xFF800000> : vector<256xf32>
    %36 = vector.multi_reduction <maximumf>, %35, %cst_19 [1] : vector<256x256xf32> to vector<256xf32>
    %37 = vector.shape_cast %36 : vector<256xf32> to vector<256x1xf32>
    %38 = vector.broadcast %37 : vector<256x1xf32> to vector<256x256xf32>
    %39 = arith.subf %35, %38 : vector<256x256xf32>
    %40 = math.exp %39 : vector<256x256xf32>
    %cst_20 = arith.constant dense<0.000000e+00> : vector<256xf32>
    %41 = vector.multi_reduction <add>, %40, %cst_20 [1] : vector<256x256xf32> to vector<256xf32>
    %42 = vector.shape_cast %41 : vector<256xf32> to vector<256x1xf32>
    %cst_21 = arith.constant 1.000000e+00 : f32
    %43 = vector.broadcast %cst_21 : f32 to vector<256x1xf32>
    %44 = arith.divf %43, %42 : vector<256x1xf32>
    %45 = vector.broadcast %44 : vector<256x1xf32> to vector<256x256xf32>
    %46 = arith.mulf %40, %45 : vector<256x256xf32>
    %cst_22 = arith.constant dense<0.000000e+00> : vector<32x256xf32>
    %47 = tpu.matmul %34, %46, %cst_22 {dimension_numbers = #tpu.dot_dimension_numbers<[1], [1], [0], [0], [0, 0, 1, 0], [], []>} : vector<32x256xf32>, vector<256x256xf32>, vector<32x256xf32> -> vector<32x256xf32>
    %48 = vector.extract_strided_slice %29 {offsets = [96, 0], sizes = [32, 256], strides = [1, 1]} : vector<192x256xf32> to vector<32x256xf32>
    %cst_23 = arith.constant 1.250000e-01 : f32
    %49 = vector.broadcast %cst_23 : f32 to vector<32x256xf32>
    %50 = arith.mulf %48, %49 : vector<32x256xf32>
    %51 = vector.extract_strided_slice %29 {offsets = [128, 0], sizes = [32, 256], strides = [1, 1]} : vector<192x256xf32> to vector<32x256xf32>
    %52 = vector.extract_strided_slice %29 {offsets = [160, 0], sizes = [32, 256], strides = [1, 1]} : vector<192x256xf32> to vector<32x256xf32>
    %cst_24 = arith.constant dense<0.000000e+00> : vector<256x256xf32>
    %53 = tpu.matmul %50, %51, %cst_24 {dimension_numbers = #tpu.dot_dimension_numbers<[0], [0], [1], [1], [0, 1, 1, 1], [], []>} : vector<32x256xf32>, vector<32x256xf32>, vector<256x256xf32> -> vector<256x256xf32>
    %cst_25 = arith.constant dense<0xFF800000> : vector<256xf32>
    %54 = vector.multi_reduction <maximumf>, %53, %cst_25 [1] : vector<256x256xf32> to vector<256xf32>
    %55 = vector.shape_cast %54 : vector<256xf32> to vector<256x1xf32>
    %56 = vector.broadcast %55 : vector<256x1xf32> to vector<256x256xf32>
    %57 = arith.subf %53, %56 : vector<256x256xf32>
    %58 = math.exp %57 : vector<256x256xf32>
    %cst_26 = arith.constant dense<0.000000e+00> : vector<256xf32>
    %59 = vector.multi_reduction <add>, %58, %cst_26 [1] : vector<256x256xf32> to vector<256xf32>
    %60 = vector.shape_cast %59 : vector<256xf32> to vector<256x1xf32>
    %cst_27 = arith.constant 1.000000e+00 : f32
    %61 = vector.broadcast %cst_27 : f32 to vector<256x1xf32>
    %62 = arith.divf %61, %60 : vector<256x1xf32>
    %63 = vector.broadcast %62 : vector<256x1xf32> to vector<256x256xf32>
    %64 = arith.mulf %58, %63 : vector<256x256xf32>
    %cst_28 = arith.constant dense<0.000000e+00> : vector<32x256xf32>
    %65 = tpu.matmul %52, %64, %cst_28 {dimension_numbers = #tpu.dot_dimension_numbers<[1], [1], [0], [0], [0, 0, 1, 0], [], []>} : vector<32x256xf32>, vector<256x256xf32>, vector<32x256xf32> -> vector<32x256xf32>
    %66 = tpu.concatenate %47, %65 in 0 : vector<32x256xf32>, vector<32x256xf32> -> vector<64x256xf32>
    %c0_29 = arith.constant 0 : index
    %c0_30 = arith.constant 0 : index
    %67 = vector.load %arg6[%c0_29, %c0_30] : memref<64x64xf32, #tpu.memory_space<vmem>>, vector<64x64xf32>
    %cst_31 = arith.constant dense<0.000000e+00> : vector<64x256xf32>
    %68 = tpu.matmul %67, %66, %cst_31 {dimension_numbers = #tpu.dot_dimension_numbers<[1], [0], [0], [1], [0, 0, 1, 1], [], []>} : vector<64x64xf32>, vector<64x256xf32>, vector<64x256xf32> -> vector<64x256xf32>
    %c0_32 = arith.constant 0 : index
    %c0_33 = arith.constant 0 : index
    %69 = vector.load %arg7[%c0_32, %c0_33] : memref<64x1xf32, #tpu.memory_space<vmem>>, vector<64x1xf32>
    %70 = vector.broadcast %69 : vector<64x1xf32> to vector<64x256xf32>
    %71 = arith.addf %68, %70 : vector<64x256xf32>
    %72 = arith.addf %71, %1 : vector<64x256xf32>
    %c0_34 = arith.constant 0 : index
    %c0_35 = arith.constant 0 : index
    %c0_36 = arith.constant 0 : index
    %73 = vector.load %arg8[%c0_34, %c0_35, %c0_36] : memref<1x64x256xf32, #tpu.memory_space<vmem>>, vector<1x64x256xf32>
    %74 = vector.shape_cast %73 : vector<1x64x256xf32> to vector<64x256xf32>
    %75 = vector.shape_cast %72 : vector<64x256xf32> to vector<1x64x256xf32>
    tpu.vector_store %arg8[%c0_34, %c0_35, %c0_36], %75 {strides = array<i32>} : memref<1x64x256xf32, #tpu.memory_space<vmem>>, vector<1x64x256xf32>,
    return
  }
  func.func @transform_0(%arg0: i32) -> (i32, i32, i32) {
    %c0_i32 = arith.constant 0 : i32
    %c0_i32_0 = arith.constant 0 : i32
    %c0_i32_1 = arith.constant 0 : i32
    return %arg0, %c0_i32, %c0_i32_0 : i32, i32, i32
  }
  func.func @transform_1(%arg0: i32) -> (i32, i32) {
    %c0_i32 = arith.constant 0 : i32
    %c0_i32_0 = arith.constant 0 : i32
    %c0_i32_1 = arith.constant 0 : i32
    return %c0_i32, %c0_i32_0 : i32, i32
  }
  func.func @transform_2(%arg0: i32) -> (i32, i32) {
    %c0_i32 = arith.constant 0 : i32
    %c0_i32_0 = arith.constant 0 : i32
    %c0_i32_1 = arith.constant 0 : i32
    return %c0_i32, %c0_i32_0 : i32, i32
  }
  func.func @transform_3(%arg0: i32) -> (i32, i32) {
    %c0_i32 = arith.constant 0 : i32
    %c0_i32_0 = arith.constant 0 : i32
    %c0_i32_1 = arith.constant 0 : i32
    return %c0_i32, %c0_i32_0 : i32, i32
  }
  func.func @transform_4(%arg0: i32) -> (i32, i32) {
    %c0_i32 = arith.constant 0 : i32
    %c0_i32_0 = arith.constant 0 : i32
    %c0_i32_1 = arith.constant 0 : i32
    return %c0_i32, %c0_i32_0 : i32, i32
  }
  func.func @transform_5(%arg0: i32) -> (i32, i32) {
    %c0_i32 = arith.constant 0 : i32
    %c0_i32_0 = arith.constant 0 : i32
    %c0_i32_1 = arith.constant 0 : i32
    return %c0_i32, %c0_i32_0 : i32, i32
  }
  func.func @transform_6(%arg0: i32) -> (i32, i32) {
    %c0_i32 = arith.constant 0 : i32
    %c0_i32_0 = arith.constant 0 : i32
    %c0_i32_1 = arith.constant 0 : i32
    return %c0_i32, %c0_i32_0 : i32, i32
  }
  func.func @transform_7(%arg0: i32) -> (i32, i32, i32) {
    %c0_i32 = arith.constant 0 : i32
    %c0_i32_0 = arith.constant 0 : i32
    %c0_i32_1 = arith.constant 0 : i32
    return %arg0, %c0_i32, %c0_i32_0 : i32, i32, i32
  }
}

</mosaic_0001>

<bundles_post_ra>
// kernel: tpu_custom_call.1
= control target key start
LH: loop header
LB: loop body
LE: loop exit
PB: predicated region body
PF: predicated region fallthrough
CT: control target
= control target key end

     0   :  { %12 = vsyncpa [#allocation3], 0  ;;  %s6875_s0 = inlined_call_operand.hbm [shape: f32[2,64,256], index: 0, kind: input, shape index: {}]   ;;  %s6876_s1 = inlined_call_operand.hbm [shape: f32[64,1], index: 1, kind: input, shape index: {}]   ;;  %s6877_s2 = inlined_call_operand.hbm [shape: f32[64,1], index: 2, kind: input, shape index: {}]   ;;  %s6878_s3 = inlined_call_operand.hbm [shape: f32[64,64], index: 3, kind: input, shape index: {}]   ;;  %s6879_s4 = inlined_call_operand.hbm [shape: f32[192,64], index: 4, kind: input, shape index: {}]   ;;  %s6880_s5 = inlined_call_operand.hbm [shape: f32[64,64], index: 5, kind: input, shape index: {}]   ;;  %s6881_s6 = inlined_call_operand.hbm [shape: f32[64,1], index: 6, kind: input, shape index: {}]   ;;  %s6882_s7 = inlined_call_operand.hbm [shape: f32[2,64,256], index: 7, kind: output, shape index: {}]  }
   0x1   :  { %14 = vsyncpa [#allocation3 + $0x1], 0 }
   0x2   :  { %15 = vsyncpa [#allocation6], 0 }
   0x3   :  { %16 = vsyncpa [#allocation9], 0 }
   0x4   :  { %17 = vsyncpa [#allocation12], 0 }
   0x5   :  { %18 = vsyncpa [#allocation4], 0 }
   0x6   :  { %20 = vsyncpa [#allocation4 + $0x1], 0  ;;  %s4945_s24 = smov 0   ;;  %s4947_s25 = smov 0  }
   0x7   :  { %s4949_s26 = smov 0   ;;  %s4951_s27 = smov 0  }
   0x8 LB: > { %s4889_s28 = smov [#allocation5]   ;;  %s4966_s30 = sadd.s32 4294967295, %s4887_s27   ;;  %s4887_s27 = sphi %s4951_s27, %s7361_s27   ;;  %s4883_s26 = sphi %s4949_s26, %s7360_s26   ;;  %s4879_s25 = sphi %s4947_s25, %s7359_s25   ;;  %s4875_s24 = sphi %s4945_s24, %s7358_s24  }
   0x9   : > { %s221_s29 = sshll.u32 %s4889_s28, 4  ;;  %p3635_p0 = scmp.ge.s32.totalorder %s4887_s27, 1  ;;  %s4971_s29 = int_to_ptr.vmem [resolvable:$true] %s221_s29 }
   0xa   : > { %p6883_p1 = scmp.eq.s32.totalorder %s4966_s30, 0  ;;  %p209_p2 = scmp.lt.s32.totalorder %s4887_s27, 3 }
   0xb   : > { %s4890_s9 = smov [#allocation8]   ;;  %s4891_s12 = smov [#allocation11]  }
   0xc   : > { %p4973_p3 = pnand %p3635_p0, %p209_p2  ;;  %s247_s10 = sshll.u32 %s4890_s9, 4  ;;  %s4986_s10 = int_to_ptr.vmem [resolvable:$true] %s247_s10 }
   0xd   : > { %s273_s13 = sshll.u32 %s4891_s12, 4  ;;  %s4611_s16 = scalar_lea.hbm %s6876_s1, 1024  ;;  %s4988_s13 = int_to_ptr.vmem [resolvable:$true] %s273_s13 }
   0xe   : > { %s7025_s8 = scalar_select %p4973_p3, 1, 0 }
   0xf   : > { %p4106_p5 = pneg %p4973_p3  ;;  %p4612_p7 = scmp.ne.s32.totalorder %s6876_s1, %s4611_s16 }
  0x10   : > { %p4618_p11 = scmp.lt.u32.totalorder %s4611_s16, %s6876_s1 }
  0x11   : > { %p4982_p6 = pnand %p4106_p5, %p6883_p1 }
  0x13   : > { %p4998_p8 = pneg %p4982_p6 }
  0x15   : > { %p4614_p9 = pnand %p4998_p8, %p4612_p7 }
  0x17   : > { %p4615_p10 = pneg %p4614_p9 }
  0x19   : > { %p4620_p12 = pnand %p4618_p11, %p4615_p10 }
  0x1b   : > { %4623 = shalt.err (!%p4620_p12)
}
  0x1c   : > { %s4624_s22 = scalar_lea.vmem %s4971_s29, 1024  ;;  %p4632_p5 = scmp.lt.s32.totalorder %s4971_s29, %s4971_s29 }
  0x1d   : > { %p4625_p13 = scmp.ne.s32.totalorder %s4971_s29, %s4624_s22  ;;  %p4633_p4 = scmp.lt.s32.totalorder %s4624_s22, %s4624_s22 }
  0x1f   : > { %p4627_p0 = pnand %p4625_p13, %p4998_p8  ;;  %p4634_p7 = por %p4633_p4, %p4632_p5 }
  0x21   : > { %p4628_p2 = pneg %p4627_p0 }
  0x23   : > { %p4635_p9 = pnand %p4634_p7, %p4628_p2 }
  0x25   : > { %4638 = shalt.err (!%p4635_p9)
}
  0x26   : > { %s4892_s23 = smov 128   ;;  %s4893_s28 = smov 8  }
  0x27   : > { %4109 = dma.hbm_to_vmem [thread:$0]  (!%p4982_p6), %s6876_s1, 1024, %s4971_s29, [#allocation6], %s4892_s23, %s4892_s23, %s4893_s28  }
  0x28   : > { %s4639_s16 = scalar_lea.hbm %s6878_s3, 1024 }
  0x29   : > { %p4640_p4 = scmp.ne.s32.totalorder %s6878_s3, %s4639_s16  ;;  %p4646_p12 = scmp.lt.u32.totalorder %s4639_s16, %s6878_s3 }
  0x2b   : > { %p4642_p10 = pnand %p4640_p4, %p4998_p8 }
  0x2d   : > { %p4643_p11 = pneg %p4642_p10 }
  0x2f   : > { %p4648_p13 = pnand %p4646_p12, %p4643_p11 }
  0x31   : > { %4651 = shalt.err (!%p4648_p13)
}
  0x32   : > { %s4652_s29 = scalar_lea.vmem %s4986_s10, 1024  ;;  %p4660_p7 = scmp.lt.s32.totalorder %s4986_s10, %s4986_s10 }
  0x33   : > { %p4653_p0 = scmp.ne.s32.totalorder %s4986_s10, %s4652_s29  ;;  %p4661_p9 = scmp.lt.s32.totalorder %s4652_s29, %s4652_s29 }
  0x35   : > { %p4655_p2 = pnand %p4653_p0, %p4998_p8  ;;  %p4662_p4 = por %p4661_p9, %p4660_p7 }
  0x37   : > { %p4656_p5 = pneg %p4655_p2 }
  0x39   : > { %p4663_p10 = pnand %p4662_p4, %p4656_p5 }
  0x3b   : > { %4666 = shalt.err (!%p4663_p10)
}
  0x3c   : > { %4115 = dma.hbm_to_vmem [thread:$0]  (!%p4982_p6), %s6878_s3, 1024, %s4986_s10, [#allocation9], %s4892_s23, %s4892_s23, %s4893_s28  }
  0x3d   : > { %s4667_s15 = scalar_lea.hbm %s6880_s5, 1024 }
  0x3e   : > { %p4668_p11 = scmp.ne.s32.totalorder %s6880_s5, %s4667_s15  ;;  %p4674_p0 = scmp.lt.u32.totalorder %s4667_s15, %s6880_s5 }
  0x40   : > { %p4670_p12 = pnand %p4668_p11, %p4998_p8 }
  0x42   : > { %p4671_p13 = pneg %p4670_p12 }
  0x44   : > { %p4676_p2 = pnand %p4674_p0, %p4671_p13 }
  0x46   : > { %4679 = shalt.err (!%p4676_p2)
}
  0x47   : > { %s4680_s10 = scalar_lea.vmem %s4988_s13, 1024  ;;  %p4688_p4 = scmp.lt.s32.totalorder %s4988_s13, %s4988_s13 }
  0x48   : > { %p4681_p5 = scmp.ne.s32.totalorder %s4988_s13, %s4680_s10  ;;  %p4689_p10 = scmp.lt.s32.totalorder %s4680_s10, %s4680_s10 }
  0x4a   : > { %p4683_p7 = pnand %p4681_p5, %p4998_p8  ;;  %p4690_p11 = por %p4689_p10, %p4688_p4 }
  0x4c   : > { %p4684_p9 = pneg %p4683_p7 }
  0x4e   : > { %p4691_p12 = pnand %p4690_p11, %p4684_p9 }
  0x50   : > { %4694 = shalt.err (!%p4691_p12)
}
  0x51   : > { %4121 = dma.hbm_to_vmem [thread:$0]  (!%p4982_p6), %s6880_s5, 1024, %s4988_s13, [#allocation12], %s4892_s23, %s4892_s23, %s4893_s28  }
  0x52   : > { %s4894_s22 = smov [#allocation7]   ;;  %s4895_s12 = smov [#allocation10]  }
  0x53   : > { %s234_s9 = sshll.u32 %s4894_s22, 4  ;;  %s260_s14 = sshll.u32 %s4895_s12, 4  ;;  %s235_s9 = int_to_ptr.vmem [resolvable:$true] %s234_s9  ;;  %s261_s14 = int_to_ptr.vmem [resolvable:$true] %s260_s14 }
  0x54   : > { %s4695_s17 = scalar_lea.hbm %s6877_s2, 1024 }
  0x55   : > { %p4696_p13 = scmp.ne.s32.totalorder %s6877_s2, %s4695_s17  ;;  %p4702_p5 = scmp.lt.u32.totalorder %s4695_s17, %s6877_s2 }
  0x57   : > { %p4698_p0 = pnand %p4696_p13, %p4998_p8 }
  0x59   : > { %p4699_p2 = pneg %p4698_p0 }
  0x5b   : > { %p4704_p7 = pnand %p4702_p5, %p4699_p2 }
  0x5d   : > { %4707 = shalt.err (!%p4704_p7)
}
  0x5e   : > { %s4708_s13 = scalar_lea.vmem %s235_s9, 1024  ;;  %p4716_p11 = scmp.lt.s32.totalorder %s235_s9, %s235_s9 }
  0x5f   : > { %p4709_p9 = scmp.ne.s32.totalorder %s235_s9, %s4708_s13  ;;  %p4717_p12 = scmp.lt.s32.totalorder %s4708_s13, %s4708_s13 }
  0x61   : > { %p4711_p4 = pnand %p4709_p9, %p4998_p8  ;;  %p4718_p1 = por %p4717_p12, %p4716_p11 }
  0x63   : > { %p4712_p10 = pneg %p4711_p4 }
  0x65   : > { %p4719_p3 = pnand %p4718_p1, %p4712_p10 }
  0x67   : > { %4722 = shalt.err (!%p4719_p3)
}
  0x68   : > { %4112 = dma.hbm_to_vmem [thread:$0]  (!%p4982_p6), %s6877_s2, 1024, %s235_s9, [#allocation6], %s4892_s23, %s4892_s23, %s4893_s28  }
  0x69   : > { %s4723_s16 = scalar_lea.hbm %s6879_s4, 3072 }
  0x6a   : > { %p4724_p1 = scmp.ne.s32.totalorder %s6879_s4, %s4723_s16  ;;  %p4730_p0 = scmp.lt.u32.totalorder %s4723_s16, %s6879_s4 }
  0x6c   : > { %p4726_p3 = pnand %p4724_p1, %p4998_p8 }
  0x6e   : > { %p4727_p13 = pneg %p4726_p3 }
  0x70   : > { %p4732_p2 = pnand %p4730_p0, %p4727_p13 }
  0x72   : > { %4735 = shalt.err (!%p4732_p2)
}
  0x73   : > { %s4736_s21 = scalar_lea.vmem %s261_s14, 3072  ;;  %p4744_p4 = scmp.lt.s32.totalorder %s261_s14, %s261_s14 }
  0x74   : > { %p4737_p5 = scmp.ne.s32.totalorder %s261_s14, %s4736_s21  ;;  %p4745_p10 = scmp.lt.s32.totalorder %s4736_s21, %s4736_s21 }
  0x76   : > { %p4739_p7 = pnand %p4737_p5, %p4998_p8  ;;  %p4746_p11 = por %p4745_p10, %p4744_p4 }
  0x78   : > { %p4740_p9 = pneg %p4739_p7 }
  0x7a   : > { %p4747_p12 = pnand %p4746_p11, %p4740_p9 }
  0x7c   : > { %4750 = shalt.err (!%p4747_p12)
}
  0x7d   : > { %4118 = dma.hbm_to_vmem [thread:$0]  (!%p4982_p6), %s6879_s4, 3072, %s261_s14, [#allocation9], %s4892_s23, %s4892_s23, %s4893_s28  }
  0x7e   : > { %s4896_s29 = smov [#allocation13]   ;;  %s4751_s16 = scalar_lea.hbm %s6881_s6, 1024 }
  0x7f   : > { %s286_s22 = sshll.u32 %s4896_s29, 4  ;;  %p4752_p1 = scmp.ne.s32.totalorder %s6881_s6, %s4751_s16  ;;  %s287_s22 = int_to_ptr.vmem [resolvable:$true] %s286_s22 }
  0x80   : > { %p4758_p0 = scmp.lt.u32.totalorder %s4751_s16, %s6881_s6 }
  0x81   : > { %p4754_p3 = pnand %p4752_p1, %p4998_p8 }
  0x83   : > { %p4755_p13 = pneg %p4754_p3 }
  0x85   : > { %p4760_p2 = pnand %p4758_p0, %p4755_p13 }
  0x87   : > { %4763 = shalt.err (!%p4760_p2)
}
  0x88   : > { %s4764_s14 = scalar_lea.vmem %s287_s22, 1024  ;;  %p4772_p4 = scmp.lt.s32.totalorder %s287_s22, %s287_s22 }
  0x89   : > { %p4765_p5 = scmp.ne.s32.totalorder %s287_s22, %s4764_s14  ;;  %p4773_p10 = scmp.lt.s32.totalorder %s4764_s14, %s4764_s14 }
  0x8b   : > { %p4767_p7 = pnand %p4765_p5, %p4998_p8  ;;  %p4774_p11 = por %p4773_p10, %p4772_p4 }
  0x8d   : > { %p4768_p9 = pneg %p4767_p7 }
  0x8f   : > { %p4775_p12 = pnand %p4774_p11, %p4768_p9 }
  0x91   : > { %4778 = shalt.err (!%p4775_p12)
}
  0x92   : > { %4124 = dma.hbm_to_vmem [thread:$0]  (!%p4982_p6), %s6881_s6, 1024, %s287_s22, [#allocation12], %s4892_s23, %s4892_s23, %s4893_s28  }
  0x93   : > { %s3634_s11 = sadd.s32 4294967294, %s4887_s27   ;;  %s5139_s19 = sadd.s32 1, %s4887_s27  }
  0x94   : > { %s30_s13 = ssub.s32 %s4887_s27, %s5139_s19  ;;  %s33_s29 = sadd.s32 1, %s4883_s26 }
  0x95   : > { %p31_p8 = scmp.eq.s32.totalorder %s30_s13, 0  ;;  %p40_p1 = scmp.ne.s32.totalorder %s4883_s26, %s4879_s25 }
  0x96   : > { %p41_p3 = scmp.eq.s32.totalorder %s4887_s27, 0  ;;  %p46_p13 = scmp.ne.s32.totalorder %s4879_s25, %s4875_s24 }
  0x97   : > { %s5150_s12 = scalar_select %p31_p8, %s4883_s26, %s33_s29  }
  0x98   : > { %p5152_p0 = por %p41_p3, %p40_p1  ;;  %p7029_p2 = scmp.eq.s32.totalorder %s4966_s30, 0 }
  0x99   : > { %p196_p5 = scmp.eq.s32.totalorder %s4966_s30, 1  ;;  %p202_p7 = scmp.eq.s32.totalorder %s3634_s11, 1 }
  0x9a   : > { %p5158_p6 = por %p7029_p2, %p46_p13  ;;  %p4139_p9 = scmp.lt.s32.totalorder %s4887_s27, 2 }
  0x9b   : > { %s300_s28 = sand.u32 1, %s4883_s26   ;;  %p5165_p4 = por %p196_p5, %p40_p1 }
  0x9c   : > { %p5169_p10 = por %p202_p7, %p46_p13  ;;  %s3643_s17 = sshll.u32 %s300_s28, 7 }
  0x9d   : > { %s7031_s22 = scalar_select %p5165_p4, 1, 0 }
  0x9e   : > { %s7032_s16 = scalar_select %p5169_p10, 1, 0 }
  0x9f   : > { %s3772_s18 = sshll.u32 %s4887_s27, 11  ;;  %s304_s21 = scalar_lea.vmem [#allocation2], %s3643_s17 }
  0xa0   : > { %s5177_s14 = scalar_lea.hbm %s6875_s0, %s3772_s18  ;;  %s311_s9 = sshll.u32 %s304_s21, 4  ;;  %s5179_s9 = int_to_ptr.vmem [resolvable:$true] %s311_s9 }
  0xa1   : > { %p5183_p11 = pnand %p4139_p9, %p5152_p0  ;;  %s5187_s13 = scalar_lea.sflag [#allocation3], %s300_s28 }
  0xa2   : > { %s4779_s29 = scalar_lea.hbm %s5177_s14, 2048  ;;  %s4784_s15 = scalar_lea.hbm %s6875_s0, 4096 }
  0xa3   : > { %p4780_p12 = scmp.ne.s32.totalorder %s5177_s14, %s4779_s29  ;;  %p4781_p8 = pneg %p5183_p11 }
  0xa4   : > { %p4785_p13 = scmp.lt.u32.totalorder %s5177_s14, %s6875_s0  ;;  %p4786_p0 = scmp.lt.u32.totalorder %s4784_s15, %s4779_s29 }
  0xa5   : > { %p4782_p1 = pnand %p4781_p8, %p4780_p12  ;;  %p4788_p5 = scmp.lt.u32.totalorder %s4779_s29, %s5177_s14 }
  0xa6   : > { %p4787_p2 = por %p4786_p0, %p4785_p13 }
  0xa7   : > { %p4783_p3 = pneg %p4782_p1 }
  0xa8   : > { %p4789_p7 = por %p4788_p5, %p4787_p2 }
  0xaa   : > { %p4790_p9 = pnand %p4789_p7, %p4783_p3 }
  0xac   : > { %4793 = shalt.err (!%p4790_p9)
}
  0xad   : > { %s4794_s28 = scalar_lea.vmem %s5179_s9, 2048  ;;  %s4897_s21 = smov [#allocation2]  }
  0xae   : > { %p4795_p12 = scmp.ne.s32.totalorder %s5179_s9, %s4794_s28  ;;  %s4799_s17 = sshll.u32 %s4897_s21, 4  ;;  %s4800_s17 = int_to_ptr.vmem [resolvable:$false] %s4799_s17 }
  0xaf   : > { %s4801_s18 = scalar_lea.vmem %s4800_s17, 4096  ;;  %p4802_p4 = scmp.lt.s32.totalorder %s5179_s9, %s4800_s17 }
  0xb0   : > { %p4797_p1 = pnand %p4795_p12, %p4781_p8  ;;  %p4803_p13 = scmp.lt.s32.totalorder %s4801_s18, %s4794_s28 }
  0xb2   : > { %p4798_p10 = pneg %p4797_p1  ;;  %p4804_p0 = por %p4803_p13, %p4802_p4 }
  0xb4   : > { %p4805_p2 = pnand %p4804_p0, %p4798_p10 }
  0xb6   : > { %4808 = shalt.err (!%p4805_p2)
}
  0xb7   : > { %s4898_s29 = smov 256   ;;  %s4899_s15 = smov 16  }
  0xb8   : > { %4128 = dma.hbm_to_vmem [thread:$0]  (!%p5183_p11), %s5177_s14, 2048, %s5179_s9, %s5187_s13, %s4898_s29, %s4898_s29, %s4899_s15  }
  0xb9   : > { %p7034_p8 = scmp.ne.s32.totalorder %s7025_s8, 0 }
  0xbb   : > { %323 = sbr.rel (%p7034_p8) target bundleno = 2550 (0x9f6), region = 48 }
  0xc2   : > { %s5218_s20 = sand.u32 1, %s4879_s25  }
  0xc3   : > { %s3647_s10 = sshll.u32 %s5218_s20, 7  ;;  %s326_s28 = scalar_lea.sflag [#allocation3], %s5218_s20 }
  0xc4   : > { %s5224_s21 = scalar_lea.vmem [#allocation2], %s3647_s10 }
  0xc5   : > { %4854 = dma.done.wait (%p5158_p6), %s326_s28, 2048  }
  0xc6   : > { %4856 = vsyncadd (%p5158_p6), %s326_s28, 4294965248  ;;  %p7035_p4 = scmp.eq.s32.totalorder %s4966_s30, 0 }
  0xc8   : > { %4858 = dma.done.wait (%p7035_p4), [#allocation6], 2048   ;;  %p7036_p10 = pmov %p7035_p4 }
  0xc9   : > { %p7037_p11 = pmov %p7035_p4 }
  0xca   : > { %4860 = vsyncadd (%p7036_p10), [#allocation6], 4294965248 }
  0xcb   : > { %4862 = dma.done.wait (%p7037_p11), [#allocation9], 4096   ;;  %p7038_p3 = pmov %p7035_p4 }
  0xcd   : > { %4864 = vsyncadd (%p7038_p3), [#allocation9], 4294963200  ;;  %p7039_p5 = pmov %p7038_p3 }
  0xce   : > { %p7040_p7 = pmov %p7038_p3 }
  0xcf   : > { %4866 = dma.done.wait (%p7039_p5), [#allocation12], 2048  }
  0xd0   : > { %4868 = vsyncadd (%p7040_p7), [#allocation12], 4294965248  ;;  %v5243_v0 = vld [vmem:[%s5224_s21 + $0x30] sm:$0xff]  ;;  %v5246_v1 = vld [vmem:[%s5224_s21 + $0x38] sm:$0xff]  ;;  %vm472_vm0 = vcmask 523264   ;;  %vm1284_vm1 = vcmask 261120  }
  0xd1   : > { %v5249_v2 = vld [vmem:[%s5224_s21] sm:$0xff]  ;;  %v409_v3 = vadd.f32 %v5246_v1, %v5243_v0  ;;  %v5254_v4 = vld [vmem:[%s5224_s21 + $0x8] sm:$0xff]  ;;  %v5259_v6 = vld [vmem:[%s5224_s21 + $0x10] sm:$0xff]  ;;  %v430_v17 = vmul.f32 %v5243_v0, %v5243_v0  ;;  %v431_v18 = vmul.f32 %v5246_v1, %v5246_v1  ;;  %s6794_s8 = scalar_lea.vmem [#allocation14], %s3647_s10  ;;  %s3773_s23 = sshll.u32 %s4966_s30, 11 }
  0xd2   : > { %v424_v5 = vmul.f32 %v5249_v2, %v5249_v2  ;;  %v5262_v7 = vld [vmem:[%s5224_s21 + $0x18] sm:$0xff]  ;;  %v400_v8 = vadd.f32 %v5254_v4, %v5249_v2  ;;  %v425_v9 = vmul.f32 %v5254_v4, %v5254_v4  ;;  %v426_v10 = vmul.f32 %v5259_v6, %v5259_v6  ;;  %v5275_v14 = vld [vmem:[%s5224_s21 + $0x20] sm:$0xff]  ;;  %v5278_v15 = vld [vmem:[%s5224_s21 + $0x28] sm:$0xff]  ;;  %s3504_s14 = sshll.u32 %s6794_s8, 4  ;;  %s6826_s13 = scalar_lea.hbm %s6882_s7, %s3773_s23  ;;  %s6828_s14 = int_to_ptr.vmem [resolvable:$true] %s3504_s14 }
  0xd3   : > { %410 = vadd.xlane.f32.xlu1 %v409_v3  ;;  %v427_v11 = vmul.f32 %v5262_v7, %v5262_v7  ;;  %v403_v13 = vadd.f32 %v5262_v7, %v5259_v6  ;;  %v406_v19 = vadd.f32 %v5278_v15, %v5275_v14  ;;  %v428_v20 = vmul.f32 %v5275_v14, %v5275_v14  ;;  %v5291_v24 = vld [vmem:[%s5224_s21 + $0x50] sm:$0xff]  ;;  %v5294_v25 = vld [vmem:[%s5224_s21 + $0x58] sm:$0xff]  ;;  %v5297_v26 = vld [vmem:[%s5224_s21 + $0x40] sm:$0xff]  ;;  %s3491_s30 = scalar_lea.sflag [#allocation4], %s5218_s20  ;;  %s4809_s17 = scalar_lea.vmem %s6828_s14, 2048 }
  0xd4   : > { %401 = vadd.xlane.f32.xlu0 %v400_v8  ;;  %v440_v12 = vadd.f32 %v425_v9, %v424_v5  ;;  %v429_v21 = vmul.f32 %v5278_v15, %v5278_v15  ;;  %v449_v22 = vadd.f32 %v431_v18, %v430_v17  ;;  %v5300_v27 = vld [vmem:[%s5224_s21 + $0x48] sm:$0xff]  ;;  %v415_v28 = vadd.f32 %v5294_v25, %v5291_v24  ;;  %v5315_v36 = vld [vmem:[%s5224_s21 + $0x70] sm:$0xff]  ;;  %v5318_v37 = vld [vmem:[%s5224_s21 + $0x78] sm:$0xff]  ;;  %p4810_p6 = scmp.ne.s32.totalorder %s6828_s14, %s4809_s17  ;;  %p7355_p9 = scmp.ne.s32.totalorder %s7031_s22, 0 }
  0xd5   : > { %v443_v16 = vadd.f32 %v427_v11, %v426_v10  ;;  %v434_v29 = vmul.f32 %v5291_v24, %v5291_v24  ;;  %v435_v30 = vmul.f32 %v5294_v25, %v5294_v25  ;;  %v412_v31 = vadd.f32 %v5300_v27, %v5297_v26  ;;  %v5321_v38 = vld [vmem:[%s5224_s21 + $0x60] sm:$0xff]  ;;  %v5324_v39 = vld [vmem:[%s5224_s21 + $0x68] sm:$0xff]  ;;  %v466_v18 = vld [vmem:[#allocation8 + $0x10] sm:$0xff]  ;;  %s4902_s18 = smov [#allocation14]  }
  0xd6   : > { %v446_v23 = vadd.f32 %v429_v21, %v428_v20  ;;  %v432_v32 = vmul.f32 %v5297_v26, %v5297_v26  ;;  %v433_v33 = vmul.f32 %v5300_v27, %v5300_v27  ;;  %v421_v40 = vadd.f32 %v5318_v37, %v5315_v36  ;;  %v464_v48 = vld [vmem:[#allocation8] sm:$0xff]  ;;  %v469_v21 = vld [vmem:[#allocation8 + $0x28] sm:$0xff]  ;;  %p4811_p12 = pnand %p4810_p6, %p7355_p9  ;;  %s4813_s29 = sshll.u32 %s4902_s18, 4  ;;  %s4814_s29 = int_to_ptr.vmem [resolvable:$false] %s4813_s29 }
  0xd7   : > { %441 = vadd.xlane.f32.xlu1 %v440_v12  ;;  %v455_v34 = vadd.f32 %v435_v30, %v434_v29  ;;  %v438_v41 = vmul.f32 %v5315_v36, %v5315_v36  ;;  %v439_v42 = vmul.f32 %v5318_v37, %v5318_v37  ;;  %v418_v43 = vadd.f32 %v5324_v39, %v5321_v38  ;;  %v468_v20 = vld [vmem:[#allocation8 + $0x20] sm:$0xff]  ;;  %s4815_s15 = scalar_lea.vmem %s4814_s29, 4096  ;;  %p4816_p13 = scmp.lt.s32.totalorder %s6828_s14, %s4814_s29 }
  0xd8   : > { %404 = vadd.xlane.f32.xlu0 %v403_v13  ;;  %v452_v35 = vadd.f32 %v433_v33, %v432_v32  ;;  %v436_v44 = vmul.f32 %v5321_v38, %v5321_v38  ;;  %v437_v45 = vmul.f32 %v5324_v39, %v5324_v39  ;;  %3822 = vmatprep.mubr.msk.f32.mxu0 %vm472_vm0, %v464_v48  ;;  %p4812_p1 = pneg %p4811_p12  ;;  %p4817_p0 = scmp.lt.s32.totalorder %s4815_s15, %s4809_s17 }
  0xd9   : > { %v461_v46 = vadd.f32 %v439_v42, %v438_v41  ;;  %3850 = vmatprep.mubr.msk.f32.mxu1 %vm472_vm0, %v464_v48 }
  0xda   : > { %v458_v47 = vadd.f32 %v437_v45, %v436_v44  ;;  %p4818_p2 = por %p4817_p0, %p4816_p13 }
  0xdb   : > { %444 = vadd.xlane.f32.xlu1 %v443_v16  ;;  %v465_v16 = vld [vmem:[#allocation8 + $0x8] sm:$0xff] }
  0xdc   : > { %407 = vadd.xlane.f32.xlu0 %v406_v19  ;;  %v467_v19 = vld [vmem:[#allocation8 + $0x18] sm:$0xff]  ;;  %p4819_p8 = pnand %p4818_p2, %p4812_p1 }
  0xdf   : > { %450 = vadd.xlane.f32.xlu1 %v449_v22  ;;  %v470_v22 = vld [vmem:[#allocation8 + $0x30] sm:$0xff] }
  0xe0   : > { %447 = vadd.xlane.f32.xlu0 %v446_v23  ;;  %v471_v23 = vld [vmem:[#allocation8 + $0x38] sm:$0xff] }
  0xe3   : > { %416 = vadd.xlane.f32.xlu1 %v415_v28  ;;  %v4900_v28 = vmov 0  }
  0xe4   : > { %413 = vadd.xlane.f32.xlu0 %v412_v31  ;;  %4193 = vset.pattern.permute.xlu1 %v4900_v28 }
  0xe5   : > { %4194 = vset.pattern.permute.xlu0 %v4900_v28 }
  0xe7   : > { %456 = vadd.xlane.f32.xlu1 %v455_v34 }
  0xe8   : > { %453 = vadd.xlane.f32.xlu0 %v452_v35 }
  0xeb   : > { %422 = vadd.xlane.f32.xlu1 %v421_v40 }
  0xec   : > { %419 = vadd.xlane.f32.xlu0 %v418_v43 }
  0xef   : > { %462 = vadd.xlane.f32.xlu1 %v461_v46 }
  0xf0   : > { %459 = vadd.xlane.f32.xlu0 %v458_v47 }
 0x160   : > { %v411_v49 = vpop.xlane.xlu1 %410 }
 0x161   : > { %v402_v50 = vpop.xlane.xlu0 %401 }
 0x164   : > { %v442_v51 = vpop.xlane.xlu1 %441 }
 0x165   : > { %v405_v52 = vpop.xlane.xlu0 %404 }
 0x166   : > { %v3862_v53 = vpack.c.bf16 %v405_v52, %v402_v50 }
 0x168   : > { %3863 = vmatprep.subr.bf16.mxu0 %v3862_v53  ;;  %v445_v54 = vpop.xlane.xlu1 %444 }
 0x169   : > { %3865 = vmatpush3.bf16.msra.mxu0 %v3862_v53  ;;  %v408_v55 = vpop.xlane.xlu0 %407  ;;  %v3878_v56 = vpack.c.bf16 %v445_v54, %v442_v51 }
 0x16a   : > { %v3866_v57 = vpack.c.bf16 %v411_v49, %v408_v55 }
 0x16b   : > { %3879 = vmatprep.subr.bf16.mxu1 %v3878_v56 }
 0x16c   : > { %3867 = vmatprep.subr.bf16.mxu0 %v3866_v57  ;;  %3881 = vmatpush3.bf16.msra.mxu1 %v3878_v56  ;;  %v451_v58 = vpop.xlane.xlu1 %450 }
 0x16d   : > { %3869 = vmatpush3.bf16.msra.mxu0 %v3866_v57  ;;  %v448_v59 = vpop.xlane.xlu0 %447 }
 0x16e   : > { %v3882_v60 = vpack.c.bf16 %v451_v58, %v448_v59 }
 0x170   : > { %3883 = vmatprep.subr.bf16.mxu1 %v3882_v60  ;;  %v417_v61 = vpop.xlane.xlu1 %416 }
 0x171   : > { %3885 = vmatpush3.bf16.msra.mxu1 %v3882_v60  ;;  %v414_v62 = vpop.xlane.xlu0 %413 }
 0x172   : > { %v3870_v63 = vpack.c.bf16 %v417_v61, %v414_v62 }
 0x174   : > { %3871 = vmatprep.subr.bf16.mxu0 %v3870_v63  ;;  %v457_v3 = vpop.xlane.xlu1 %456 }
 0x175   : > { %3873 = vmatpush3.bf16.msra.mxu0 %v3870_v63  ;;  %v454_v5 = vpop.xlane.xlu0 %453 }
 0x176   : > { %v3886_v8 = vpack.c.bf16 %v457_v3, %v454_v5 }
 0x178   : > { %3887 = vmatprep.subr.bf16.mxu1 %v3886_v8  ;;  %v423_v9 = vpop.xlane.xlu1 %422 }
 0x179   : > { %3889 = vmatpush3.bf16.msra.mxu1 %v3886_v8  ;;  %v420_v10 = vpop.xlane.xlu0 %419 }
 0x17a   : > { %v3874_v11 = vpack.c.bf16 %v423_v9, %v420_v10 }
 0x17c   : > { %3875 = vmatprep.subr.bf16.mxu0 %v3874_v11  ;;  %v463_v12 = vpop.xlane.xlu1 %462 }
 0x17d   : > { %3877 = vmatpush3.bf16.msra.mxu0 %v3874_v11  ;;  %v460_v13 = vpop.xlane.xlu0 %459 }
 0x17e   : > { %v3890_v17 = vpack.c.bf16 %v463_v12, %v460_v13 }
 0x180   : > { %3891 = vmatprep.subr.bf16.mxu1 %v3890_v17  ;;  %3823 = vmatmul.mubr.msk.f32.vlgmr.msra.gmra.mrb[0].mxu0 %vm472_vm0, %v465_v16 }
 0x181   : > { %3893 = vmatpush3.bf16.msra.mxu1 %v3890_v17  ;;  %3825 = vmatprep.mubr.msk.f32.mxu0 %vm472_vm0, %v466_v18 }
 0x184   : > { %3851 = vmatmul.mubr.msk.f32.vlgmr.msra.gmra.mrb[0].mxu1 %vm472_vm0, %v465_v16  ;;  %3826 = vmatmul.mubr.msk.f32.gmra.mrb[2].mxu0 %vm472_vm0, %v467_v19 }
 0x185   : > { %3853 = vmatprep.mubr.msk.f32.mxu1 %vm472_vm0, %v466_v18  ;;  %3828 = vmatprep.mubr.msk.f32.mxu0 %vm472_vm0, %v468_v20 }
 0x188   : > { %3854 = vmatmul.mubr.msk.f32.gmra.mrb[2].mxu1 %vm472_vm0, %v467_v19  ;;  %3829 = vmatmul.mubr.msk.f32.gmra.mrb[4].mxu0 %vm472_vm0, %v469_v21 }
 0x189   : > { %3856 = vmatprep.mubr.msk.f32.mxu1 %vm472_vm0, %v468_v20  ;;  %3831 = vmatprep.mubr.msk.f32.mxu0 %vm472_vm0, %v470_v22 }
 0x18c   : > { %3857 = vmatmul.mubr.msk.f32.gmra.mrb[4].mxu1 %vm472_vm0, %v469_v21  ;;  %3832 = vmatmul.mubr.msk.f32.gmra.mrb[6].mxu0 %vm472_vm0, %v471_v23 }
 0x18d   : > { %3859 = vmatprep.mubr.msk.f32.mxu1 %vm472_vm0, %v470_v22 }
 0x190   : > { %3860 = vmatmul.mubr.msk.f32.gmra.mrb[6].mxu1 %vm472_vm0, %v471_v23 }
 0x253   : > { %v3824_v29 = vpop.f32.mrb[0].mxu0 }
 0x254   : > { %v5354_v30 = vmul.f32 0.001953125, %v3824_v29  ;;  %v563_v31 = vpop.f32.mrb[1].mxu0 }
 0x255   : > { %v5356_v32 = vmul.f32 0.001953125, %v563_v31 }
 0x256   : > { %v724_v33 = vmul.f32 %v5354_v30, %v5354_v30 }
 0x257   : > { %v723_v34 = vmul.f32 %v5356_v32, %v5356_v32  ;;  %v3852_v35 = vpop.f32.mrb[0].mxu1  ;;  %v3827_v40 = vpop.f32.mrb[2].mxu0 }
 0x258   : > { %v716_v41 = vmul.f32 0.001953125, %v3852_v35  ;;  %v668_v42 = vpop.f32.mrb[1].mxu1  ;;  %v5362_v43 = vmul.f32 0.001953125, %v3827_v40  ;;  %v573_v44 = vpop.f32.mrb[3].mxu0  ;;  %v756_v40 = vld [vmem:[#allocation5 + $0x8] sm:$0xff] }
 0x259   : > { %v715_v45 = vmul.f32 0.001953125, %v668_v42  ;;  %v5364_v46 = vmul.f32 0.001953125, %v573_v44  ;;  %v755_v42 = vld [vmem:[#allocation5] sm:$0xff] }
 0x25a   : > { %v732_v47 = vsub.f32 %v716_v41, %v724_v33  ;;  %v726_v48 = vmul.f32 %v5362_v43, %v5362_v43 }
 0x25b   : > { %v731_v49 = vsub.f32 %v715_v45, %v723_v34  ;;  %v725_v50 = vmul.f32 %v5364_v46, %v5364_v46  ;;  %v3855_v51 = vpop.f32.mrb[2].mxu1  ;;  %v3830_v52 = vpop.f32.mrb[4].mxu0 }
 0x25c   : > { %v740_v53 = vadd.f32 1e-05, %v732_v47  ;;  %v718_v54 = vmul.f32 0.001953125, %v3855_v51  ;;  %v678_v55 = vpop.f32.mrb[3].mxu1  ;;  %v5370_v56 = vmul.f32 0.001953125, %v3830_v52  ;;  %v583_v57 = vpop.f32.mrb[5].mxu0 }
 0x25d   : > { %v739_v58 = vadd.f32 1e-05, %v731_v49  ;;  %v717_v59 = vmul.f32 0.001953125, %v678_v55  ;;  %v5372_v60 = vmul.f32 0.001953125, %v583_v57  ;;  %v772_v51 = vld [vmem:[#allocation7 + $0x8] sm:$0xff]  ;;  %v758_v52 = vld [vmem:[#allocation5 + $0x18] sm:$0xff] }
 0x25e   : > { %4195 = vrsqrt.f32 %v740_v53  ;;  %v734_v61 = vsub.f32 %v718_v54, %v726_v48  ;;  %v728_v62 = vmul.f32 %v5370_v56, %v5370_v56  ;;  %v757_v54 = vld [vmem:[#allocation5 + $0x10] sm:$0xff] }
 0x25f   : > { %4197 = vrsqrt.f32 %v739_v58  ;;  %v733_v63 = vsub.f32 %v717_v59, %v725_v50  ;;  %v727_v3 = vmul.f32 %v5372_v60, %v5372_v60  ;;  %v3858_v5 = vpop.f32.mrb[4].mxu1  ;;  %v3833_v8 = vpop.f32.mrb[6].mxu0 }
 0x260   : > { %v742_v9 = vadd.f32 1e-05, %v734_v61  ;;  %v720_v10 = vmul.f32 0.001953125, %v3858_v5  ;;  %v688_v11 = vpop.f32.mrb[5].mxu1  ;;  %v5378_v12 = vmul.f32 0.001953125, %v3833_v8  ;;  %v593_v13 = vpop.f32.mrb[7].mxu0 }
 0x261   : > { %v741_v16 = vadd.f32 1e-05, %v733_v63  ;;  %v719_v17 = vmul.f32 0.001953125, %v688_v11  ;;  %v5380_v18 = vmul.f32 0.001953125, %v593_v13  ;;  %v759_v5 = vld [vmem:[#allocation5 + $0x20] sm:$0xff]  ;;  %v776_v13 = vld [vmem:[#allocation7 + $0x28] sm:$0xff] }
 0x262   : > { %4199 = vrsqrt.f32 %v742_v9  ;;  %v736_v19 = vsub.f32 %v720_v10, %v728_v62  ;;  %v730_v20 = vmul.f32 %v5378_v12, %v5378_v12  ;;  %v760_v62 = vld [vmem:[#allocation5 + $0x28] sm:$0xff] }
 0x263   : > { %4201 = vrsqrt.f32 %v741_v16  ;;  %v735_v21 = vsub.f32 %v719_v17, %v727_v3  ;;  %v729_v22 = vmul.f32 %v5380_v18, %v5380_v18  ;;  %v3861_v23 = vpop.f32.mrb[6].mxu1  ;;  %v762_v16 = vld [vmem:[#allocation5 + $0x38] sm:$0xff] }
 0x264   : > { %v744_v28 = vadd.f32 1e-05, %v736_v19  ;;  %v722_v29 = vmul.f32 0.001953125, %v3861_v23  ;;  %v698_v31 = vpop.f32.mrb[7].mxu1  ;;  %v761_v19 = vld [vmem:[#allocation5 + $0x30] sm:$0xff] }
 0x265   : > { %v743_v33 = vadd.f32 1e-05, %v735_v21  ;;  %v721_v34 = vmul.f32 0.001953125, %v698_v31  ;;  %v778_v31 = vld [vmem:[#allocation7 + $0x38] sm:$0xff] }
 0x266   : > { %4203 = vrsqrt.f32 %v744_v28  ;;  %v738_v35 = vsub.f32 %v722_v29, %v730_v20 }
 0x267   : > { %4205 = vrsqrt.f32 %v743_v33  ;;  %v737_v41 = vsub.f32 %v721_v34, %v729_v22  ;;  %v774_v34 = vld [vmem:[#allocation7 + $0x18] sm:$0xff] }
 0x268   : > { %v4196_v44 = vpop.eup %4195  ;;  %v746_v45 = vadd.f32 1e-05, %v738_v35 }
 0x269   : > { %v4198_v47 = vpop.eup %4197  ;;  %v745_v48 = vadd.f32 1e-05, %v737_v41  ;;  %v764_v49 = vmul.f32 %v4196_v44, %v756_v40  ;;  %v773_v40 = vld [vmem:[#allocation7 + $0x10] sm:$0xff]  ;;  %v775_v41 = vld [vmem:[#allocation7 + $0x20] sm:$0xff] }
 0x26a   : > { %4207 = vrsqrt.f32 %v746_v45  ;;  %v763_v50 = vmul.f32 %v4198_v47, %v755_v42  ;;  %v777_v44 = vld [vmem:[#allocation7 + $0x30] sm:$0xff]  ;;  %v6886_v45 = vmov 0.0  }
 0x26b   : > { %4209 = vrsqrt.f32 %v745_v48  ;;  %802 = vperm.xlu1 %4193, %v764_v49   ;;  %v780_v53 = vmul.f32 %v764_v49, %v5354_v30  ;;  %v771_v30 = vld [vmem:[#allocation7] sm:$0xff]  ;;  %1067 = vmatprep.mubr.f32.mxu0 %v6886_v45 }
 0x26c   : > { %v4200_v55 = vpop.eup %4199  ;;  %797 = vperm.xlu0 %4194, %v763_v50   ;;  %v779_v57 = vmul.f32 %v763_v50, %v5356_v32  ;;  %1445 = vmatprep.mubr.f32.mxu1 %v6886_v45 }
 0x26d   : > { %v4202_v58 = vpop.eup %4201  ;;  %v788_v59 = vsub.f32 %v772_v51, %v780_v53  ;;  %v766_v61 = vmul.f32 %v4200_v55, %v758_v52 }
 0x26e   : > { %v765_v63 = vmul.f32 %v4202_v58, %v757_v54 }
 0x26f   : > { %858 = vperm.xlu1 %4193, %v788_v59   ;;  %v782_v3 = vmul.f32 %v766_v61, %v5362_v43  ;;  %v787_v43 = vsub.f32 %v771_v30, %v779_v57 }
 0x270   : > { %v4204_v8 = vpop.eup %4203  ;;  %v781_v9 = vmul.f32 %v765_v63, %v5364_v46 }
 0x271   : > { %v4206_v10 = vpop.eup %4205  ;;  %v768_v11 = vmul.f32 %v4204_v8, %v760_v62  ;;  %v790_v35 = vsub.f32 %v774_v34, %v782_v3 }
 0x272   : > { %v767_v17 = vmul.f32 %v4206_v10, %v759_v5 }
 0x273   : > { %812 = vperm.xlu1 %4193, %v766_v61   ;;  %822 = vperm.xlu0 %4194, %v768_v11   ;;  %v784_v32 = vmul.f32 %v768_v11, %v5370_v56 }
 0x274   : > { %v4208_v20 = vpop.eup %4207  ;;  %v783_v21 = vmul.f32 %v767_v17, %v5372_v60  ;;  %v789_v60 = vsub.f32 %v773_v40, %v781_v9 }
 0x275   : > { %v4210_v22 = vpop.eup %4209  ;;  %v792_v23 = vsub.f32 %v776_v13, %v784_v32  ;;  %v770_v28 = vmul.f32 %v4208_v20, %v762_v16 }
 0x276   : > { %v769_v29 = vmul.f32 %v4210_v22, %v761_v19  ;;  %v791_v42 = vsub.f32 %v775_v41, %v783_v21 }
 0x277   : > { %853 = vperm.xlu1 %4193, %v787_v43   ;;  %878 = vperm.xlu0 %4194, %v792_v23   ;;  %v786_v46 = vmul.f32 %v770_v28, %v5378_v12 }
 0x278   : > { %v785_v33 = vmul.f32 %v769_v29, %v5380_v18 }
 0x279   : > { %v794_v56 = vsub.f32 %v778_v31, %v786_v46 }
 0x27a   : > { %v793_v12 = vsub.f32 %v777_v44, %v785_v33  ;;  %v912_v44 = vld [vmem:[#allocation10 + $0x28] sm:$0xff] }
 0x27b   : > { %807 = vperm.xlu1 %4193, %v765_v63   ;;  %832 = vperm.xlu0 %4194, %v770_v28  }
 0x27f   : > { %868 = vperm.xlu1 %4193, %v790_v35   ;;  %888 = vperm.xlu0 %4194, %v794_v56  }
 0x283   : > { %863 = vperm.xlu1 %4193, %v789_v60  }
 0x287   : > { %817 = vperm.xlu1 %4193, %v767_v17  }
 0x28b   : > { %873 = vperm.xlu1 %4193, %v791_v42   ;;  %v907_v42 = vld [vmem:[#allocation10] sm:$0xff] }
 0x28f   : > { %827 = vperm.xlu1 %4193, %v769_v29  }
 0x293   : > { %883 = vperm.xlu1 %4193, %v793_v12   ;;  %v913_v12 = vld [vmem:[#allocation10 + $0x30] sm:$0xff] }
 0x2ea   : > { %v803_v18 = vpop.permute.xlu1 %802 }
 0x2eb   : > { %v798_v48 = vpop.permute.xlu0 %797  ;;  %v837_v50 = vmul.f32 %v803_v18, %v5259_v6  ;;  %v838_v51 = vmul.f32 %v803_v18, %v5262_v7  ;;  %v914_v18 = vld [vmem:[#allocation10 + $0x38] sm:$0xff] }
 0x2ec   : > { %v835_v52 = vmul.f32 %v798_v48, %v5249_v2  ;;  %v836_v53 = vmul.f32 %v798_v48, %v5254_v4  ;;  %v916_v48 = vld [vmem:[#allocation10 + $0x48] sm:$0xff] }
 0x2ee   : > { %v859_v47 = vpop.permute.xlu1 %858 }
 0x2ef   : > { %v893_v55 = vadd.f32 %v859_v47, %v837_v50  ;;  %v894_v57 = vadd.f32 %v859_v47, %v838_v51  ;;  %v915_v47 = vld [vmem:[#allocation10 + $0x40] sm:$0xff]  ;;  %v918_v50 = vld [vmem:[#allocation10 + $0x58] sm:$0xff] }
 0x2f0   : > { %v919_v51 = vld [vmem:[#allocation10 + $0x60] sm:$0xff] }
 0x2f2   : > { %v813_v49 = vpop.permute.xlu1 %812  ;;  %v823_v3 = vpop.permute.xlu0 %822 }
 0x2f3   : > { %v841_v6 = vmul.f32 %v813_v49, %v5243_v0  ;;  %v842_v7 = vmul.f32 %v813_v49, %v5246_v1  ;;  %v845_v19 = vmul.f32 %v823_v3, %v5291_v24  ;;  %v846_v20 = vmul.f32 %v823_v3, %v5294_v25  ;;  %v917_v49 = vld [vmem:[#allocation10 + $0x50] sm:$0xff] }
 0x2f6   : > { %v854_v54 = vpop.permute.xlu1 %853  ;;  %v879_v13 = vpop.permute.xlu0 %878 }
 0x2f7   : > { %v891_v58 = vadd.f32 %v854_v54, %v835_v52  ;;  %v892_v59 = vadd.f32 %v854_v54, %v836_v53  ;;  %v901_v21 = vadd.f32 %v879_v13, %v845_v19  ;;  %v902_v22 = vadd.f32 %v879_v13, %v846_v20  ;;  %v920_v52 = vld [vmem:[#allocation10 + $0x68] sm:$0xff]  ;;  %v921_v53 = vld [vmem:[#allocation10 + $0x70] sm:$0xff]  ;;  %v922_v54 = vld [vmem:[#allocation10 + $0x78] sm:$0xff] }
 0x2f9   : > { %v3896_v61 = vpack.c.bf16 %v893_v55, %v891_v58  ;;  %v3894_v62 = vpack.c.bf16 %v894_v57, %v892_v59  ;;  %v923_v55 = vld [vmem:[#allocation10 + $0x80] sm:$0xff]  ;;  %v924_v57 = vld [vmem:[#allocation10 + $0x88] sm:$0xff]  ;;  %v925_v58 = vld [vmem:[#allocation10 + $0x90] sm:$0xff] }
 0x2fa   : > { %v808_v63 = vpop.permute.xlu1 %807  ;;  %v926_v59 = vld [vmem:[#allocation10 + $0x98] sm:$0xff] }
 0x2fb   : > { %3895 = vmatprep.subr.bf16.mxu0 %v3894_v62  ;;  %v839_v2 = vmul.f32 %v808_v63, %v5275_v14  ;;  %v840_v4 = vmul.f32 %v808_v63, %v5278_v15  ;;  %v833_v14 = vpop.permute.xlu0 %832 }
 0x2fc   : > { %3897 = vmatpush1.bf16.msra.mxu0 %v3896_v61  ;;  %v849_v31 = vmul.f32 %v833_v14, %v5315_v36  ;;  %v850_v24 = vmul.f32 %v833_v14, %v5318_v37  ;;  %v908_v36 = vld [vmem:[#allocation10 + $0x8] sm:$0xff]  ;;  %v909_v37 = vld [vmem:[#allocation10 + $0x10] sm:$0xff] }
 0x2fe   : > { %v869_v5 = vpop.permute.xlu1 %868 }
 0x2ff   : > { %v897_v9 = vadd.f32 %v869_v5, %v841_v6  ;;  %v898_v10 = vadd.f32 %v869_v5, %v842_v7  ;;  %v889_v25 = vpop.permute.xlu0 %888 }
 0x300   : > { %v905_v34 = vadd.f32 %v889_v25, %v849_v31  ;;  %v906_v56 = vadd.f32 %v889_v25, %v850_v24  ;;  %v930_v24 = vld [vmem:[#allocation10 + $0xb8] sm:$0xff] }
 0x302   : > { %v864_v8 = vpop.permute.xlu1 %863 }
 0x303   : > { %v895_v11 = vadd.f32 %v864_v8, %v839_v2  ;;  %v896_v30 = vadd.f32 %v864_v8, %v840_v4 }
 0x305   : > { %v3900_v16 = vpack.c.bf16 %v897_v9, %v895_v11  ;;  %v3898_v17 = vpack.c.bf16 %v898_v10, %v896_v30 }
 0x306   : > { %v818_v32 = vpop.permute.xlu1 %817 }
 0x307   : > { %3899 = vmatprep.subr.bf16.mxu0 %v3898_v17  ;;  %v843_v0 = vmul.f32 %v818_v32, %v5297_v26  ;;  %v844_v1 = vmul.f32 %v818_v32, %v5300_v27 }
 0x308   : > { %3901 = vmatpush1.bf16.msra.mxu0 %v3900_v16 }
 0x30a   : > { %v874_v15 = vpop.permute.xlu1 %873 }
 0x30b   : > { %v899_v43 = vadd.f32 %v874_v15, %v843_v0  ;;  %v900_v23 = vadd.f32 %v874_v15, %v844_v1 }
 0x30d   : > { %v3904_v28 = vpack.c.bf16 %v901_v21, %v899_v43  ;;  %v3902_v29 = vpack.c.bf16 %v902_v22, %v900_v23 }
 0x30e   : > { %v828_v46 = vpop.permute.xlu1 %827 }
 0x30f   : > { %3903 = vmatprep.subr.bf16.mxu0 %v3902_v29  ;;  %v847_v26 = vmul.f32 %v828_v46, %v5321_v38  ;;  %v848_v27 = vmul.f32 %v828_v46, %v5324_v39  ;;  %v910_v38 = vld [vmem:[#allocation10 + $0x18] sm:$0xff]  ;;  %v911_v39 = vld [vmem:[#allocation10 + $0x20] sm:$0xff]  ;;  %v928_v29 = vld [vmem:[#allocation10 + $0xa8] sm:$0xff] }
 0x310   : > { %3905 = vmatpush1.bf16.msra.mxu0 %v3904_v28  ;;  %v927_v28 = vld [vmem:[#allocation10 + $0xa0] sm:$0xff]  ;;  %v929_v46 = vld [vmem:[#allocation10 + $0xb0] sm:$0xff] }
 0x312   : > { %v884_v33 = vpop.permute.xlu1 %883 }
 0x313   : > { %v903_v35 = vadd.f32 %v884_v33, %v847_v26  ;;  %v904_v40 = vadd.f32 %v884_v33, %v848_v27 }
 0x315   : > { %v3908_v60 = vpack.c.bf16 %v905_v34, %v903_v35  ;;  %v3906_v41 = vpack.c.bf16 %v906_v56, %v904_v40 }
 0x317   : > { %3907 = vmatprep.subr.bf16.mxu0 %v3906_v41 }
 0x318   : > { %3909 = vmatpush1.bf16.msra.mxu0 %v3908_v60 }
 0x31b   : > { %3671 = vmatmul.mubr.msk.f32.vlgmr.msra.gmra.mrb[8].mxu0 %vm472_vm0, %v907_v42 }
 0x31c   : > { %1073 = vmatprep.mubr.f32.mxu0 %v6886_v45 }
 0x31f   : > { %3672 = vmatmul.mubr.msk.f32.gmra.mrb[10].mxu0 %vm472_vm0, %v908_v36 }
 0x320   : > { %1079 = vmatprep.mubr.f32.mxu0 %v6886_v45 }
 0x323   : > { %3673 = vmatmul.mubr.msk.f32.gmra.mrb[12].mxu0 %vm472_vm0, %v909_v37 }
 0x324   : > { %1085 = vmatprep.mubr.f32.mxu0 %v6886_v45 }
 0x327   : > { %3674 = vmatmul.mubr.msk.f32.gmra.mrb[14].mxu0 %vm472_vm0, %v910_v38 }
 0x328   : > { %1091 = vmatprep.mubr.f32.mxu0 %v6886_v45 }
 0x32b   : > { %3675 = vmatmul.mubr.msk.f32.gmra.mrb[16].mxu0 %vm472_vm0, %v911_v39 }
 0x32c   : > { %1097 = vmatprep.mubr.f32.mxu0 %v6886_v45 }
 0x32f   : > { %3676 = vmatmul.mubr.msk.f32.gmra.mrb[18].mxu0 %vm472_vm0, %v912_v44 }
 0x330   : > { %1103 = vmatprep.mubr.f32.mxu0 %v6886_v45 }
 0x333   : > { %3677 = vmatmul.mubr.msk.f32.gmra.mrb[20].mxu0 %vm472_vm0, %v913_v12 }
 0x334   : > { %1109 = vmatprep.mubr.f32.mxu0 %v6886_v45 }
 0x337   : > { %3678 = vmatmul.mubr.msk.f32.gmra.mrb[22].mxu0 %vm472_vm0, %v914_v18 }
 0x338   : > { %1115 = vmatprep.mubr.f32.mxu0 %v6886_v45 }
 0x33b   : > { %3679 = vmatmul.mubr.msk.f32.gmra.mrb[24].mxu0 %vm472_vm0, %v915_v47 }
 0x33c   : > { %1121 = vmatprep.mubr.f32.mxu0 %v6886_v45 }
 0x33f   : > { %3680 = vmatmul.mubr.msk.f32.gmra.mrb[26].mxu0 %vm472_vm0, %v916_v48 }
 0x340   : > { %1127 = vmatprep.mubr.f32.mxu0 %v6886_v45 }
 0x343   : > { %3681 = vmatmul.mubr.msk.f32.gmra.mrb[28].mxu0 %vm472_vm0, %v917_v49 }
 0x344   : > { %1133 = vmatprep.mubr.f32.mxu0 %v6886_v45 }
 0x347   : > { %3682 = vmatmul.mubr.msk.f32.gmra.mrb[30].mxu0 %vm472_vm0, %v918_v50 }
 0x348   : > { %1139 = vmatprep.mubr.f32.mxu0 %v6886_v45 }
 0x34b   : > { %3683 = vmatmul.mubr.msk.f32.gmra.mrb[32].mxu0 %vm472_vm0, %v919_v51 }
 0x34c   : > { %1145 = vmatprep.mubr.f32.mxu0 %v6886_v45 }
 0x34f   : > { %3684 = vmatmul.mubr.msk.f32.gmra.mrb[34].mxu0 %vm472_vm0, %v920_v52 }
 0x350   : > { %1151 = vmatprep.mubr.f32.mxu0 %v6886_v45 }
 0x353   : > { %3685 = vmatmul.mubr.msk.f32.gmra.mrb[36].mxu0 %vm472_vm0, %v921_v53 }
 0x354   : > { %1157 = vmatprep.mubr.f32.mxu0 %v6886_v45 }
 0x357   : > { %3686 = vmatmul.mubr.msk.f32.gmra.mrb[38].mxu0 %vm472_vm0, %v922_v54 }
 0x358   : > { %1163 = vmatprep.mubr.f32.mxu0 %v6886_v45 }
 0x35b   : > { %3687 = vmatmul.mubr.msk.f32.gmra.mrb[40].mxu0 %vm472_vm0, %v923_v55 }
 0x35c   : > { %1169 = vmatprep.mubr.f32.mxu0 %v6886_v45 }
 0x35f   : > { %3688 = vmatmul.mubr.msk.f32.gmra.mrb[42].mxu0 %vm472_vm0, %v924_v57 }
 0x360   : > { %1175 = vmatprep.mubr.f32.mxu0 %v6886_v45 }
 0x363   : > { %3689 = vmatmul.mubr.msk.f32.gmra.mrb[44].mxu0 %vm472_vm0, %v925_v58 }
 0x364   : > { %1181 = vmatprep.mubr.f32.mxu0 %v6886_v45 }
 0x367   : > { %3690 = vmatmul.mubr.msk.f32.gmra.mrb[46].mxu0 %vm472_vm0, %v926_v59 }
 0x368   : > { %1187 = vmatprep.mubr.f32.mxu0 %v6886_v45 }
 0x36b   : > { %3691 = vmatmul.mubr.msk.f32.gmra.mrb[48].mxu0 %vm472_vm0, %v927_v28 }
 0x36c   : > { %1193 = vmatprep.mubr.f32.mxu0 %v6886_v45 }
 0x36f   : > { %3692 = vmatmul.mubr.msk.f32.gmra.mrb[50].mxu0 %vm472_vm0, %v928_v29 }
 0x370   : > { %1199 = vmatprep.mubr.f32.mxu0 %v6886_v45 }
 0x373   : > { %3693 = vmatmul.mubr.msk.f32.gmra.mrb[52].mxu0 %vm472_vm0, %v929_v46 }
 0x374   : > { %1205 = vmatprep.mubr.f32.mxu0 %v6886_v45 }
 0x377   : > { %3694 = vmatmul.mubr.msk.f32.gmra.mrb[54].mxu0 %vm472_vm0, %v930_v24 }
 0x3ee   : > { %v1069_v61 = vpop.f32.mrb[8].mxu0 }
 0x3ef   : > { %v1212_v62 = vmul.f32 0.125, %v1069_v61  ;;  %v1071_v63 = vpop.f32.mrb[9].mxu0 }
 0x3f0   : > { %v1213_v3 = vmul.f32 0.125, %v1071_v63 }
 0x3f1   : > { %1220 = vxpose.xlu1.b32.start [1/4] (short) %v1212_v62, 128 }
 0x3f2   : > { %1252 = vxpose.xlu0.b32.start [1/4] (short) %v1213_v3, 128  ;;  %v1075_v5 = vpop.f32.mrb[10].mxu0 }
 0x3f3   : > { %v1214_v6 = vmul.f32 0.125, %v1075_v5  ;;  %v1077_v7 = vpop.f32.mrb[11].mxu0 }
 0x3f4   : > { %v1215_v2 = vmul.f32 0.125, %v1077_v7 }
 0x3f5   : > { %1221 = vxpose.xlu1.b32.cont [2/4] (short) %v1214_v6, 128 }
 0x3f6   : > { %1253 = vxpose.xlu0.b32.cont [2/4] (short) %v1215_v2, 128  ;;  %v1081_v4 = vpop.f32.mrb[12].mxu0 }
 0x3f7   : > { %v1216_v8 = vmul.f32 0.125, %v1081_v4  ;;  %v1083_v9 = vpop.f32.mrb[13].mxu0 }
 0x3f8   : > { %v1217_v10 = vmul.f32 0.125, %v1083_v9 }
 0x3f9   : > { %1222 = vxpose.xlu1.b32.cont [3/4] (short) %v1216_v8, 128 }
 0x3fa   : > { %1254 = vxpose.xlu0.b32.cont [3/4] (short) %v1217_v10, 128  ;;  %v1087_v11 = vpop.f32.mrb[14].mxu0 }
 0x3fb   : > { %v1218_v30 = vmul.f32 0.125, %v1087_v11  ;;  %v1089_v13 = vpop.f32.mrb[15].mxu0 }
 0x3fc   : > { %v1219_v16 = vmul.f32 0.125, %v1089_v13 }
 0x3fd   : > { %1223 = vxpose.xlu1.b32.end [4/4] (short) %v1218_v30, 128 }
 0x3fe   : > { %1255 = vxpose.xlu0.b32.end [4/4] (short) %v1219_v16, 128  ;;  %v1093_v17 = vpop.f32.mrb[16].mxu0 }
 0x3ff   : > { %v1095_v32 = vpop.f32.mrb[17].mxu0 }
 0x402   : > { %v1099_v19 = vpop.f32.mrb[18].mxu0 }
 0x403   : > { %v3912_v20 = vpack.c.bf16 %v1099_v19, %v1093_v17  ;;  %v1101_v0 = vpop.f32.mrb[19].mxu0 }
 0x404   : > { %v3910_v1 = vpack.c.bf16 %v1101_v0, %v1095_v32 }
 0x406   : > { %3911 = vmatprep.subr.bf16.mxu1 %v3910_v1  ;;  %v1105_v14 = vpop.f32.mrb[20].mxu0 }
 0x407   : > { %3913 = vmatpush1.bf16.msra.mxu1 %v3912_v20  ;;  %v1107_v15 = vpop.f32.mrb[21].mxu0 }
 0x40a   : > { %v1111_v21 = vpop.f32.mrb[22].mxu0 }
 0x40b   : > { %v3916_v22 = vpack.c.bf16 %v1111_v21, %v1105_v14  ;;  %v1113_v43 = vpop.f32.mrb[23].mxu0 }
 0x40c   : > { %v3914_v23 = vpack.c.bf16 %v1113_v43, %v1107_v15 }
 0x40e   : > { %3915 = vmatprep.subr.bf16.mxu1 %v3914_v23  ;;  %v5458_v31 = vpop.f32.mrb[24].mxu0 }
 0x40f   : > { %3917 = vmatpush1.bf16.msra.mxu1 %v3916_v22  ;;  %7041 = vst [vmem:[#allocation20_spill] sm:$0xff] %v5458_v31  ;;  %v1119_v25 = vpop.f32.mrb[25].mxu0 }
 0x410   : > { %2214 = vmatprep.mubr.f32.mxu0 %v1119_v25 }
 0x412   : > { %v5461_v26 = vpop.f32.mrb[26].mxu0 }
 0x413   : > { %7042 = vst [vmem:[#allocation21_spill] sm:$0xff] %v5461_v26  ;;  %v5463_v27 = vpop.f32.mrb[27].mxu0 }
 0x414   : > { %7043 = vst [vmem:[#allocation22_spill] sm:$0xff] %v5463_v27 }
 0x416   : > { %v5465_v33 = vpop.f32.mrb[28].mxu0 }
 0x417   : > { %7044 = vst [vmem:[#allocation23_spill] sm:$0xff] %v5465_v33  ;;  %v5467_v34 = vpop.f32.mrb[29].mxu0 }
 0x418   : > { %7045 = vst [vmem:[#allocation24_spill] sm:$0xff] %v5467_v34 }
 0x41a   : > { %v5469_v56 = vpop.f32.mrb[30].mxu0 }
 0x41b   : > { %7046 = vst [vmem:[#allocation25_spill] sm:$0xff] %v5469_v56  ;;  %v5471_v35 = vpop.f32.mrb[31].mxu0 }
 0x41c   : > { %7047 = vst [vmem:[#allocation26_spill] sm:$0xff] %v5471_v35 }
 0x41e   : > { %v1141_v40 = vpop.f32.mrb[32].mxu0 }
 0x41f   : > { %v2239_v60 = vmul.f32 0.125, %v1141_v40  ;;  %v1143_v41 = vpop.f32.mrb[33].mxu0 }
 0x420   : > { %v2240_v42 = vmul.f32 0.125, %v1143_v41 }
 0x422   : > { %v1147_v36 = vpop.f32.mrb[34].mxu0 }
 0x423   : > { %v2241_v37 = vmul.f32 0.125, %v1147_v36  ;;  %v1149_v38 = vpop.f32.mrb[35].mxu0 }
 0x424   : > { %v2242_v39 = vmul.f32 0.125, %v1149_v38 }
 0x426   : > { %v1153_v44 = vpop.f32.mrb[36].mxu0 }
 0x427   : > { %v2243_v12 = vmul.f32 0.125, %v1153_v44  ;;  %v1155_v18 = vpop.f32.mrb[37].mxu0 }
 0x428   : > { %v2244_v47 = vmul.f32 0.125, %v1155_v18 }
 0x42a   : > { %v1159_v48 = vpop.f32.mrb[38].mxu0 }
 0x42b   : > { %v2245_v49 = vmul.f32 0.125, %v1159_v48  ;;  %v1161_v50 = vpop.f32.mrb[39].mxu0 }
 0x42c   : > { %v2246_v51 = vmul.f32 0.125, %v1161_v50 }
 0x42e   : > { %2279 = vxpose.xlu1.b32.start [1/4] (short) %v2240_v42, 128  ;;  %v1165_v52 = vpop.f32.mrb[40].mxu0 }
 0x42f   : > { %2247 = vxpose.xlu0.b32.start [1/4] (short) %v2239_v60, 128  ;;  %v1167_v53 = vpop.f32.mrb[41].mxu0 }
 0x432   : > { %2280 = vxpose.xlu1.b32.cont [2/4] (short) %v2242_v39, 128  ;;  %v1171_v54 = vpop.f32.mrb[42].mxu0 }
 0x433   : > { %2248 = vxpose.xlu0.b32.cont [2/4] (short) %v2241_v37, 128  ;;  %v3984_v55 = vpack.c.bf16 %v1171_v54, %v1165_v52  ;;  %v1173_v57 = vpop.f32.mrb[43].mxu0 }
 0x434   : > { %v3982_v58 = vpack.c.bf16 %v1173_v57, %v1167_v53 }
 0x436   : > { %2281 = vxpose.xlu1.b32.cont [3/4] (short) %v2244_v47, 128  ;;  %3983 = vmatprep.subr.bf16.mxu1 %v3982_v58  ;;  %v1177_v59 = vpop.f32.mrb[44].mxu0 }
 0x437   : > { %2249 = vxpose.xlu0.b32.cont [3/4] (short) %v2243_v12, 128  ;;  %v1179_v61 = vpop.f32.mrb[45].mxu0 }
 0x43a   : > { %2282 = vxpose.xlu1.b32.end [4/4] (short) %v2246_v51, 128  ;;  %v1183_v62 = vpop.f32.mrb[46].mxu0 }
 0x43b   : > { %2250 = vxpose.xlu0.b32.end [4/4] (short) %v2245_v49, 128  ;;  %v3988_v63 = vpack.c.bf16 %v1183_v62, %v1177_v59  ;;  %v1185_v3 = vpop.f32.mrb[47].mxu0 }
 0x43c   : > { %v3986_v5 = vpack.c.bf16 %v1185_v3, %v1179_v61 }
 0x471   : > { %v1236_v6 = vpop.trf.xlu1 }
 0x472   : > { %3695 = vmatmul.mubr.msk.f32.vlgmr.msra.gmra.mrb[8].mxu1 %vm1284_vm1, %v1236_v6  ;;  %v1268_v7 = vpop.trf.xlu0 }
 0x473   : > { %1451 = vmatprep.mubr.f32.mxu1 %v6886_v45  ;;  %3985 = vmatpush1.bf16.msra.mxu1 %v3984_v55 }
 0x474   : > { %3987 = vmatprep.subr.bf16.mxu1 %v3986_v5 }
 0x475   : > { %v1237_v2 = vpop.trf.xlu1 }
 0x476   : > { %3696 = vmatmul.mubr.msk.f32.gmra.mrb[10].mxu1 %vm1284_vm1, %v1237_v2  ;;  %v1269_v8 = vpop.trf.xlu0 }
 0x477   : > { %1457 = vmatprep.mubr.f32.mxu1 %v6886_v45  ;;  %3989 = vmatpush1.bf16.msra.mxu1 %v3988_v63 }
 0x479   : > { %v1238_v4 = vpop.trf.xlu1 }
 0x47a   : > { %3697 = vmatmul.mubr.msk.f32.gmra.mrb[12].mxu1 %vm1284_vm1, %v1238_v4  ;;  %v1270_v10 = vpop.trf.xlu0 }
 0x47b   : > { %1463 = vmatprep.mubr.f32.mxu1 %v6886_v45 }
 0x47d   : > { %v1239_v9 = vpop.trf.xlu1 }
 0x47e   : > { %3698 = vmatmul.mubr.msk.f32.gmra.mrb[14].mxu1 %vm1284_vm1, %v1239_v9  ;;  %v1271_v13 = vpop.trf.xlu0 }
 0x47f   : > { %1469 = vmatprep.mubr.f32.mxu1 %v6886_v45 }
 0x481   : > { %v1240_v11 = vpop.trf.xlu1 }
 0x482   : > { %3699 = vmatmul.mubr.msk.f32.gmra.mrb[16].mxu1 %vm1284_vm1, %v1240_v11  ;;  %v1272_v17 = vpop.trf.xlu0 }
 0x483   : > { %1475 = vmatprep.mubr.f32.mxu1 %v6886_v45 }
 0x485   : > { %v1241_v30 = vpop.trf.xlu1 }
 0x486   : > { %3700 = vmatmul.mubr.msk.f32.gmra.mrb[18].mxu1 %vm1284_vm1, %v1241_v30  ;;  %v1273_v20 = vpop.trf.xlu0 }
 0x487   : > { %1481 = vmatprep.mubr.f32.mxu1 %v6886_v45 }
 0x489   : > { %v1242_v16 = vpop.trf.xlu1 }
 0x48a   : > { %3701 = vmatmul.mubr.msk.f32.gmra.mrb[20].mxu1 %vm1284_vm1, %v1242_v16  ;;  %v1274_v1 = vpop.trf.xlu0 }
 0x48b   : > { %1487 = vmatprep.mubr.f32.mxu1 %v6886_v45 }
 0x48d   : > { %v1243_v32 = vpop.trf.xlu1 }
 0x48e   : > { %3702 = vmatmul.mubr.msk.f32.gmra.mrb[22].mxu1 %vm1284_vm1, %v1243_v32  ;;  %v1275_v21 = vpop.trf.xlu0 }
 0x48f   : > { %1493 = vmatprep.mubr.f32.mxu1 %v6886_v45 }
 0x491   : > { %v1244_v19 = vpop.trf.xlu1 }
 0x492   : > { %3703 = vmatmul.mubr.msk.f32.gmra.mrb[24].mxu1 %vm1284_vm1, %v1244_v19  ;;  %v1276_v43 = vpop.trf.xlu0 }
 0x493   : > { %1499 = vmatprep.mubr.f32.mxu1 %v6886_v45 }
 0x495   : > { %v1245_v0 = vpop.trf.xlu1 }
 0x496   : > { %3704 = vmatmul.mubr.msk.f32.gmra.mrb[26].mxu1 %vm1284_vm1, %v1245_v0  ;;  %v1277_v28 = vpop.trf.xlu0 }
 0x497   : > { %1505 = vmatprep.mubr.f32.mxu1 %v6886_v45 }
 0x499   : > { %v1246_v14 = vpop.trf.xlu1 }
 0x49a   : > { %3705 = vmatmul.mubr.msk.f32.gmra.mrb[28].mxu1 %vm1284_vm1, %v1246_v14  ;;  %v1278_v24 = vpop.trf.xlu0 }
 0x49b   : > { %1511 = vmatprep.mubr.f32.mxu1 %v6886_v45 }
 0x49d   : > { %v1247_v15 = vpop.trf.xlu1 }
 0x49e   : > { %3706 = vmatmul.mubr.msk.f32.gmra.mrb[30].mxu1 %vm1284_vm1, %v1247_v15  ;;  %v1279_v25 = vpop.trf.xlu0 }
 0x49f   : > { %1517 = vmatprep.mubr.f32.mxu1 %v6886_v45 }
 0x4a1   : > { %v1248_v22 = vpop.trf.xlu1 }
 0x4a2   : > { %3707 = vmatmul.mubr.msk.f32.gmra.mrb[32].mxu1 %vm1284_vm1, %v1248_v22  ;;  %v1280_v40 = vpop.trf.xlu0 }
 0x4a3   : > { %1523 = vmatprep.mubr.f32.mxu1 %v6886_v45 }
 0x4a5   : > { %v1249_v23 = vpop.trf.xlu1 }
 0x4a6   : > { %3708 = vmatmul.mubr.msk.f32.gmra.mrb[34].mxu1 %vm1284_vm1, %v1249_v23  ;;  %v1281_v60 = vpop.trf.xlu0 }
 0x4a7   : > { %1529 = vmatprep.mubr.f32.mxu1 %v6886_v45 }
 0x4a9   : > { %v1250_v29 = vpop.trf.xlu1 }
 0x4aa   : > { %3709 = vmatmul.mubr.msk.f32.gmra.mrb[36].mxu1 %vm1284_vm1, %v1250_v29  ;;  %v1282_v41 = vpop.trf.xlu0 }
 0x4ab   : > { %1535 = vmatprep.mubr.f32.mxu1 %v6886_v45 }
 0x4ad   : > { %v1251_v46 = vpop.trf.xlu1 }
 0x4ae   : > { %3710 = vmatmul.mubr.msk.f32.gmra.mrb[38].mxu1 %vm1284_vm1, %v1251_v46  ;;  %v1283_v42 = vpop.trf.xlu0 }
 0x4af   : > { %1541 = vmatprep.mubr.f32.mxu1 %v6886_v45 }
 0x4b1   : > { %v2295_v53 = vpop.trf.xlu1 }
 0x4b2   : > { %3711 = vmatmul.mubr.msk.f32.gmra.mrb[40].mxu1 %vm1284_vm1, %v1268_v7  ;;  %v2263_v36 = vpop.trf.xlu0 }
 0x4b3   : > { %1547 = vmatprep.mubr.f32.mxu1 %v6886_v45 }
 0x4b5   : > { %v2296_v54 = vpop.trf.xlu1 }
 0x4b6   : > { %3712 = vmatmul.mubr.msk.f32.gmra.mrb[42].mxu1 %vm1284_vm1, %v1269_v8  ;;  %v2264_v37 = vpop.trf.xlu0 }
 0x4b7   : > { %1553 = vmatprep.mubr.f32.mxu1 %v6886_v45 }
 0x4b9   : > { %v2297_v57 = vpop.trf.xlu1 }
 0x4ba   : > { %3713 = vmatmul.mubr.msk.f32.gmra.mrb[44].mxu1 %vm1284_vm1, %v1270_v10  ;;  %v2265_v38 = vpop.trf.xlu0 }
 0x4bb   : > { %1559 = vmatprep.mubr.f32.mxu1 %v6886_v45 }
 0x4bd   : > { %v2298_v59 = vpop.trf.xlu1 }
 0x4be   : > { %3714 = vmatmul.mubr.msk.f32.gmra.mrb[46].mxu1 %vm1284_vm1, %v1271_v13  ;;  %v2266_v39 = vpop.trf.xlu0 }
 0x4bf   : > { %1565 = vmatprep.mubr.f32.mxu1 %v6886_v45 }
 0x4c1   : > { %v2299_v61 = vpop.trf.xlu1 }
 0x4c2   : > { %3715 = vmatmul.mubr.msk.f32.gmra.mrb[48].mxu1 %vm1284_vm1, %v1272_v17  ;;  %v2267_v44 = vpop.trf.xlu0 }
 0x4c3   : > { %1571 = vmatprep.mubr.f32.mxu1 %v6886_v45 }
 0x4c5   : > { %v2300_v63 = vpop.trf.xlu1 }
 0x4c6   : > { %3716 = vmatmul.mubr.msk.f32.gmra.mrb[50].mxu1 %vm1284_vm1, %v1273_v20  ;;  %v2268_v12 = vpop.trf.xlu0 }
 0x4c7   : > { %1577 = vmatprep.mubr.f32.mxu1 %v6886_v45 }
 0x4c9   : > { %v2301_v3 = vpop.trf.xlu1 }
 0x4ca   : > { %3717 = vmatmul.mubr.msk.f32.gmra.mrb[52].mxu1 %vm1284_vm1, %v1274_v1  ;;  %v2269_v18 = vpop.trf.xlu0 }
 0x4cb   : > { %1583 = vmatprep.mubr.f32.mxu1 %v6886_v45 }
 0x4cd   : > { %v2302_v5 = vpop.trf.xlu1 }
 0x4ce   : > { %3718 = vmatmul.mubr.msk.f32.gmra.mrb[54].mxu1 %vm1284_vm1, %v1275_v21  ;;  %v2270_v47 = vpop.trf.xlu0 }
 0x4cf   : > { %1589 = vmatprep.mubr.f32.mxu1 %v6886_v45 }
 0x4d1   : > { %v2303_v6 = vpop.trf.xlu1 }
 0x4d2   : > { %3719 = vmatmul.mubr.msk.f32.gmra.mrb[56].mxu1 %vm1284_vm1, %v1276_v43  ;;  %v2271_v48 = vpop.trf.xlu0 }
 0x4d3   : > { %1595 = vmatprep.mubr.f32.mxu1 %v6886_v45 }
 0x4d5   : > { %v2304_v8 = vpop.trf.xlu1 }
 0x4d6   : > { %3720 = vmatmul.mubr.msk.f32.gmra.mrb[58].mxu1 %vm1284_vm1, %v1277_v28  ;;  %v2272_v49 = vpop.trf.xlu0 }
 0x4d7   : > { %1601 = vmatprep.mubr.f32.mxu1 %v6886_v45 }
 0x4d9   : > { %v2305_v13 = vpop.trf.xlu1 }
 0x4da   : > { %3721 = vmatmul.mubr.msk.f32.gmra.mrb[60].mxu1 %vm1284_vm1, %v1278_v24  ;;  %v2273_v50 = vpop.trf.xlu0 }
 0x4db   : > { %1607 = vmatprep.mubr.f32.mxu1 %v6886_v45 }
 0x4dd   : > { %v2306_v0 = vpop.trf.xlu1 }
 0x4de   : > { %3722 = vmatmul.mubr.msk.f32.gmra.mrb[62].mxu1 %vm1284_vm1, %v1279_v25  ;;  %v2274_v51 = vpop.trf.xlu0 }
 0x4df   : > { %1613 = vmatprep.mubr.f32.mxu1 %v6886_v45 }
 0x4e1   : > { %v2307_v22 = vpop.trf.xlu1 }
 0x4e2   : > { %3723 = vmatmul.mubr.msk.f32.gmra.mrb[64].mxu1 %vm1284_vm1, %v1280_v40  ;;  %v2275_v52 = vpop.trf.xlu0 }
 0x4e3   : > { %1619 = vmatprep.mubr.f32.mxu1 %v6886_v45 }
 0x4e5   : > { %v2308_v24 = vpop.trf.xlu1 }
 0x4e6   : > { %3724 = vmatmul.mubr.msk.f32.gmra.mrb[66].mxu1 %vm1284_vm1, %v1281_v60  ;;  %v2276_v55 = vpop.trf.xlu0 }
 0x4e7   : > { %1625 = vmatprep.mubr.f32.mxu1 %v6886_v45 }
 0x4ea   : > { %3725 = vmatmul.mubr.msk.f32.gmra.mrb[68].mxu1 %vm1284_vm1, %v1282_v41  ;;  %v2277_v58 = vpop.trf.xlu0 }
 0x4eb   : > { %1631 = vmatprep.mubr.f32.mxu1 %v6886_v45 }
 0x4ee   : > { %3726 = vmatmul.mubr.msk.f32.gmra.mrb[70].mxu1 %vm1284_vm1, %v1283_v42  ;;  %v2278_v62 = vpop.trf.xlu0  ;;  %v2309_v42 = vpop.trf.xlu1 }
 0x4ef   : > { %2471 = vmatprep.mubr.f32.mxu1 %v6886_v45 }
 0x4f2   : > { %3727 = vmatmul.mubr.msk.f32.vlgmr.msra.gmra.mrb[72].mxu1 %vm1284_vm1, %v2263_v36 }
 0x4f3   : > { %2477 = vmatprep.mubr.f32.mxu1 %v6886_v45 }
 0x4f6   : > { %3728 = vmatmul.mubr.msk.f32.gmra.mrb[74].mxu1 %vm1284_vm1, %v2264_v37 }
 0x4f7   : > { %2483 = vmatprep.mubr.f32.mxu1 %v6886_v45 }
 0x4fa   : > { %3729 = vmatmul.mubr.msk.f32.gmra.mrb[76].mxu1 %vm1284_vm1, %v2265_v38 }
 0x4fb   : > { %2489 = vmatprep.mubr.f32.mxu1 %v6886_v45 }
 0x4fe   : > { %3730 = vmatmul.mubr.msk.f32.gmra.mrb[78].mxu1 %vm1284_vm1, %v2266_v39 }
 0x4ff   : > { %2495 = vmatprep.mubr.f32.mxu1 %v6886_v45 }
 0x502   : > { %3731 = vmatmul.mubr.msk.f32.gmra.mrb[80].mxu1 %vm1284_vm1, %v2267_v44 }
 0x503   : > { %2501 = vmatprep.mubr.f32.mxu1 %v6886_v45 }
 0x506   : > { %3732 = vmatmul.mubr.msk.f32.gmra.mrb[82].mxu1 %vm1284_vm1, %v2268_v12  ;;  %v2310_v12 = vpop.trf.xlu1 }
 0x507   : > { %2507 = vmatprep.mubr.f32.mxu1 %v6886_v45 }
 0x50a   : > { %3733 = vmatmul.mubr.msk.f32.gmra.mrb[84].mxu1 %vm1284_vm1, %v2269_v18 }
 0x50b   : > { %2513 = vmatprep.mubr.f32.mxu1 %v6886_v45 }
 0x50e   : > { %3734 = vmatmul.mubr.msk.f32.gmra.mrb[86].mxu1 %vm1284_vm1, %v2270_v47 }
 0x50f   : > { %2519 = vmatprep.mubr.f32.mxu1 %v6886_v45 }
 0x512   : > { %3735 = vmatmul.mubr.msk.f32.gmra.mrb[88].mxu1 %vm1284_vm1, %v2271_v48 }
 0x513   : > { %2525 = vmatprep.mubr.f32.mxu1 %v6886_v45 }
 0x516   : > { %3736 = vmatmul.mubr.msk.f32.gmra.mrb[90].mxu1 %vm1284_vm1, %v2272_v49 }
 0x517   : > { %2531 = vmatprep.mubr.f32.mxu1 %v6886_v45 }
 0x51a   : > { %3737 = vmatmul.mubr.msk.f32.gmra.mrb[92].mxu1 %vm1284_vm1, %v2273_v50 }
 0x51b   : > { %2537 = vmatprep.mubr.f32.mxu1 %v6886_v45 }
 0x51e   : > { %3738 = vmatmul.mubr.msk.f32.gmra.mrb[94].mxu1 %vm1284_vm1, %v2274_v51 }
 0x51f   : > { %2543 = vmatprep.mubr.f32.mxu1 %v6886_v45 }
 0x522   : > { %3739 = vmatmul.mubr.msk.f32.gmra.mrb[96].mxu1 %vm1284_vm1, %v2275_v52 }
 0x523   : > { %2549 = vmatprep.mubr.f32.mxu1 %v6886_v45 }
 0x526   : > { %3740 = vmatmul.mubr.msk.f32.gmra.mrb[98].mxu1 %vm1284_vm1, %v2276_v55 }
 0x527   : > { %2555 = vmatprep.mubr.f32.mxu1 %v6886_v45 }
 0x52a   : > { %3741 = vmatmul.mubr.msk.f32.gmra.mrb[100].mxu1 %vm1284_vm1, %v2277_v58 }
 0x52b   : > { %2561 = vmatprep.mubr.f32.mxu1 %v6886_v45 }
 0x52e   : > { %3742 = vmatmul.mubr.msk.f32.gmra.mrb[102].mxu1 %vm1284_vm1, %v2278_v62 }
 0x52f   : > { %2567 = vmatprep.mubr.f32.mxu1 %v6886_v45 }
 0x532   : > { %3743 = vmatmul.mubr.msk.f32.gmra.mrb[104].mxu1 %vm1284_vm1, %v2295_v53 }
 0x533   : > { %2573 = vmatprep.mubr.f32.mxu1 %v6886_v45 }
 0x536   : > { %3744 = vmatmul.mubr.msk.f32.gmra.mrb[106].mxu1 %vm1284_vm1, %v2296_v54 }
 0x537   : > { %2579 = vmatprep.mubr.f32.mxu1 %v6886_v45 }
 0x53a   : > { %3745 = vmatmul.mubr.msk.f32.gmra.mrb[108].mxu1 %vm1284_vm1, %v2297_v57 }
 0x53b   : > { %2585 = vmatprep.mubr.f32.mxu1 %v6886_v45 }
 0x53e   : > { %3746 = vmatmul.mubr.msk.f32.gmra.mrb[110].mxu1 %vm1284_vm1, %v2298_v59 }
 0x53f   : > { %2591 = vmatprep.mubr.f32.mxu1 %v6886_v45 }
 0x542   : > { %3747 = vmatmul.mubr.msk.f32.gmra.mrb[112].mxu1 %vm1284_vm1, %v2299_v61 }
 0x543   : > { %2597 = vmatprep.mubr.f32.mxu1 %v6886_v45 }
 0x545   : > { %v5579_v7 = vpop.f32.mrb[8].mxu1 }
 0x546   : > { %v5581_v2 = vpop.f32.mrb[9].mxu1  ;;  %3748 = vmatmul.mubr.msk.f32.gmra.mrb[114].mxu1 %vm1284_vm1, %v2300_v63 }
 0x547   : > { %v1638_v4 = vmax.f32 %v5579_v7, %v5581_v2  ;;  %2603 = vmatprep.mubr.f32.mxu1 %v6886_v45 }
 0x549   : > { %v5587_v9 = vpop.f32.mrb[10].mxu1  ;;  %1639 = vmax.xlane.f32.xlu0 %v1638_v4 }
 0x54a   : > { %v5589_v10 = vpop.f32.mrb[11].mxu1  ;;  %3749 = vmatmul.mubr.msk.f32.gmra.mrb[116].mxu1 %vm1284_vm1, %v2301_v3 }
 0x54b   : > { %v1641_v11 = vmax.f32 %v5587_v9, %v5589_v10  ;;  %2609 = vmatprep.mubr.f32.mxu1 %v6886_v45 }
 0x54d   : > { %v5595_v30 = vpop.f32.mrb[12].mxu1  ;;  %1642 = vmax.xlane.f32.xlu1 %v1641_v11 }
 0x54e   : > { %v5597_v16 = vpop.f32.mrb[13].mxu1  ;;  %3750 = vmatmul.mubr.msk.f32.gmra.mrb[118].mxu1 %vm1284_vm1, %v2302_v5 }
 0x54f   : > { %v1644_v17 = vmax.f32 %v5595_v30, %v5597_v16  ;;  %2615 = vmatprep.mubr.f32.mxu1 %v6886_v45 }
 0x551   : > { %v5603_v32 = vpop.f32.mrb[14].mxu1  ;;  %1645 = vmax.xlane.f32.xlu0 %v1644_v17 }
 0x552   : > { %v5605_v19 = vpop.f32.mrb[15].mxu1  ;;  %3751 = vmatmul.mubr.msk.f32.gmra.mrb[120].mxu1 %vm1284_vm1, %v2303_v6 }
 0x553   : > { %v1647_v20 = vmax.f32 %v5603_v32, %v5605_v19  ;;  %2621 = vmatprep.mubr.f32.mxu1 %v6886_v45 }
 0x555   : > { %v5611_v1 = vpop.f32.mrb[16].mxu1  ;;  %1648 = vmax.xlane.f32.xlu1 %v1647_v20 }
 0x556   : > { %v5613_v14 = vpop.f32.mrb[17].mxu1  ;;  %3752 = vmatmul.mubr.msk.f32.gmra.mrb[122].mxu1 %vm1284_vm1, %v2304_v8 }
 0x557   : > { %v1650_v15 = vmax.f32 %v5611_v1, %v5613_v14  ;;  %2627 = vmatprep.mubr.f32.mxu1 %v6886_v45 }
 0x559   : > { %v5619_v21 = vpop.f32.mrb[18].mxu1  ;;  %1651 = vmax.xlane.f32.xlu0 %v1650_v15 }
 0x55a   : > { %v5621_v43 = vpop.f32.mrb[19].mxu1  ;;  %3753 = vmatmul.mubr.msk.f32.gmra.mrb[124].mxu1 %vm1284_vm1, %v2305_v13 }
 0x55b   : > { %v1653_v23 = vmax.f32 %v5619_v21, %v5621_v43  ;;  %2633 = vmatprep.mubr.f32.mxu1 %v6886_v45 }
 0x55d   : > { %v5627_v28 = vpop.f32.mrb[20].mxu1  ;;  %1654 = vmax.xlane.f32.xlu1 %v1653_v23 }
 0x55e   : > { %v5629_v29 = vpop.f32.mrb[21].mxu1  ;;  %3754 = vmatmul.mubr.msk.f32.gmra.mrb[126].mxu1 %vm1284_vm1, %v2306_v0 }
 0x55f   : > { %v1656_v46 = vmax.f32 %v5627_v28, %v5629_v29  ;;  %2639 = vmatprep.mubr.f32.mxu1 %v6886_v45 }
 0x561   : > { %v5635_v25 = vpop.f32.mrb[22].mxu1  ;;  %1657 = vmax.xlane.f32.xlu0 %v1656_v46 }
 0x562   : > { %v5637_v40 = vpop.f32.mrb[23].mxu1  ;;  %3755 = vmatmul.mubr.msk.f32.gmra.mrb[128].mxu1 %vm1284_vm1, %v2307_v22 }
 0x563   : > { %v1659_v60 = vmax.f32 %v5635_v25, %v5637_v40  ;;  %2645 = vmatprep.mubr.f32.mxu1 %v6886_v45 }
 0x565   : > { %v5643_v41 = vpop.f32.mrb[24].mxu1  ;;  %1660 = vmax.xlane.f32.xlu1 %v1659_v60 }
 0x566   : > { %v5645_v36 = vpop.f32.mrb[25].mxu1  ;;  %3756 = vmatmul.mubr.msk.f32.gmra.mrb[130].mxu1 %vm1284_vm1, %v2308_v24 }
 0x567   : > { %v1662_v37 = vmax.f32 %v5643_v41, %v5645_v36  ;;  %2651 = vmatprep.mubr.f32.mxu1 %v6886_v45 }
 0x569   : > { %v5651_v38 = vpop.f32.mrb[26].mxu1  ;;  %1663 = vmax.xlane.f32.xlu0 %v1662_v37 }
 0x56a   : > { %v5653_v39 = vpop.f32.mrb[27].mxu1  ;;  %3757 = vmatmul.mubr.msk.f32.gmra.mrb[132].mxu1 %vm1284_vm1, %v2309_v42 }
 0x56b   : > { %v1665_v44 = vmax.f32 %v5651_v38, %v5653_v39  ;;  %2657 = vmatprep.mubr.f32.mxu1 %v6886_v45 }
 0x56d   : > { %v5659_v18 = vpop.f32.mrb[28].mxu1  ;;  %1666 = vmax.xlane.f32.xlu1 %v1665_v44 }
 0x56e   : > { %v5661_v47 = vpop.f32.mrb[29].mxu1  ;;  %3758 = vmatmul.mubr.msk.f32.gmra.mrb[134].mxu1 %vm1284_vm1, %v2310_v12 }
 0x56f   : > { %v1668_v48 = vmax.f32 %v5659_v18, %v5661_v47  ;;  %3421 = vmatprep.mubr.f32.mxu1 %v6886_v45 }
 0x571   : > { %v5667_v49 = vpop.f32.mrb[30].mxu1  ;;  %1669 = vmax.xlane.f32.xlu0 %v1668_v48 }
 0x572   : > { %v5669_v50 = vpop.f32.mrb[31].mxu1 }
 0x573   : > { %v1671_v51 = vmax.f32 %v5667_v49, %v5669_v50 }
 0x575   : > { %v5673_v52 = vpop.f32.mrb[32].mxu1  ;;  %1672 = vmax.xlane.f32.xlu1 %v1671_v51 }
 0x576   : > { %v5675_v53 = vpop.f32.mrb[33].mxu1 }
 0x577   : > { %v1674_v54 = vmax.f32 %v5673_v52, %v5675_v53 }
 0x579   : > { %v5679_v55 = vpop.f32.mrb[34].mxu1  ;;  %1675 = vmax.xlane.f32.xlu0 %v1674_v54 }
 0x57a   : > { %v5681_v57 = vpop.f32.mrb[35].mxu1 }
 0x57b   : > { %v1677_v58 = vmax.f32 %v5679_v55, %v5681_v57 }
 0x57d   : > { %v5685_v59 = vpop.f32.mrb[36].mxu1  ;;  %1678 = vmax.xlane.f32.xlu1 %v1677_v58 }
 0x57e   : > { %v5687_v61 = vpop.f32.mrb[37].mxu1 }
 0x57f   : > { %v1680_v62 = vmax.f32 %v5685_v59, %v5687_v61 }
 0x581   : > { %v5691_v63 = vpop.f32.mrb[38].mxu1  ;;  %1681 = vmax.xlane.f32.xlu0 %v1680_v62 }
 0x582   : > { %7048 = vst [vmem:[#allocation27_spill] sm:$0xff] %v5691_v63  ;;  %v5693_v3 = vpop.f32.mrb[39].mxu1 }
 0x583   : > { %7049 = vst [vmem:[#allocation28_spill] sm:$0xff] %v5693_v3  ;;  %v1683_v5 = vmax.f32 %v5691_v63, %v5693_v3 }
 0x585   : > { %v5697_v6 = vpop.f32.mrb[40].mxu1  ;;  %1684 = vmax.xlane.f32.xlu1 %v1683_v5 }
 0x586   : > { %7050 = vst [vmem:[#allocation29_spill] sm:$0xff] %v5697_v6  ;;  %v5699_v4 = vpop.f32.mrb[41].mxu1 }
 0x587   : > { %7051 = vst [vmem:[#allocation30_spill] sm:$0xff] %v5699_v4  ;;  %v1686_v8 = vmax.f32 %v5697_v6, %v5699_v4 }
 0x589   : > { %v5703_v11 = vpop.f32.mrb[42].mxu1  ;;  %1687 = vmax.xlane.f32.xlu0 %v1686_v8 }
 0x58a   : > { %7052 = vst [vmem:[#allocation31_spill] sm:$0xff] %v5703_v11  ;;  %v5705_v13 = vpop.f32.mrb[43].mxu1 }
 0x58b   : > { %7053 = vst [vmem:[#allocation32_spill] sm:$0xff] %v5705_v13  ;;  %v1689_v17 = vmax.f32 %v5703_v11, %v5705_v13 }
 0x58d   : > { %v5709_v20 = vpop.f32.mrb[44].mxu1  ;;  %1690 = vmax.xlane.f32.xlu1 %v1689_v17 }
 0x58e   : > { %7054 = vst [vmem:[#allocation33_spill] sm:$0xff] %v5709_v20  ;;  %v5711_v0 = vpop.f32.mrb[45].mxu1 }
 0x58f   : > { %7055 = vst [vmem:[#allocation34_spill] sm:$0xff] %v5711_v0  ;;  %v1692_v15 = vmax.f32 %v5709_v20, %v5711_v0 }
 0x591   : > { %v5715_v22 = vpop.f32.mrb[46].mxu1  ;;  %1693 = vmax.xlane.f32.xlu0 %v1692_v15 }
 0x592   : > { %7056 = vst [vmem:[#allocation35_spill] sm:$0xff] %v5715_v22  ;;  %v5717_v23 = vpop.f32.mrb[47].mxu1 }
 0x593   : > { %7057 = vst [vmem:[#allocation36_spill] sm:$0xff] %v5717_v23  ;;  %v1695_v46 = vmax.f32 %v5715_v22, %v5717_v23 }
 0x595   : > { %v5721_v24 = vpop.f32.mrb[48].mxu1  ;;  %1696 = vmax.xlane.f32.xlu1 %v1695_v46 }
 0x596   : > { %7058 = vst [vmem:[#allocation37_spill] sm:$0xff] %v5721_v24  ;;  %v5723_v60 = vpop.f32.mrb[49].mxu1 }
 0x597   : > { %7059 = vst [vmem:[#allocation38_spill] sm:$0xff] %v5723_v60  ;;  %v1698_v42 = vmax.f32 %v5721_v24, %v5723_v60 }
 0x599   : > { %v5727_v37 = vpop.f32.mrb[50].mxu1  ;;  %1699 = vmax.xlane.f32.xlu0 %v1698_v42 }
 0x59a   : > { %7060 = vst [vmem:[#allocation39_spill] sm:$0xff] %v5727_v37  ;;  %v5729_v44 = vpop.f32.mrb[51].mxu1 }
 0x59b   : > { %7061 = vst [vmem:[#allocation40_spill] sm:$0xff] %v5729_v44  ;;  %v1701_v12 = vmax.f32 %v5727_v37, %v5729_v44 }
 0x59d   : > { %v5733_v48 = vpop.f32.mrb[52].mxu1  ;;  %1702 = vmax.xlane.f32.xlu1 %v1701_v12 }
 0x59e   : > { %7062 = vst [vmem:[#allocation41_spill] sm:$0xff] %v5733_v48  ;;  %v5735_v51 = vpop.f32.mrb[53].mxu1 }
 0x59f   : > { %7063 = vst [vmem:[#allocation42_spill] sm:$0xff] %v5735_v51  ;;  %v1704_v54 = vmax.f32 %v5733_v48, %v5735_v51 }
 0x5a1   : > { %v5739_v58 = vpop.f32.mrb[54].mxu1  ;;  %1705 = vmax.xlane.f32.xlu0 %v1704_v54 }
 0x5a2   : > { %7064 = vst [vmem:[#allocation43_spill] sm:$0xff] %v5739_v58  ;;  %v5741_v62 = vpop.f32.mrb[55].mxu1 }
 0x5a3   : > { %7065 = vst [vmem:[#allocation44_spill] sm:$0xff] %v5741_v62  ;;  %v1707_v5 = vmax.f32 %v5739_v58, %v5741_v62 }
 0x5a5   : > { %1708 = vmax.xlane.f32.xlu1 %v1707_v5  ;;  %v5745_v8 = vpop.f32.mrb[56].mxu1 }
 0x5a6   : > { %v5747_v17 = vpop.f32.mrb[57].mxu1 }
 0x5a9   : > { %v5751_v46 = vpop.f32.mrb[58].mxu1 }
 0x5aa   : > { %v5753_v42 = vpop.f32.mrb[59].mxu1 }
 0x5ad   : > { %v5757_v54 = vpop.f32.mrb[60].mxu1 }
 0x5ae   : > { %v5759_v45 = vpop.f32.mrb[61].mxu1 }
 0x5b1   : > { %v5763_v56 = vpop.f32.mrb[62].mxu1 }
 0x5b2   : > { %v5765_v35 = vpop.f32.mrb[63].mxu1 }
 0x5b5   : > { %v5769_v33 = vpop.f32.mrb[64].mxu1 }
 0x5b6   : > { %v5771_v34 = vpop.f32.mrb[65].mxu1 }
 0x5b9   : > { %v5775_v26 = vpop.f32.mrb[66].mxu1 }
 0x5ba   : > { %v5777_v27 = vpop.f32.mrb[67].mxu1 }
 0x5bd   : > { %v5781_v31 = vpop.f32.mrb[68].mxu1 }
 0x5be   : > { %v5783_v62 = vpop.f32.mrb[69].mxu1 }
 0x5c1   : > { %v5787_v58 = vpop.f32.mrb[70].mxu1 }
 0x5c2   : > { %v5789_v51 = vpop.f32.mrb[71].mxu1 }
 0x5c5   : > { %v5793_v48 = vpop.f32.mrb[72].mxu1 }
 0x5c6   : > { %7066 = vst [vmem:[#allocation45_spill] sm:$0xff] %v5793_v48  ;;  %v5795_v44 = vpop.f32.mrb[73].mxu1 }
 0x5c7   : > { %7067 = vst [vmem:[#allocation46_spill] sm:$0xff] %v5795_v44 }
 0x5c9   : > { %v5799_v37 = vpop.f32.mrb[74].mxu1 }
 0x5ca   : > { %7068 = vst [vmem:[#allocation47_spill] sm:$0xff] %v5799_v37  ;;  %v5801_v60 = vpop.f32.mrb[75].mxu1 }
 0x5cb   : > { %7069 = vst [vmem:[#allocation48_spill] sm:$0xff] %v5801_v60 }
 0x5cd   : > { %v5805_v24 = vpop.f32.mrb[76].mxu1 }
 0x5ce   : > { %7070 = vst [vmem:[#allocation49_spill] sm:$0xff] %v5805_v24  ;;  %v5807_v23 = vpop.f32.mrb[77].mxu1 }
 0x5cf   : > { %7071 = vst [vmem:[#allocation50_spill] sm:$0xff] %v5807_v23 }
 0x5d1   : > { %v5811_v22 = vpop.f32.mrb[78].mxu1 }
 0x5d2   : > { %7072 = vst [vmem:[#allocation51_spill] sm:$0xff] %v5811_v22  ;;  %v5813_v0 = vpop.f32.mrb[79].mxu1 }
 0x5d3   : > { %7073 = vst [vmem:[#allocation52_spill] sm:$0xff] %v5813_v0 }
 0x5d5   : > { %v5817_v20 = vpop.f32.mrb[80].mxu1 }
 0x5d6   : > { %7074 = vst [vmem:[#allocation53_spill] sm:$0xff] %v5817_v20  ;;  %v1640_v13 = vpop.xlane.xlu0 %1639  ;;  %v5819_v11 = vpop.f32.mrb[81].mxu1 }
 0x5d7   : > { %7075 = vst [vmem:[#allocation54_spill] sm:$0xff] %v5819_v11  ;;  %v1734_v15 = vsub.f32 %v5579_v7, %v1640_v13  ;;  %v1735_v4 = vsub.f32 %v5581_v2, %v1640_v13 }
 0x5d9   : > { %v1798_v12 = vmul.f32 1.442695, %v1734_v15  ;;  %v1800_v23 = vmul.f32 1.442695, %v1735_v4  ;;  %v5825_v24 = vpop.f32.mrb[82].mxu1 }
 0x5da   : > { %7076 = vst [vmem:[#allocation55_spill] sm:$0xff] %v5825_v24  ;;  %v1643_v3 = vpop.xlane.xlu1 %1642  ;;  %v5827_v63 = vpop.f32.mrb[83].mxu1 }
 0x5db   : > { %7077 = vst [vmem:[#allocation56_spill] sm:$0xff] %v5827_v63  ;;  %4211 = vpow2.f32 %v1798_v12  ;;  %v1736_v5 = vsub.f32 %v5587_v9, %v1643_v3  ;;  %v1737_v0 = vsub.f32 %v5589_v10, %v1643_v3 }
 0x5dc   : > { %4213 = vpow2.f32 %v1800_v23 }
 0x5dd   : > { %v1802_v2 = vmul.f32 1.442695, %v1736_v5  ;;  %v1804_v13 = vmul.f32 1.442695, %v1737_v0  ;;  %v5833_v22 = vpop.f32.mrb[84].mxu1 }
 0x5de   : > { %7078 = vst [vmem:[#allocation57_spill] sm:$0xff] %v5833_v22  ;;  %v1646_v15 = vpop.xlane.xlu0 %1645  ;;  %v5835_v4 = vpop.f32.mrb[85].mxu1 }
 0x5df   : > { %7079 = vst [vmem:[#allocation58_spill] sm:$0xff] %v5835_v4  ;;  %4215 = vpow2.f32 %v1802_v2  ;;  %v1738_v6 = vsub.f32 %v5595_v30, %v1646_v15  ;;  %v1739_v12 = vsub.f32 %v5597_v16, %v1646_v15 }
 0x5e0   : > { %4217 = vpow2.f32 %v1804_v13 }
 0x5e1   : > { %v1806_v10 = vmul.f32 1.442695, %v1738_v6  ;;  %v1808_v3 = vmul.f32 1.442695, %v1739_v12  ;;  %v5841_v7 = vpop.f32.mrb[86].mxu1 }
 0x5e2   : > { %7080 = vst [vmem:[#allocation59_spill] sm:$0xff] %v5841_v7  ;;  %v1649_v23 = vpop.xlane.xlu1 %1648  ;;  %v5843_v0 = vpop.f32.mrb[87].mxu1 }
 0x5e3   : > { %7081 = vst [vmem:[#allocation60_spill] sm:$0xff] %v5843_v0  ;;  %4219 = vpow2.f32 %v1806_v10  ;;  %v1740_v5 = vsub.f32 %v5603_v32, %v1649_v23  ;;  %v1741_v2 = vsub.f32 %v5605_v19, %v1649_v23 }
 0x5e4   : > { %4221 = vpow2.f32 %v1808_v3 }
 0x5e5   : > { %v5849_v16 = vpop.eup %4211  ;;  %v1810_v15 = vmul.f32 1.442695, %v1740_v5  ;;  %v1812_v13 = vmul.f32 1.442695, %v1741_v2  ;;  %v5851_v6 = vpop.f32.mrb[88].mxu1 }
 0x5e6   : > { %7082 = vst [vmem:[#allocation61_spill] sm:$0xff] %v5849_v16  ;;  %7083 = vst [vmem:[#allocation62_spill] sm:$0xff] %v5851_v6  ;;  %v5853_v12 = vpop.eup %4213  ;;  %v1652_v9 = vpop.xlane.xlu0 %1651 }
 0x5e7   : > { %v5855_v4 = vpop.f32.mrb[89].mxu1  ;;  %4223 = vpow2.f32 %v1810_v15  ;;  %v1742_v32 = vsub.f32 %v5611_v1, %v1652_v9  ;;  %v1743_v19 = vsub.f32 %v5613_v14, %v1652_v9  ;;  %v1926_v10 = vadd.f32 %v5853_v12, %v5849_v16 }
 0x5e8   : > { %7084 = vst [vmem:[#allocation63_spill] sm:$0xff] %v5855_v4  ;;  %4225 = vpow2.f32 %v1812_v13  ;;  %v7090_v16 = vmax.f32 %v5745_v8, %v5747_v17 }
 0x5e9   : > { %v5863_v23 = vpop.eup %4215  ;;  %v1814_v5 = vmul.f32 1.442695, %v1742_v32  ;;  %v1816_v2 = vmul.f32 1.442695, %v1743_v19  ;;  %1927 = vadd.xlane.f32.xlu0 %v1926_v10  ;;  %v5865_v30 = vpop.f32.mrb[90].mxu1 }
 0x5ea   : > { %7085 = vst [vmem:[#allocation64_spill] sm:$0xff] %v5863_v23  ;;  %7086 = vst [vmem:[#allocation65_spill] sm:$0xff] %v5865_v30  ;;  %v5867_v0 = vpop.eup %4217  ;;  %v1655_v15 = vpop.xlane.xlu1 %1654 }
 0x5eb   : > { %7087 = vst [vmem:[#allocation66_spill] sm:$0xff] %v5867_v0  ;;  %v5869_v1 = vpop.f32.mrb[91].mxu1  ;;  %4227 = vpow2.f32 %v1814_v5  ;;  %v1744_v14 = vsub.f32 %v5619_v21, %v1655_v15  ;;  %v1745_v9 = vsub.f32 %v5621_v43, %v1655_v15  ;;  %v1929_v13 = vadd.f32 %v5867_v0, %v5863_v23 }
 0x5ec   : > { %7088 = vst [vmem:[#allocation67_spill] sm:$0xff] %v5869_v1  ;;  %4229 = vpow2.f32 %v1816_v2  ;;  %v7093_v0 = vmax.f32 %v5751_v46, %v5753_v42 }
 0x5ed   : > { %v5877_v19 = vpop.eup %4219  ;;  %v1818_v10 = vmul.f32 1.442695, %v1744_v14  ;;  %v1820_v3 = vmul.f32 1.442695, %v1745_v9  ;;  %1711 = vmax.xlane.f32.xlu0 %v7090_v16  ;;  %1930 = vadd.xlane.f32.xlu1 %v1929_v13  ;;  %v5882_v5 = vpop.f32.mrb[92].mxu1 }
 0x5ee   : > { %7089 = vst [vmem:[#allocation68_spill] sm:$0xff] %v5877_v19  ;;  %v5884_v21 = vpop.eup %4221  ;;  %v1658_v43 = vpop.xlane.xlu0 %1657 }
 0x5ef   : > { %7091 = vst [vmem:[#allocation69_spill] sm:$0xff] %v5884_v21  ;;  %v5886_v15 = vpop.f32.mrb[93].mxu1  ;;  %4231 = vpow2.f32 %v1818_v10  ;;  %v1746_v2 = vsub.f32 %v5627_v28, %v1658_v43  ;;  %v1747_v32 = vsub.f32 %v5629_v29, %v1658_v43  ;;  %v1932_v14 = vadd.f32 %v5884_v21, %v5877_v19 }
 0x5f0   : > { %4233 = vpow2.f32 %v1820_v3  ;;  %v7096_v21 = vmax.f32 %v5757_v54, %v5759_v45 }
 0x5f1   : > { %v5894_v9 = vpop.eup %4223  ;;  %v1822_v13 = vmul.f32 1.442695, %v1746_v2  ;;  %v1824_v23 = vmul.f32 1.442695, %v1747_v32  ;;  %1933 = vadd.xlane.f32.xlu0 %v1932_v14  ;;  %1714 = vmax.xlane.f32.xlu1 %v7093_v0  ;;  %v5899_v10 = vpop.f32.mrb[94].mxu1 }
 0x5f2   : > { %7092 = vst [vmem:[#allocation70_spill] sm:$0xff] %v5894_v9  ;;  %v5901_v28 = vpop.eup %4225  ;;  %v1661_v29 = vpop.xlane.xlu1 %1660 }
 0x5f3   : > { %7094 = vst [vmem:[#allocation71_spill] sm:$0xff] %v5901_v28  ;;  %v5903_v43 = vpop.f32.mrb[95].mxu1  ;;  %4235 = vpow2.f32 %v1822_v13  ;;  %v1748_v3 = vsub.f32 %v5635_v25, %v1661_v29  ;;  %v1749_v16 = vsub.f32 %v5637_v40, %v1661_v29  ;;  %v1935_v32 = vadd.f32 %v5901_v28, %v5894_v9 }
 0x5f4   : > { %4237 = vpow2.f32 %v1824_v23  ;;  %v7100_v28 = vmax.f32 %v5763_v56, %v5765_v35 }
 0x5f5   : > { %v5911_v0 = vpop.eup %4227  ;;  %v1826_v14 = vmul.f32 1.442695, %v1748_v3  ;;  %v1828_v19 = vmul.f32 1.442695, %v1749_v16  ;;  %1717 = vmax.xlane.f32.xlu0 %v7096_v21  ;;  %1936 = vadd.xlane.f32.xlu1 %v1935_v32  ;;  %v5916_v13 = vpop.f32.mrb[96].mxu1 }
 0x5f6   : > { %7095 = vst [vmem:[#allocation72_spill] sm:$0xff] %v5911_v0  ;;  %v5918_v25 = vpop.eup %4229  ;;  %v1664_v40 = vpop.xlane.xlu0 %1663 }
 0x5f7   : > { %7097 = vst [vmem:[#allocation73_spill] sm:$0xff] %v5918_v25  ;;  %v5920_v29 = vpop.f32.mrb[97].mxu1  ;;  %4239 = vpow2.f32 %v1826_v14  ;;  %v1750_v23 = vsub.f32 %v5643_v41, %v1664_v40  ;;  %v1751_v2 = vsub.f32 %v5645_v36, %v1664_v40  ;;  %v1938_v16 = vadd.f32 %v5918_v25, %v5911_v0 }
 0x5f8   : > { %7098 = vst [vmem:[#allocation74_spill] sm:$0xff] %v5920_v29  ;;  %4241 = vpow2.f32 %v1828_v19  ;;  %v7105_v25 = vmax.f32 %v5769_v33, %v5771_v34 }
 0x5f9   : > { %v5928_v3 = vpop.eup %4231  ;;  %v1830_v32 = vmul.f32 1.442695, %v1750_v23  ;;  %v1832_v9 = vmul.f32 1.442695, %v1751_v2  ;;  %1939 = vadd.xlane.f32.xlu0 %v1938_v16  ;;  %1720 = vmax.xlane.f32.xlu1 %v7100_v28  ;;  %v5933_v14 = vpop.f32.mrb[98].mxu1 }
 0x5fa   : > { %7099 = vst [vmem:[#allocation75_spill] sm:$0xff] %v5928_v3  ;;  %7101 = vst [vmem:[#allocation76_spill] sm:$0xff] %v5933_v14  ;;  %v5935_v41 = vpop.eup %4233  ;;  %v1667_v36 = vpop.xlane.xlu1 %1666 }
 0x5fb   : > { %7102 = vst [vmem:[#allocation77_spill] sm:$0xff] %v5935_v41  ;;  %v5937_v40 = vpop.f32.mrb[99].mxu1  ;;  %4243 = vpow2.f32 %v1830_v32  ;;  %v1752_v19 = vsub.f32 %v5651_v38, %v1667_v36  ;;  %v1753_v21 = vsub.f32 %v5653_v39, %v1667_v36  ;;  %v1941_v2 = vadd.f32 %v5935_v41, %v5928_v3 }
 0x5fc   : > { %7103 = vst [vmem:[#allocation78_spill] sm:$0xff] %v5937_v40  ;;  %4245 = vpow2.f32 %v1832_v9  ;;  %v7110_v41 = vmax.f32 %v5775_v26, %v5777_v27 }
 0x5fd   : > { %v5945_v28 = vpop.eup %4235  ;;  %v1834_v16 = vmul.f32 1.442695, %v1752_v19  ;;  %v1836_v0 = vmul.f32 1.442695, %v1753_v21  ;;  %1723 = vmax.xlane.f32.xlu0 %v7105_v25  ;;  %1942 = vadd.xlane.f32.xlu1 %v1941_v2  ;;  %v5950_v32 = vpop.f32.mrb[100].mxu1 }
 0x5fe   : > { %7104 = vst [vmem:[#allocation79_spill] sm:$0xff] %v5945_v28  ;;  %7106 = vst [vmem:[#allocation80_spill] sm:$0xff] %v5950_v32  ;;  %v5952_v38 = vpop.eup %4237  ;;  %v1670_v39 = vpop.xlane.xlu0 %1669 }
 0x5ff   : > { %7107 = vst [vmem:[#allocation81_spill] sm:$0xff] %v5952_v38  ;;  %v5954_v36 = vpop.f32.mrb[101].mxu1  ;;  %4247 = vpow2.f32 %v1834_v16  ;;  %v1754_v9 = vsub.f32 %v5659_v18, %v1670_v39  ;;  %v1755_v23 = vsub.f32 %v5661_v47, %v1670_v39  ;;  %v1944_v21 = vadd.f32 %v5952_v38, %v5945_v28 }
 0x600   : > { %7108 = vst [vmem:[#allocation82_spill] sm:$0xff] %v5954_v36  ;;  %4249 = vpow2.f32 %v1836_v0  ;;  %v7115_v38 = vmax.f32 %v5781_v31, %v5783_v62 }
 0x601   : > { %v5962_v19 = vpop.eup %4239  ;;  %v1838_v2 = vmul.f32 1.442695, %v1754_v9  ;;  %v1840_v3 = vmul.f32 1.442695, %v1755_v23  ;;  %1945 = vadd.xlane.f32.xlu0 %v1944_v21  ;;  %1726 = vmax.xlane.f32.xlu1 %v7110_v41  ;;  %v5967_v16 = vpop.f32.mrb[102].mxu1 }
 0x602   : > { %7109 = vst [vmem:[#allocation83_spill] sm:$0xff] %v5962_v19  ;;  %7111 = vst [vmem:[#allocation84_spill] sm:$0xff] %v5967_v16  ;;  %v5969_v18 = vpop.eup %4241  ;;  %v1673_v47 = vpop.xlane.xlu1 %1672 }
 0x603   : > { %7112 = vst [vmem:[#allocation85_spill] sm:$0xff] %v5969_v18  ;;  %v5971_v39 = vpop.f32.mrb[103].mxu1  ;;  %4251 = vpow2.f32 %v1838_v2  ;;  %v1756_v0 = vsub.f32 %v5667_v49, %v1673_v47  ;;  %v1757_v25 = vsub.f32 %v5669_v50, %v1673_v47  ;;  %v1947_v23 = vadd.f32 %v5969_v18, %v5962_v19 }
 0x604   : > { %7113 = vst [vmem:[#allocation86_spill] sm:$0xff] %v5971_v39  ;;  %4253 = vpow2.f32 %v1840_v3  ;;  %v7118_v18 = vmax.f32 %v5787_v58, %v5789_v51 }
 0x605   : > { %v5979_v41 = vpop.eup %4243  ;;  %v1842_v21 = vmul.f32 1.442695, %v1756_v0  ;;  %v1844_v28 = vmul.f32 1.442695, %v1757_v25  ;;  %1729 = vmax.xlane.f32.xlu0 %v7115_v38  ;;  %1948 = vadd.xlane.f32.xlu1 %v1947_v23  ;;  %v5984_v2 = vpop.f32.mrb[104].mxu1 }
 0x606   : > { %7114 = vst [vmem:[#allocation87_spill] sm:$0xff] %v5979_v41  ;;  %v5986_v49 = vpop.eup %4245  ;;  %v1676_v50 = vpop.xlane.xlu0 %1675 }
 0x607   : > { %7116 = vst [vmem:[#allocation88_spill] sm:$0xff] %v5986_v49  ;;  %v5988_v47 = vpop.f32.mrb[105].mxu1  ;;  %4255 = vpow2.f32 %v1842_v21  ;;  %v1758_v3 = vsub.f32 %v5673_v52, %v1676_v50  ;;  %v1759_v9 = vsub.f32 %v5675_v53, %v1676_v50  ;;  %v1950_v25 = vadd.f32 %v5986_v49, %v5979_v41 }
 0x608   : > { %4257 = vpow2.f32 %v1844_v28  ;;  %v7121_v49 = vmax.f32 %v5793_v48, %v5795_v44  ;;  %v7132_v44 = vld [vmem:[#allocation50_spill] sm:$0xff] }
 0x609   : > { %v5996_v0 = vpop.eup %4247  ;;  %v1846_v23 = vmul.f32 1.442695, %v1758_v3  ;;  %v1848_v19 = vmul.f32 1.442695, %v1759_v9  ;;  %1951 = vadd.xlane.f32.xlu0 %v1950_v25  ;;  %1732 = vmax.xlane.f32.xlu1 %v7118_v18  ;;  %v6001_v21 = vpop.f32.mrb[106].mxu1 }
 0x60a   : > { %7117 = vst [vmem:[#allocation89_spill] sm:$0xff] %v5996_v0  ;;  %v6003_v52 = vpop.eup %4249  ;;  %v1679_v53 = vpop.xlane.xlu1 %1678 }
 0x60b   : > { %7119 = vst [vmem:[#allocation90_spill] sm:$0xff] %v6003_v52  ;;  %v6005_v50 = vpop.f32.mrb[107].mxu1  ;;  %4259 = vpow2.f32 %v1846_v23  ;;  %v1760_v28 = vsub.f32 %v5679_v55, %v1679_v53  ;;  %v1761_v38 = vsub.f32 %v5681_v57, %v1679_v53  ;;  %v1953_v9 = vadd.f32 %v6003_v52, %v5996_v0 }
 0x60c   : > { %4261 = vpow2.f32 %v1848_v19  ;;  %v7124_v52 = vmax.f32 %v5799_v37, %v5801_v60  ;;  %v7131_v37 = vld [vmem:[#allocation49_spill] sm:$0xff] }
 0x60d   : > { %v6013_v18 = vpop.eup %4251  ;;  %v1850_v25 = vmul.f32 1.442695, %v1760_v28  ;;  %v1852_v41 = vmul.f32 1.442695, %v1761_v38  ;;  %1954 = vadd.xlane.f32.xlu1 %v1953_v9  ;;  %2665 = vmax.xlane.f32.xlu0 %v7121_v49  ;;  %v6018_v23 = vpop.f32.mrb[108].mxu1  ;;  %v7129_v28 = vld [vmem:[#allocation28_spill] sm:$0xff]  ;;  %v7133_v48 = vmax.f32 %v7131_v37, %v7132_v44 }
 0x60e   : > { %7120 = vst [vmem:[#allocation91_spill] sm:$0xff] %v6013_v18  ;;  %v6020_v55 = vpop.eup %4253  ;;  %v1682_v57 = vpop.xlane.xlu0 %1681  ;;  %v7138_v37 = vld [vmem:[#allocation51_spill] sm:$0xff] }
 0x60f   : > { %7122 = vst [vmem:[#allocation92_spill] sm:$0xff] %v6020_v55  ;;  %v6022_v53 = vpop.f32.mrb[109].mxu1  ;;  %4263 = vpow2.f32 %v1850_v25  ;;  %v1762_v19 = vsub.f32 %v5685_v59, %v1682_v57  ;;  %v1763_v3 = vsub.f32 %v5687_v61, %v1682_v57  ;;  %v1956_v38 = vadd.f32 %v6020_v55, %v6013_v18 }
 0x610   : > { %4265 = vpow2.f32 %v1852_v41  ;;  %v7128_v41 = vld [vmem:[#allocation27_spill] sm:$0xff] }
 0x611   : > { %v6030_v49 = vpop.eup %4255  ;;  %v1854_v9 = vmul.f32 1.442695, %v1762_v19  ;;  %v1856_v0 = vmul.f32 1.442695, %v1763_v3  ;;  %1957 = vadd.xlane.f32.xlu0 %v1956_v38  ;;  %2668 = vmax.xlane.f32.xlu1 %v7124_v52  ;;  %v6035_v25 = vpop.f32.mrb[110].mxu1  ;;  %v7136_v19 = vld [vmem:[#allocation30_spill] sm:$0xff] }
 0x612   : > { %7123 = vst [vmem:[#allocation93_spill] sm:$0xff] %v6030_v49  ;;  %7125 = vst [vmem:[#allocation94_spill] sm:$0xff] %v6035_v25  ;;  %v6037_v59 = vpop.eup %4257  ;;  %v1685_v61 = vpop.xlane.xlu1 %1684 }
 0x613   : > { %7126 = vst [vmem:[#allocation95_spill] sm:$0xff] %v6037_v59  ;;  %v6039_v57 = vpop.f32.mrb[111].mxu1  ;;  %4267 = vpow2.f32 %v1854_v9  ;;  %v1764_v18 = vsub.f32 %v7128_v41, %v1685_v61  ;;  %v1765_v55 = vsub.f32 %v7129_v28, %v1685_v61  ;;  %v1959_v3 = vadd.f32 %v6037_v59, %v6030_v49 }
 0x614   : > { %7127 = vst [vmem:[#allocation96_spill] sm:$0xff] %v6039_v57  ;;  %4269 = vpow2.f32 %v1856_v0  ;;  %v7135_v0 = vld [vmem:[#allocation29_spill] sm:$0xff]  ;;  %v7139_v57 = vld [vmem:[#allocation52_spill] sm:$0xff] }
 0x615   : > { %v6047_v52 = vpop.eup %4259  ;;  %v1858_v38 = vmul.f32 1.442695, %v1764_v18  ;;  %v1860_v60 = vmul.f32 1.442695, %v1765_v55  ;;  %1960 = vadd.xlane.f32.xlu1 %v1959_v3  ;;  %2671 = vmax.xlane.f32.xlu0 %v7133_v48  ;;  %v6052_v9 = vpop.f32.mrb[112].mxu1  ;;  %v7140_v25 = vmax.f32 %v7138_v37, %v7139_v57  ;;  %v7143_v55 = vld [vmem:[#allocation32_spill] sm:$0xff]  ;;  %v7145_v37 = vmax.f32 %v5817_v20, %v5819_v11 }
 0x616   : > { %7130 = vst [vmem:[#allocation27_spill] sm:$0xff] %v6047_v52  ;;  %v6054_v41 = vpop.eup %4261  ;;  %v1688_v28 = vpop.xlane.xlu0 %1687  ;;  %v7151_v20 = vmax.f32 %v5825_v24, %v5827_v63  ;;  %v7158_v24 = vld [vmem:[#allocation58_spill] sm:$0xff] }
 0x617   : > { %7134 = vst [vmem:[#allocation28_spill] sm:$0xff] %v6054_v41  ;;  %v6056_v61 = vpop.f32.mrb[113].mxu1  ;;  %4271 = vpow2.f32 %v1858_v38  ;;  %v1766_v49 = vsub.f32 %v7135_v0, %v1688_v28  ;;  %v1767_v59 = vsub.f32 %v7136_v19, %v1688_v28  ;;  %v1962_v18 = vadd.f32 %v6054_v41, %v6047_v52 }
 0x618   : > { %4273 = vpow2.f32 %v1860_v60  ;;  %v7142_v60 = vld [vmem:[#allocation31_spill] sm:$0xff] }
 0x619   : > { %v6064_v48 = vpop.eup %4263  ;;  %v1862_v3 = vmul.f32 1.442695, %v1766_v49  ;;  %v1864_v44 = vmul.f32 1.442695, %v1767_v59  ;;  %1963 = vadd.xlane.f32.xlu0 %v1962_v18  ;;  %2674 = vmax.xlane.f32.xlu1 %v7140_v25  ;;  %v6069_v38 = vpop.f32.mrb[114].mxu1  ;;  %v7149_v59 = vld [vmem:[#allocation34_spill] sm:$0xff] }
 0x61a   : > { %7137 = vst [vmem:[#allocation29_spill] sm:$0xff] %v6064_v48  ;;  %v6071_v0 = vpop.eup %4265  ;;  %v1691_v19 = vpop.xlane.xlu1 %1690 }
 0x61b   : > { %7141 = vst [vmem:[#allocation30_spill] sm:$0xff] %v6071_v0  ;;  %v6073_v28 = vpop.f32.mrb[115].mxu1  ;;  %4275 = vpow2.f32 %v1862_v3  ;;  %v1768_v52 = vsub.f32 %v7142_v60, %v1691_v19  ;;  %v1769_v41 = vsub.f32 %v7143_v55, %v1691_v19  ;;  %v1965_v49 = vadd.f32 %v6071_v0, %v6064_v48 }
 0x61c   : > { %4277 = vpow2.f32 %v1864_v44  ;;  %v7148_v44 = vld [vmem:[#allocation33_spill] sm:$0xff] }
 0x61d   : > { %v6081_v25 = vpop.eup %4267  ;;  %v1866_v18 = vmul.f32 1.442695, %v1768_v52  ;;  %v1868_v57 = vmul.f32 1.442695, %v1769_v41  ;;  %1966 = vadd.xlane.f32.xlu1 %v1965_v49  ;;  %2677 = vmax.xlane.f32.xlu0 %v7145_v37  ;;  %v6086_v3 = vpop.f32.mrb[116].mxu1  ;;  %v7156_v41 = vld [vmem:[#allocation36_spill] sm:$0xff] }
 0x61e   : > { %7144 = vst [vmem:[#allocation31_spill] sm:$0xff] %v6081_v25  ;;  %v6088_v60 = vpop.eup %4269  ;;  %v1694_v55 = vpop.xlane.xlu0 %1693 }
 0x61f   : > { %7146 = vst [vmem:[#allocation32_spill] sm:$0xff] %v6088_v60  ;;  %v6090_v19 = vpop.f32.mrb[117].mxu1  ;;  %4279 = vpow2.f32 %v1866_v18  ;;  %v1770_v48 = vsub.f32 %v7148_v44, %v1694_v55  ;;  %v1771_v0 = vsub.f32 %v7149_v59, %v1694_v55  ;;  %v1968_v52 = vadd.f32 %v6088_v60, %v6081_v25 }
 0x620   : > { %7147 = vst [vmem:[#allocation97_spill] sm:$0xff] %v6090_v19  ;;  %4281 = vpow2.f32 %v1868_v57  ;;  %v7155_v57 = vld [vmem:[#allocation35_spill] sm:$0xff]  ;;  %v7159_v19 = vmax.f32 %v5833_v22, %v7158_v24  ;;  %v7164_v22 = vld [vmem:[#allocation60_spill] sm:$0xff] }
 0x621   : > { %v6098_v37 = vpop.eup %4271  ;;  %v1870_v49 = vmul.f32 1.442695, %v1770_v48  ;;  %v1872_v11 = vmul.f32 1.442695, %v1771_v0  ;;  %1969 = vadd.xlane.f32.xlu0 %v1968_v52  ;;  %2680 = vmax.xlane.f32.xlu1 %v7151_v20  ;;  %v6103_v18 = vpop.f32.mrb[118].mxu1  ;;  %v7162_v0 = vld [vmem:[#allocation38_spill] sm:$0xff] }
 0x622   : > { %7150 = vst [vmem:[#allocation33_spill] sm:$0xff] %v6098_v37  ;;  %7152 = vst [vmem:[#allocation34_spill] sm:$0xff] %v6103_v18  ;;  %v6105_v44 = vpop.eup %4273  ;;  %v1697_v59 = vpop.xlane.xlu1 %1696 }
 0x623   : > { %7153 = vst [vmem:[#allocation98_spill] sm:$0xff] %v6105_v44  ;;  %v6107_v55 = vpop.f32.mrb[119].mxu1  ;;  %4283 = vpow2.f32 %v1870_v49  ;;  %v1772_v25 = vsub.f32 %v7155_v57, %v1697_v59  ;;  %v1773_v60 = vsub.f32 %v7156_v41, %v1697_v59  ;;  %v1971_v48 = vadd.f32 %v6105_v44, %v6098_v37 }
 0x624   : > { %7154 = vst [vmem:[#allocation99_spill] sm:$0xff] %v6107_v55  ;;  %4285 = vpow2.f32 %v1872_v11  ;;  %v7161_v11 = vld [vmem:[#allocation37_spill] sm:$0xff]  ;;  %v7165_v55 = vmax.f32 %v5841_v7, %v7164_v22  ;;  %v7170_v7 = vmax.f32 %v5851_v6, %v5855_v4  ;;  %v7175_v6 = vmax.f32 %v5865_v30, %v5869_v1 }
 0x625   : > { %v6115_v20 = vpop.eup %4275  ;;  %v1874_v52 = vmul.f32 1.442695, %v1772_v25  ;;  %v1876_v63 = vmul.f32 1.442695, %v1773_v60  ;;  %1972 = vadd.xlane.f32.xlu1 %v1971_v48  ;;  %2683 = vmax.xlane.f32.xlu0 %v7159_v19  ;;  %v6120_v49 = vpop.f32.mrb[120].mxu1  ;;  %v7168_v60 = vld [vmem:[#allocation40_spill] sm:$0xff]  ;;  %v7180_v30 = vmax.f32 %v5882_v5, %v5886_v15 }
 0x626   : > { %7157 = vst [vmem:[#allocation35_spill] sm:$0xff] %v6115_v20  ;;  %v6122_v57 = vpop.eup %4277  ;;  %v1700_v41 = vpop.xlane.xlu0 %1699 }
 0x627   : > { %7160 = vst [vmem:[#allocation36_spill] sm:$0xff] %v6122_v57  ;;  %v6124_v59 = vpop.f32.mrb[121].mxu1  ;;  %4287 = vpow2.f32 %v1874_v52  ;;  %v1774_v37 = vsub.f32 %v7161_v11, %v1700_v41  ;;  %v1775_v44 = vsub.f32 %v7162_v0, %v1700_v41  ;;  %v1974_v25 = vadd.f32 %v6122_v57, %v6115_v20 }
 0x628   : > { %4289 = vpow2.f32 %v1876_v63  ;;  %v7167_v63 = vld [vmem:[#allocation39_spill] sm:$0xff] }
 0x629   : > { %v6132_v19 = vpop.eup %4279  ;;  %v1878_v48 = vmul.f32 1.442695, %v1774_v37  ;;  %v1880_v24 = vmul.f32 1.442695, %v1775_v44  ;;  %1975 = vadd.xlane.f32.xlu0 %v1974_v25  ;;  %2686 = vmax.xlane.f32.xlu1 %v7165_v55  ;;  %v6137_v52 = vpop.f32.mrb[122].mxu1  ;;  %v7173_v44 = vld [vmem:[#allocation42_spill] sm:$0xff] }
 0x62a   : > { %7163 = vst [vmem:[#allocation37_spill] sm:$0xff] %v6132_v19  ;;  %v6139_v11 = vpop.eup %4281  ;;  %v1703_v0 = vpop.xlane.xlu1 %1702 }
 0x62b   : > { %7166 = vst [vmem:[#allocation38_spill] sm:$0xff] %v6139_v11  ;;  %v6141_v41 = vpop.f32.mrb[123].mxu1  ;;  %4291 = vpow2.f32 %v1878_v48  ;;  %v1776_v20 = vsub.f32 %v7167_v63, %v1703_v0  ;;  %v1777_v57 = vsub.f32 %v7168_v60, %v1703_v0  ;;  %v1977_v37 = vadd.f32 %v6139_v11, %v6132_v19 }
 0x62c   : > { %4293 = vpow2.f32 %v1880_v24  ;;  %v7172_v24 = vld [vmem:[#allocation41_spill] sm:$0xff] }
 0x62d   : > { %v6149_v55 = vpop.eup %4283  ;;  %v1882_v25 = vmul.f32 1.442695, %v1776_v20  ;;  %v1884_v22 = vmul.f32 1.442695, %v1777_v57  ;;  %1978 = vadd.xlane.f32.xlu1 %v1977_v37  ;;  %2689 = vmax.xlane.f32.xlu0 %v7170_v7  ;;  %v6154_v48 = vpop.f32.mrb[124].mxu1  ;;  %v7178_v57 = vld [vmem:[#allocation44_spill] sm:$0xff] }
 0x62e   : > { %7169 = vst [vmem:[#allocation39_spill] sm:$0xff] %v6149_v55  ;;  %v6156_v63 = vpop.eup %4285  ;;  %v1706_v60 = vpop.xlane.xlu0 %1705 }
 0x62f   : > { %7171 = vst [vmem:[#allocation40_spill] sm:$0xff] %v6156_v63  ;;  %v6158_v0 = vpop.f32.mrb[125].mxu1  ;;  %4295 = vpow2.f32 %v1882_v25  ;;  %v1778_v19 = vsub.f32 %v7172_v24, %v1706_v60  ;;  %v1779_v11 = vsub.f32 %v7173_v44, %v1706_v60  ;;  %v1980_v20 = vadd.f32 %v6156_v63, %v6149_v55 }
 0x630   : > { %4297 = vpow2.f32 %v1884_v22  ;;  %v7177_v22 = vld [vmem:[#allocation43_spill] sm:$0xff] }
 0x631   : > { %v6166_v7 = vpop.eup %4287  ;;  %v1886_v37 = vmul.f32 1.442695, %v1778_v19  ;;  %v1888_v4 = vmul.f32 1.442695, %v1779_v11  ;;  %1981 = vadd.xlane.f32.xlu0 %v1980_v20  ;;  %2692 = vmax.xlane.f32.xlu1 %v7175_v6  ;;  %v6171_v25 = vpop.f32.mrb[126].mxu1 }
 0x632   : > { %7174 = vst [vmem:[#allocation41_spill] sm:$0xff] %v6166_v7  ;;  %v6173_v24 = vpop.eup %4289  ;;  %v1709_v44 = vpop.xlane.xlu1 %1708 }
 0x633   : > { %7176 = vst [vmem:[#allocation42_spill] sm:$0xff] %v6173_v24  ;;  %v6175_v60 = vpop.f32.mrb[127].mxu1  ;;  %4299 = vpow2.f32 %v1886_v37  ;;  %v1780_v55 = vsub.f32 %v7177_v22, %v1709_v44  ;;  %v1781_v63 = vsub.f32 %v7178_v57, %v1709_v44  ;;  %v1983_v19 = vadd.f32 %v6173_v24, %v6166_v7 }
 0x634   : > { %4301 = vpow2.f32 %v1888_v4 }
 0x635   : > { %v6183_v6 = vpop.eup %4291  ;;  %v1890_v20 = vmul.f32 1.442695, %v1780_v55  ;;  %v1892_v1 = vmul.f32 1.442695, %v1781_v63  ;;  %1984 = vadd.xlane.f32.xlu1 %v1983_v19  ;;  %2695 = vmax.xlane.f32.xlu0 %v7180_v30  ;;  %v6188_v37 = vpop.f32.mrb[128].mxu1  ;;  %v7183_v30 = vmax.f32 %v5899_v10, %v5903_v43 }
 0x636   : > { %7179 = vst [vmem:[#allocation43_spill] sm:$0xff] %v6183_v6  ;;  %v6190_v22 = vpop.eup %4293  ;;  %v6192_v57 = vpop.f32.mrb[129].mxu1 }
 0x637   : > { %7181 = vst [vmem:[#allocation44_spill] sm:$0xff] %v6190_v22  ;;  %4303 = vpow2.f32 %v1890_v20  ;;  %v1986_v4 = vadd.f32 %v6190_v22, %v6183_v6 }
 0x638   : > { %4305 = vpow2.f32 %v1892_v1 }
 0x639   : > { %v6198_v55 = vpop.eup %4295  ;;  %1987 = vadd.xlane.f32.xlu0 %v1986_v4  ;;  %2698 = vmax.xlane.f32.xlu1 %v7183_v30  ;;  %v6203_v63 = vpop.f32.mrb[130].mxu1  ;;  %v7186_v4 = vmax.f32 %v5916_v13, %v5920_v29 }
 0x63a   : > { %7182 = vst [vmem:[#allocation100_spill] sm:$0xff] %v6198_v55  ;;  %v6205_v19 = vpop.eup %4297  ;;  %v6207_v11 = vpop.f32.mrb[131].mxu1 }
 0x63b   : > { %7184 = vst [vmem:[#allocation101_spill] sm:$0xff] %v6205_v19  ;;  %v1989_v20 = vadd.f32 %v6205_v19, %v6198_v55 }
 0x63d   : > { %v6213_v1 = vpop.eup %4299  ;;  %1990 = vadd.xlane.f32.xlu1 %v1989_v20  ;;  %2701 = vmax.xlane.f32.xlu0 %v7186_v4  ;;  %v6218_v30 = vpop.f32.mrb[132].mxu1  ;;  %v7189_v20 = vmax.f32 %v5933_v14, %v5937_v40 }
 0x63e   : > { %7185 = vst [vmem:[#allocation102_spill] sm:$0xff] %v6213_v1  ;;  %v6220_v6 = vpop.eup %4301  ;;  %v6222_v22 = vpop.f32.mrb[133].mxu1 }
 0x63f   : > { %7187 = vst [vmem:[#allocation103_spill] sm:$0xff] %v6220_v6  ;;  %v1992_v7 = vadd.f32 %v6220_v6, %v6213_v1 }
 0x641   : > { %v6228_v44 = vpop.eup %4303  ;;  %1993 = vadd.xlane.f32.xlu0 %v1992_v7  ;;  %2704 = vmax.xlane.f32.xlu1 %v7189_v20  ;;  %v6233_v4 = vpop.f32.mrb[134].mxu1  ;;  %v7192_v7 = vmax.f32 %v5950_v32, %v5954_v36  ;;  %v7193_v20 = vmax.f32 %v5967_v16, %v5971_v39 }
 0x642   : > { %7188 = vst [vmem:[#allocation104_spill] sm:$0xff] %v6228_v44  ;;  %v6235_v19 = vpop.eup %4305  ;;  %v6237_v24 = vpop.f32.mrb[135].mxu1 }
 0x643   : > { %7190 = vst [vmem:[#allocation105_spill] sm:$0xff] %v6235_v19  ;;  %7191 = vst [vmem:[#allocation106_spill] sm:$0xff] %v6237_v24  ;;  %v1995_v29 = vadd.f32 %v6235_v19, %v6228_v44 }
 0x645   : > { %1996 = vadd.xlane.f32.xlu1 %v1995_v29  ;;  %2707 = vmax.xlane.f32.xlu0 %v7192_v7 }
 0x649   : > { %2710 = vmax.xlane.f32.xlu1 %v7193_v20 }
 0x676   : > { %v1928_v55 = vpop.xlane.xlu0 %1927 }
 0x677   : > { %4307 = vrcp.f32 %v1928_v55 }
 0x67a   : > { %v1712_v6 = vpop.xlane.xlu0 %1711  ;;  %v1931_v40 = vpop.xlane.xlu1 %1930 }
 0x67b   : > { %v1782_v14 = vsub.f32 %v5745_v8, %v1712_v6  ;;  %v1783_v44 = vsub.f32 %v5747_v17, %v1712_v6  ;;  %4309 = vrcp.f32 %v1931_v40 }
 0x67d   : > { %v1894_v19 = vmul.f32 1.442695, %v1782_v14  ;;  %v1896_v1 = vmul.f32 1.442695, %v1783_v44 }
 0x67e   : > { %v1934_v29 = vpop.xlane.xlu0 %1933  ;;  %v1715_v24 = vpop.xlane.xlu1 %1714 }
 0x67f   : > { %4311 = vpow2.f32 %v1894_v19  ;;  %v1784_v7 = vsub.f32 %v5751_v46, %v1715_v24  ;;  %v1785_v36 = vsub.f32 %v5753_v42, %v1715_v24  ;;  %v7194_v24 = vld [vmem:[#allocation66_spill] sm:$0xff] }
 0x680   : > { %4313 = vpow2.f32 %v1896_v1 }
 0x681   : > { %4315 = vrcp.f32 %v1934_v29  ;;  %v1898_v20 = vmul.f32 1.442695, %v1784_v7  ;;  %v1900_v55 = vmul.f32 1.442695, %v1785_v36  ;;  %v4308_v32 = vpop.eup %4307  ;;  %v7195_v36 = vld [vmem:[#allocation61_spill] sm:$0xff]  ;;  %v7196_v29 = vld [vmem:[#allocation64_spill] sm:$0xff] }
 0x682   : > { %v1718_v39 = vpop.xlane.xlu0 %1717  ;;  %v1937_v16 = vpop.xlane.xlu1 %1936  ;;  %v2087_v42 = vmul.f32 %v4308_v32, %v5853_v12  ;;  %v2086_v1 = vmul.f32 %v4308_v32, %v7195_v36  ;;  %v7197_v36 = vld [vmem:[#allocation69_spill] sm:$0xff] }
 0x683   : > { %4317 = vpow2.f32 %v1898_v20  ;;  %v1786_v8 = vsub.f32 %v5757_v54, %v1718_v39  ;;  %v1787_v17 = vsub.f32 %v5759_v45, %v1718_v39 }
 0x684   : > { %4319 = vpow2.f32 %v1900_v55 }
 0x685   : > { %v4310_v14 = vpop.eup %4309  ;;  %v1902_v40 = vmul.f32 1.442695, %v1786_v8  ;;  %v1904_v6 = vmul.f32 1.442695, %v1787_v17  ;;  %4321 = vrcp.f32 %v1937_v16 }
 0x686   : > { %v1940_v46 = vpop.xlane.xlu0 %1939  ;;  %v1721_v44 = vpop.xlane.xlu1 %1720  ;;  %v2089_v19 = vmul.f32 %v4310_v14, %v7194_v24  ;;  %v2088_v7 = vmul.f32 %v4310_v14, %v7196_v29 }
 0x687   : > { %4323 = vpow2.f32 %v1902_v40  ;;  %v1788_v54 = vsub.f32 %v5763_v56, %v1721_v44  ;;  %v1789_v45 = vsub.f32 %v5765_v35, %v1721_v44 }
 0x688   : > { %4325 = vpow2.f32 %v1904_v6  ;;  %v3918_v39 = vpack.c.bf16 %v2089_v19, %v2087_v42  ;;  %v3920_v20 = vpack.c.bf16 %v2088_v7, %v2086_v1 }
 0x689   : > { %v6261_v55 = vpop.eup %4311  ;;  %4327 = vrcp.f32 %v1940_v46  ;;  %v1906_v16 = vmul.f32 1.442695, %v1788_v54  ;;  %v1908_v8 = vmul.f32 1.442695, %v1789_v45  ;;  %v7198_v54 = vld [vmem:[#allocation71_spill] sm:$0xff] }
 0x68a   : > { %v6263_v12 = vpop.eup %4313  ;;  %v1724_v17 = vpop.xlane.xlu0 %1723  ;;  %3919 = vmatprep.subr.bf16.mxu0 %v3918_v39  ;;  %v7199_v39 = vld [vmem:[#allocation68_spill] sm:$0xff] }
 0x68b   : > { %v1943_v32 = vpop.xlane.xlu1 %1942  ;;  %v4316_v24 = vpop.eup %4315  ;;  %4329 = vpow2.f32 %v1906_v16  ;;  %v1790_v14 = vsub.f32 %v5769_v33, %v1724_v17  ;;  %v1791_v56 = vsub.f32 %v5771_v34, %v1724_v17  ;;  %3921 = vmatpush1.bf16.xpose.msra.mxu0 %v3920_v20  ;;  %v1998_v35 = vadd.f32 %v6263_v12, %v6261_v55  ;;  %v7200_v16 = vld [vmem:[#allocation70_spill] sm:$0xff] }
 0x68c   : > { %4331 = vpow2.f32 %v1908_v8  ;;  %v2091_v1 = vmul.f32 %v4316_v24, %v7197_v36  ;;  %v2090_v20 = vmul.f32 %v4316_v24, %v7199_v39 }
 0x68d   : > { %v6269_v40 = vpop.eup %4317  ;;  %v1910_v6 = vmul.f32 1.442695, %v1790_v14  ;;  %v1912_v46 = vmul.f32 1.442695, %v1791_v56  ;;  %4333 = vrcp.f32 %v1943_v32  ;;  %1999 = vadd.xlane.f32.xlu0 %v1998_v35 }
 0x68e   : > { %v6271_v44 = vpop.eup %4319  ;;  %v1946_v42 = vpop.xlane.xlu0 %1945 }
 0x68f   : > { %v1727_v19 = vpop.xlane.xlu1 %1726  ;;  %v4322_v33 = vpop.eup %4321  ;;  %4335 = vpow2.f32 %v1910_v6  ;;  %v2001_v7 = vadd.f32 %v6271_v44, %v6269_v40 }
 0x690   : > { %v1792_v34 = vsub.f32 %v5775_v26, %v1727_v19  ;;  %v1793_v29 = vsub.f32 %v5777_v27, %v1727_v19  ;;  %4337 = vpow2.f32 %v1912_v46  ;;  %v2093_v45 = vmul.f32 %v4322_v33, %v7198_v54  ;;  %v7204_v54 = vld [vmem:[#allocation73_spill] sm:$0xff] }
 0x691   : > { %v2092_v8 = vmul.f32 %v4322_v33, %v7200_v16  ;;  %v6281_v17 = vpop.eup %4323  ;;  %4339 = vrcp.f32 %v1946_v42  ;;  %2002 = vadd.xlane.f32.xlu1 %v2001_v7  ;;  %v7201_v26 = vmax.f32 %v5984_v2, %v5988_v47  ;;  %v7203_v7 = vmax.f32 %v6001_v21, %v6005_v50 }
 0x692   : > { %v1914_v32 = vmul.f32 1.442695, %v1792_v34  ;;  %v1916_v14 = vmul.f32 1.442695, %v1793_v29  ;;  %v6286_v27 = vpop.eup %4325  ;;  %v1730_v56 = vpop.xlane.xlu0 %1729  ;;  %v3922_v35 = vpack.c.bf16 %v2093_v45, %v2091_v1 }
 0x693   : > { %2713 = vmax.xlane.f32.xlu0 %v7201_v26  ;;  %v1949_v6 = vpop.xlane.xlu1 %1948  ;;  %v3924_v46 = vpack.c.bf16 %v2092_v8, %v2090_v20  ;;  %v4328_v19 = vpop.eup %4327  ;;  %v1794_v24 = vsub.f32 %v5781_v31, %v1730_v56  ;;  %v1795_v36 = vsub.f32 %v5783_v62, %v1730_v56  ;;  %v2004_v42 = vadd.f32 %v6286_v27, %v6281_v17  ;;  %v7206_v26 = vld [vmem:[#allocation72_spill] sm:$0xff] }
 0x694   : > { %4341 = vpow2.f32 %v1914_v32  ;;  %3923 = vmatprep.subr.bf16.mxu0 %v3922_v35  ;;  %v2095_v45 = vmul.f32 %v4328_v19, %v7204_v54  ;;  %v7205_v32 = vld [vmem:[#allocation77_spill] sm:$0xff]  ;;  %v2094_v56 = vmul.f32 %v4328_v19, %v7206_v26  ;;  %v7207_v35 = vld [vmem:[#allocation75_spill] sm:$0xff]  ;;  %v7216_v26 = vld [vmem:[#allocation96_spill] sm:$0xff] }
 0x695   : > { %4343 = vpow2.f32 %v1916_v14  ;;  %v6292_v33 = vpop.eup %4329  ;;  %v1918_v34 = vmul.f32 1.442695, %v1794_v24  ;;  %v1920_v29 = vmul.f32 1.442695, %v1795_v36  ;;  %3925 = vmatpush1.bf16.xpose.msra.mxu0 %v3924_v46  ;;  %2716 = vmax.xlane.f32.xlu1 %v7203_v7  ;;  %v7211_v19 = vld [vmem:[#allocation45_spill] sm:$0xff] }
 0x696   : > { %7202 = vst [vmem:[#allocation66_spill] sm:$0xff] %v6292_v33  ;;  %4345 = vrcp.f32 %v1949_v6  ;;  %v6294_v1 = vpop.eup %4331  ;;  %v1952_v31 = vpop.xlane.xlu0 %1951 }
 0x697   : > { %2005 = vadd.xlane.f32.xlu0 %v2004_v42  ;;  %v1733_v62 = vpop.xlane.xlu1 %1732  ;;  %v4334_v39 = vpop.eup %4333  ;;  %4347 = vpow2.f32 %v1918_v34  ;;  %v2007_v8 = vadd.f32 %v6294_v1, %v6292_v33 }
 0x698   : > { %v1796_v20 = vsub.f32 %v5787_v58, %v1733_v62  ;;  %v1797_v16 = vsub.f32 %v5789_v51, %v1733_v62  ;;  %4349 = vpow2.f32 %v1920_v29  ;;  %v2097_v14 = vmul.f32 %v4334_v39, %v7205_v32 }
 0x699   : > { %v2096_v6 = vmul.f32 %v4334_v39, %v7207_v35  ;;  %v6307_v46 = vpop.eup %4335  ;;  %4351 = vrcp.f32 %v1952_v31  ;;  %v7209_v58 = vmax.f32 %v6018_v23, %v6022_v53  ;;  %2008 = vadd.xlane.f32.xlu1 %v2007_v8  ;;  %v7212_v39 = vld [vmem:[#allocation46_spill] sm:$0xff] }
 0x69a   : > { %7208 = vst [vmem:[#allocation61_spill] sm:$0xff] %v6307_v46  ;;  %v1922_v24 = vmul.f32 1.442695, %v1796_v20  ;;  %v1924_v36 = vmul.f32 1.442695, %v1797_v16  ;;  %v6312_v51 = vpop.eup %4337  ;;  %v3926_v42 = vpack.c.bf16 %v2097_v14, %v2095_v45  ;;  %v2666_v29 = vpop.xlane.xlu0 %2665  ;;  %v7215_v14 = vld [vmem:[#allocation94_spill] sm:$0xff] }
 0x69b   : > { %2719 = vmax.xlane.f32.xlu0 %v7209_v58  ;;  %7210 = vst [vmem:[#allocation64_spill] sm:$0xff] %v6312_v51  ;;  %v1955_v34 = vpop.xlane.xlu1 %1954  ;;  %v3928_v7 = vpack.c.bf16 %v2096_v6, %v2094_v56  ;;  %v4340_v62 = vpop.eup %4339  ;;  %v2760_v54 = vsub.f32 %v7211_v19, %v2666_v29  ;;  %v2761_v32 = vsub.f32 %v7212_v39, %v2666_v29  ;;  %v7220_v19 = vld [vmem:[#allocation48_spill] sm:$0xff] }
 0x69c   : > { %4353 = vpow2.f32 %v1922_v24  ;;  %v2010_v31 = vadd.f32 %v6312_v51, %v6307_v46  ;;  %3927 = vmatprep.subr.bf16.mxu0 %v3926_v42  ;;  %v7217_v56 = vmax.f32 %v7215_v14, %v7216_v26  ;;  %v7218_v24 = vld [vmem:[#allocation81_spill] sm:$0xff]  ;;  %v7223_v46 = vld [vmem:[#allocation83_spill] sm:$0xff] }
 0x69d   : > { %4355 = vpow2.f32 %v1924_v36  ;;  %v2824_v16 = vmul.f32 1.442695, %v2760_v54  ;;  %v2826_v8 = vmul.f32 1.442695, %v2761_v32  ;;  %3929 = vmatpush1.bf16.xpose.msra.mxu0 %v3928_v7  ;;  %v2099_v58 = vmul.f32 %v4340_v62, %v7218_v24  ;;  %v7219_v36 = vld [vmem:[#allocation47_spill] sm:$0xff]  ;;  %v7221_v54 = vld [vmem:[#allocation85_spill] sm:$0xff] }
 0x69e   : > { %v6318_v20 = vpop.eup %4341  ;;  %4357 = vrcp.f32 %v1955_v34  ;;  %2722 = vmax.xlane.f32.xlu1 %v7217_v56  ;;  %v1958_v35 = vpop.xlane.xlu0 %1957  ;;  %v7222_v32 = vld [vmem:[#allocation79_spill] sm:$0xff] }
 0x69f   : > { %7213 = vst [vmem:[#allocation69_spill] sm:$0xff] %v6318_v20  ;;  %2011 = vadd.xlane.f32.xlu0 %v2010_v31  ;;  %v6320_v45 = vpop.eup %4343  ;;  %v2669_v6 = vpop.xlane.xlu1 %2668  ;;  %4359 = vpow2.f32 %v2824_v16  ;;  %v2098_v31 = vmul.f32 %v4340_v62, %v7222_v32  ;;  %v7225_v16 = vmax.f32 %v6052_v9, %v6056_v61  ;;  %v7227_v62 = vld [vmem:[#allocation49_spill] sm:$0xff] }
 0x6a0   : > { %7214 = vst [vmem:[#allocation71_spill] sm:$0xff] %v6320_v45  ;;  %v4346_v29 = vpop.eup %4345  ;;  %v2762_v42 = vsub.f32 %v7219_v36, %v2669_v6  ;;  %v2763_v34 = vsub.f32 %v7220_v19, %v2669_v6  ;;  %v2013_v7 = vadd.f32 %v6320_v45, %v6318_v20  ;;  %4361 = vpow2.f32 %v2826_v8 }
 0x6a1   : > { %v2101_v39 = vmul.f32 %v4346_v29, %v7221_v54  ;;  %v2100_v56 = vmul.f32 %v4346_v29, %v7223_v46  ;;  %v6333_v51 = vpop.eup %4347  ;;  %4363 = vrcp.f32 %v1958_v35  ;;  %v7228_v29 = vld [vmem:[#allocation50_spill] sm:$0xff] }
 0x6a2   : > { %7224 = vst [vmem:[#allocation68_spill] sm:$0xff] %v6333_v51  ;;  %v2828_v24 = vmul.f32 1.442695, %v2762_v42  ;;  %v2830_v33 = vmul.f32 1.442695, %v2763_v34  ;;  %v6338_v6 = vpop.eup %4349  ;;  %2014 = vadd.xlane.f32.xlu1 %v2013_v7  ;;  %v2672_v19 = vpop.xlane.xlu0 %2671 }
 0x6a3   : > { %2725 = vmax.xlane.f32.xlu0 %v7225_v16  ;;  %7226 = vst [vmem:[#allocation70_spill] sm:$0xff] %v6338_v6  ;;  %v3930_v36 = vpack.c.bf16 %v2101_v39, %v2099_v58  ;;  %v1961_v8 = vpop.xlane.xlu1 %1960  ;;  %v3932_v54 = vpack.c.bf16 %v2100_v56, %v2098_v31  ;;  %v4352_v20 = vpop.eup %4351  ;;  %v2764_v46 = vsub.f32 %v7227_v62, %v2672_v19  ;;  %v7234_v62 = vld [vmem:[#allocation52_spill] sm:$0xff] }
 0x6a4   : > { %4365 = vpow2.f32 %v2828_v24  ;;  %v2765_v32 = vsub.f32 %v7228_v29, %v2672_v19  ;;  %v2016_v35 = vadd.f32 %v6338_v6, %v6333_v51  ;;  %v7231_v39 = vmax.f32 %v6069_v38, %v6073_v28  ;;  %v7232_v24 = vld [vmem:[#allocation88_spill] sm:$0xff]  ;;  %v7237_v51 = vld [vmem:[#allocation89_spill] sm:$0xff] }
 0x6a5   : > { %4367 = vpow2.f32 %v2830_v33  ;;  %3931 = vmatprep.subr.bf16.mxu0 %v3930_v36  ;;  %v2832_v34 = vmul.f32 1.442695, %v2764_v46  ;;  %v2103_v16 = vmul.f32 %v4352_v20, %v7232_v24  ;;  %v7233_v33 = vld [vmem:[#allocation51_spill] sm:$0xff]  ;;  %v7235_v46 = vld [vmem:[#allocation90_spill] sm:$0xff] }
 0x6a6   : > { %v6344_v42 = vpop.eup %4353  ;;  %4369 = vrcp.f32 %v1961_v8  ;;  %v2834_v7 = vmul.f32 1.442695, %v2765_v32  ;;  %3933 = vmatpush1.bf16.xpose.msra.mxu0 %v3932_v54  ;;  %2728 = vmax.xlane.f32.xlu1 %v7231_v39  ;;  %v1964_v31 = vpop.xlane.xlu0 %1963  ;;  %v7236_v32 = vld [vmem:[#allocation87_spill] sm:$0xff] }
 0x6a7   : > { %7229 = vst [vmem:[#allocation73_spill] sm:$0xff] %v6344_v42  ;;  %2017 = vadd.xlane.f32.xlu0 %v2016_v35  ;;  %v6346_v58 = vpop.eup %4355  ;;  %v2675_v56 = vpop.xlane.xlu1 %2674  ;;  %4371 = vpow2.f32 %v2832_v34  ;;  %v2102_v35 = vmul.f32 %v4352_v20, %v7236_v32  ;;  %v7239_v34 = vld [vmem:[#allocation97_spill] sm:$0xff] }
 0x6a8   : > { %7230 = vst [vmem:[#allocation77_spill] sm:$0xff] %v6346_v58  ;;  %v4358_v19 = vpop.eup %4357  ;;  %v2766_v36 = vsub.f32 %v7233_v33, %v2675_v56  ;;  %v2767_v8 = vsub.f32 %v7234_v62, %v2675_v56  ;;  %v2019_v54 = vadd.f32 %v6346_v58, %v6344_v42  ;;  %4373 = vpow2.f32 %v2834_v7  ;;  %v7242_v20 = vld [vmem:[#allocation53_spill] sm:$0xff] }
 0x6a9   : > { %v2105_v29 = vmul.f32 %v4358_v19, %v7235_v46  ;;  %v2104_v39 = vmul.f32 %v4358_v19, %v7237_v51  ;;  %v6359_v6 = vpop.eup %4359  ;;  %4375 = vrcp.f32 %v1964_v31  ;;  %v7240_v33 = vmax.f32 %v6086_v3, %v7239_v34  ;;  %v7243_v19 = vld [vmem:[#allocation54_spill] sm:$0xff] }
 0x6aa   : > { %7238 = vst [vmem:[#allocation72_spill] sm:$0xff] %v6359_v6  ;;  %v2836_v24 = vmul.f32 1.442695, %v2766_v36  ;;  %v2838_v45 = vmul.f32 1.442695, %v2767_v8  ;;  %v6364_v56 = vpop.eup %4361  ;;  %2020 = vadd.xlane.f32.xlu1 %v2019_v54  ;;  %v2678_v42 = vpop.xlane.xlu0 %2677 }
 0x6ab   : > { %2731 = vmax.xlane.f32.xlu0 %v7240_v33  ;;  %7241 = vst [vmem:[#allocation75_spill] sm:$0xff] %v6364_v56  ;;  %v3934_v62 = vpack.c.bf16 %v2105_v29, %v2103_v16  ;;  %v1967_v7 = vpop.xlane.xlu1 %1966  ;;  %v3936_v46 = vpack.c.bf16 %v2104_v39, %v2102_v35  ;;  %v4364_v58 = vpop.eup %4363  ;;  %v2768_v51 = vsub.f32 %v7242_v20, %v2678_v42  ;;  %v7246_v29 = vld [vmem:[#allocation99_spill] sm:$0xff] }
 0x6ac   : > { %4377 = vpow2.f32 %v2836_v24  ;;  %v2769_v32 = vsub.f32 %v7243_v19, %v2678_v42  ;;  %v2952_v31 = vadd.f32 %v6364_v56, %v6359_v6  ;;  %v7247_v35 = vmax.f32 %v6103_v18, %v7246_v29  ;;  %v7248_v24 = vld [vmem:[#allocation92_spill] sm:$0xff]  ;;  %v7253_v56 = vld [vmem:[#allocation93_spill] sm:$0xff] }
 0x6ad   : > { %4379 = vpow2.f32 %v2838_v45  ;;  %3935 = vmatprep.subr.bf16.mxu0 %v3934_v62  ;;  %v2840_v8 = vmul.f32 1.442695, %v2768_v51  ;;  %v2107_v33 = vmul.f32 %v4364_v58, %v7248_v24  ;;  %v7249_v45 = vld [vmem:[#allocation55_spill] sm:$0xff]  ;;  %v7250_v19 = vld [vmem:[#allocation56_spill] sm:$0xff] }
 0x6ae   : > { %v6370_v36 = vpop.eup %4365  ;;  %4381 = vrcp.f32 %v1967_v7  ;;  %v2842_v54 = vmul.f32 1.442695, %v2769_v32  ;;  %3937 = vmatpush1.bf16.xpose.msra.mxu0 %v3936_v46  ;;  %2734 = vmax.xlane.f32.xlu1 %v7247_v35  ;;  %v1970_v39 = vpop.xlane.xlu0 %1969  ;;  %v7251_v51 = vld [vmem:[#allocation95_spill] sm:$0xff] }
 0x6af   : > { %7244 = vst [vmem:[#allocation45_spill] sm:$0xff] %v6370_v36  ;;  %2953 = vadd.xlane.f32.xlu0 %v2952_v31  ;;  %v6372_v16 = vpop.eup %4367  ;;  %v2681_v42 = vpop.xlane.xlu1 %2680  ;;  %4383 = vpow2.f32 %v2840_v8  ;;  %v7252_v31 = vld [vmem:[#allocation91_spill] sm:$0xff]  ;;  %v7255_v8 = vmax.f32 %v6120_v49, %v6124_v59 }
 0x6b0   : > { %7245 = vst [vmem:[#allocation46_spill] sm:$0xff] %v6372_v16  ;;  %v4370_v20 = vpop.eup %4369  ;;  %v2770_v62 = vsub.f32 %v7249_v45, %v2681_v42  ;;  %v2771_v7 = vsub.f32 %v7250_v19, %v2681_v42  ;;  %v2955_v46 = vadd.f32 %v6372_v16, %v6370_v36  ;;  %4385 = vpow2.f32 %v2842_v54 }
 0x6b1   : > { %v2109_v32 = vmul.f32 %v4370_v20, %v7251_v51  ;;  %v2106_v6 = vmul.f32 %v4364_v58, %v7252_v31  ;;  %v2108_v35 = vmul.f32 %v4370_v20, %v7253_v56  ;;  %v6385_v29 = vpop.eup %4371  ;;  %4387 = vrcp.f32 %v1970_v39  ;;  %v7257_v58 = vld [vmem:[#allocation57_spill] sm:$0xff]  ;;  %v7258_v20 = vld [vmem:[#allocation58_spill] sm:$0xff] }
 0x6b2   : > { %7254 = vst [vmem:[#allocation94_spill] sm:$0xff] %v6385_v29  ;;  %v2844_v24 = vmul.f32 1.442695, %v2770_v62  ;;  %v2846_v18 = vmul.f32 1.442695, %v2771_v7  ;;  %v6390_v42 = vpop.eup %4373  ;;  %2956 = vadd.xlane.f32.xlu1 %v2955_v46  ;;  %v2684_v19 = vpop.xlane.xlu0 %2683 }
 0x6b3   : > { %2737 = vmax.xlane.f32.xlu0 %v7255_v8  ;;  %7256 = vst [vmem:[#allocation96_spill] sm:$0xff] %v6390_v42  ;;  %v3938_v45 = vpack.c.bf16 %v2109_v32, %v2107_v33  ;;  %v1973_v54 = vpop.xlane.xlu1 %1972  ;;  %v3940_v51 = vpack.c.bf16 %v2108_v35, %v2106_v6  ;;  %v4376_v36 = vpop.eup %4375  ;;  %v2772_v56 = vsub.f32 %v7257_v58, %v2684_v19  ;;  %v7264_v58 = vld [vmem:[#allocation60_spill] sm:$0xff] }
 0x6b4   : > { %4389 = vpow2.f32 %v2844_v24  ;;  %v2773_v31 = vsub.f32 %v7258_v20, %v2684_v19  ;;  %v2958_v39 = vadd.f32 %v6390_v42, %v6385_v29  ;;  %v7261_v6 = vmax.f32 %v6137_v52, %v6141_v41  ;;  %v7262_v24 = vld [vmem:[#allocation28_spill] sm:$0xff]  ;;  %v7267_v29 = vld [vmem:[#allocation29_spill] sm:$0xff] }
 0x6b5   : > { %4391 = vpow2.f32 %v2846_v18  ;;  %3939 = vmatprep.subr.bf16.mxu0 %v3938_v45  ;;  %v2848_v7 = vmul.f32 1.442695, %v2772_v56  ;;  %v2111_v8 = vmul.f32 %v4376_v36, %v7262_v24  ;;  %v7263_v18 = vld [vmem:[#allocation59_spill] sm:$0xff]  ;;  %v7265_v56 = vld [vmem:[#allocation30_spill] sm:$0xff] }
 0x6b6   : > { %v6396_v62 = vpop.eup %4377  ;;  %4393 = vrcp.f32 %v1973_v54  ;;  %v2850_v46 = vmul.f32 1.442695, %v2773_v31  ;;  %3941 = vmatpush1.bf16.xpose.msra.mxu0 %v3940_v51  ;;  %2740 = vmax.xlane.f32.xlu1 %v7261_v6  ;;  %v1976_v32 = vpop.xlane.xlu0 %1975  ;;  %v7266_v31 = vld [vmem:[#allocation27_spill] sm:$0xff] }
 0x6b7   : > { %7259 = vst [vmem:[#allocation81_spill] sm:$0xff] %v6396_v62  ;;  %2959 = vadd.xlane.f32.xlu0 %v2958_v39  ;;  %v6398_v33 = vpop.eup %4379  ;;  %v2687_v35 = vpop.xlane.xlu1 %2686  ;;  %4395 = vpow2.f32 %v2848_v7  ;;  %v2110_v39 = vmul.f32 %v4376_v36, %v7266_v31  ;;  %v7269_v7 = vmax.f32 %v6154_v48, %v6158_v0  ;;  %v7271_v36 = vld [vmem:[#allocation62_spill] sm:$0xff] }
 0x6b8   : > { %7260 = vst [vmem:[#allocation47_spill] sm:$0xff] %v6398_v33  ;;  %v4382_v19 = vpop.eup %4381  ;;  %v2774_v45 = vsub.f32 %v7263_v18, %v2687_v35  ;;  %v2775_v54 = vsub.f32 %v7264_v58, %v2687_v35  ;;  %v2961_v51 = vadd.f32 %v6398_v33, %v6396_v62  ;;  %4397 = vpow2.f32 %v2850_v46 }
 0x6b9   : > { %v2113_v20 = vmul.f32 %v4382_v19, %v7265_v56  ;;  %v2112_v6 = vmul.f32 %v4382_v19, %v7267_v29  ;;  %v6411_v42 = vpop.eup %4383  ;;  %4399 = vrcp.f32 %v1976_v32  ;;  %v7272_v19 = vld [vmem:[#allocation63_spill] sm:$0xff] }
 0x6ba   : > { %7268 = vst [vmem:[#allocation48_spill] sm:$0xff] %v6411_v42  ;;  %v2852_v24 = vmul.f32 1.442695, %v2774_v45  ;;  %v2854_v16 = vmul.f32 1.442695, %v2775_v54  ;;  %v6416_v35 = vpop.eup %4385  ;;  %2962 = vadd.xlane.f32.xlu1 %v2961_v51  ;;  %v2690_v58 = vpop.xlane.xlu0 %2689 }
 0x6bb   : > { %2743 = vmax.xlane.f32.xlu0 %v7269_v7  ;;  %7270 = vst [vmem:[#allocation85_spill] sm:$0xff] %v6416_v35  ;;  %v3942_v18 = vpack.c.bf16 %v2113_v20, %v2111_v8  ;;  %v1979_v46 = vpop.xlane.xlu1 %1978  ;;  %v3944_v56 = vpack.c.bf16 %v2112_v6, %v2110_v39  ;;  %v4388_v62 = vpop.eup %4387  ;;  %v2776_v29 = vsub.f32 %v7271_v36, %v2690_v58  ;;  %v7277_v36 = vld [vmem:[#allocation67_spill] sm:$0xff] }
 0x6bc   : > { %4401 = vpow2.f32 %v2852_v24  ;;  %v2777_v31 = vsub.f32 %v7272_v19, %v2690_v58  ;;  %v2964_v32 = vadd.f32 %v6416_v35, %v6411_v42  ;;  %v7274_v20 = vmax.f32 %v6171_v25, %v6175_v60  ;;  %v7275_v24 = vld [vmem:[#allocation32_spill] sm:$0xff]  ;;  %v7280_v42 = vld [vmem:[#allocation33_spill] sm:$0xff] }
 0x6bd   : > { %4403 = vpow2.f32 %v2854_v16  ;;  %3943 = vmatprep.subr.bf16.mxu0 %v3942_v18  ;;  %v2856_v54 = vmul.f32 1.442695, %v2776_v29  ;;  %v2115_v7 = vmul.f32 %v4388_v62, %v7275_v24  ;;  %v7276_v16 = vld [vmem:[#allocation65_spill] sm:$0xff]  ;;  %v7278_v29 = vld [vmem:[#allocation98_spill] sm:$0xff] }
 0x6be   : > { %v6422_v45 = vpop.eup %4389  ;;  %4405 = vrcp.f32 %v1979_v46  ;;  %v2858_v51 = vmul.f32 1.442695, %v2777_v31  ;;  %3945 = vmatpush1.bf16.xpose.msra.mxu0 %v3944_v56  ;;  %2746 = vmax.xlane.f32.xlu1 %v7274_v20  ;;  %v1982_v39 = vpop.xlane.xlu0 %1981  ;;  %v7279_v31 = vld [vmem:[#allocation31_spill] sm:$0xff] }
 0x6bf   : > { %7273 = vst [vmem:[#allocation79_spill] sm:$0xff] %v6422_v45  ;;  %2965 = vadd.xlane.f32.xlu0 %v2964_v32  ;;  %v6424_v8 = vpop.eup %4391  ;;  %v2693_v6 = vpop.xlane.xlu1 %2692  ;;  %4407 = vpow2.f32 %v2856_v54  ;;  %v2114_v32 = vmul.f32 %v4388_v62, %v7279_v31  ;;  %v7282_v54 = vmax.f32 %v6188_v37, %v6192_v57 }
 0x6c0   : > { %v4394_v58 = vpop.eup %4393  ;;  %v2778_v18 = vsub.f32 %v7276_v16, %v2693_v6  ;;  %v2779_v46 = vsub.f32 %v7277_v36, %v2693_v6  ;;  %v2967_v56 = vadd.f32 %v6424_v8, %v6422_v45  ;;  %4409 = vpow2.f32 %v2858_v51 }
 0x6c1   : > { %v2117_v19 = vmul.f32 %v4394_v58, %v7278_v29  ;;  %v2116_v20 = vmul.f32 %v4394_v58, %v7280_v42  ;;  %v6437_v35 = vpop.eup %4395  ;;  %4411 = vrcp.f32 %v1982_v39 }
 0x6c2   : > { %7281 = vst [vmem:[#allocation83_spill] sm:$0xff] %v6437_v35  ;;  %v2860_v24 = vmul.f32 1.442695, %v2778_v18  ;;  %v2862_v33 = vmul.f32 1.442695, %v2779_v46  ;;  %v6442_v6 = vpop.eup %4397  ;;  %2968 = vadd.xlane.f32.xlu1 %v2967_v56  ;;  %v2696_v36 = vpop.xlane.xlu0 %2695  ;;  %v7284_v56 = vmax.f32 %v6203_v63, %v6207_v11 }
 0x6c3   : > { %2749 = vmax.xlane.f32.xlu0 %v7282_v54  ;;  %v3946_v16 = vpack.c.bf16 %v2117_v19, %v2115_v7  ;;  %v1985_v51 = vpop.xlane.xlu1 %1984  ;;  %v3948_v29 = vpack.c.bf16 %v2116_v20, %v2114_v32  ;;  %v4400_v45 = vpop.eup %4399  ;;  %v2780_v42 = vsub.f32 %v5882_v5, %v2696_v36  ;;  %v2781_v62 = vsub.f32 %v5886_v15, %v2696_v36  ;;  %v7285_v19 = vld [vmem:[#allocation36_spill] sm:$0xff]  ;;  %v7286_v54 = vld [vmem:[#allocation38_spill] sm:$0xff] }
 0x6c4   : > { %4413 = vpow2.f32 %v2860_v24  ;;  %v2970_v39 = vadd.f32 %v6442_v6, %v6437_v35  ;;  %v2119_v31 = vmul.f32 %v4400_v45, %v7285_v19 }
 0x6c5   : > { %4415 = vpow2.f32 %v2862_v33  ;;  %3947 = vmatprep.subr.bf16.mxu0 %v3946_v16  ;;  %v2864_v18 = vmul.f32 1.442695, %v2780_v42  ;;  %v2866_v46 = vmul.f32 1.442695, %v2781_v62 }
 0x6c6   : > { %v6448_v58 = vpop.eup %4401  ;;  %4417 = vrcp.f32 %v1985_v51  ;;  %3949 = vmatpush1.bf16.xpose.msra.mxu0 %v3948_v29  ;;  %2752 = vmax.xlane.f32.xlu1 %v7284_v56  ;;  %v1988_v5 = vpop.xlane.xlu0 %1987  ;;  %v7287_v51 = vld [vmem:[#allocation35_spill] sm:$0xff]  ;;  %v7288_v29 = vld [vmem:[#allocation37_spill] sm:$0xff] }
 0x6c7   : > { %7283 = vst [vmem:[#allocation49_spill] sm:$0xff] %v6448_v58  ;;  %2971 = vadd.xlane.f32.xlu0 %v2970_v39  ;;  %v6450_v7 = vpop.eup %4403  ;;  %v2699_v15 = vpop.xlane.xlu1 %2698  ;;  %4419 = vpow2.f32 %v2864_v18  ;;  %v2118_v36 = vmul.f32 %v4400_v45, %v7287_v51 }
 0x6c8   : > { %v4406_v32 = vpop.eup %4405  ;;  %v2782_v33 = vsub.f32 %v5899_v10, %v2699_v15  ;;  %v2783_v20 = vsub.f32 %v5903_v43, %v2699_v15  ;;  %v2973_v24 = vadd.f32 %v6450_v7, %v6448_v58  ;;  %4421 = vpow2.f32 %v2866_v46 }
 0x6c9   : > { %v2121_v16 = vmul.f32 %v4406_v32, %v7286_v54  ;;  %v2120_v42 = vmul.f32 %v4406_v32, %v7288_v29  ;;  %v6463_v62 = vpop.eup %4407  ;;  %4423 = vrcp.f32 %v1988_v5  ;;  %v7290_v10 = vmax.f32 %v6218_v30, %v6222_v22  ;;  %v7292_v32 = vld [vmem:[#allocation74_spill] sm:$0xff] }
 0x6ca   : > { %7289 = vst [vmem:[#allocation50_spill] sm:$0xff] %v6463_v62  ;;  %v2868_v39 = vmul.f32 1.442695, %v2782_v33  ;;  %v2870_v56 = vmul.f32 1.442695, %v2783_v20  ;;  %v6468_v43 = vpop.eup %4409  ;;  %2974 = vadd.xlane.f32.xlu1 %v2973_v24  ;;  %v2702_v15 = vpop.xlane.xlu0 %2701 }
 0x6cb   : > { %2755 = vmax.xlane.f32.xlu0 %v7290_v10  ;;  %7291 = vst [vmem:[#allocation88_spill] sm:$0xff] %v6468_v43  ;;  %v3950_v18 = vpack.c.bf16 %v2121_v16, %v2119_v31  ;;  %v1991_v46 = vpop.xlane.xlu1 %1990  ;;  %v3952_v19 = vpack.c.bf16 %v2120_v42, %v2118_v36  ;;  %v4412_v54 = vpop.eup %4411  ;;  %v2784_v45 = vsub.f32 %v5916_v13, %v2702_v15  ;;  %v7295_v16 = vld [vmem:[#allocation106_spill] sm:$0xff]  ;;  %v7297_v42 = vld [vmem:[#allocation40_spill] sm:$0xff] }
 0x6cc   : > { %4425 = vpow2.f32 %v2868_v39  ;;  %v2785_v51 = vsub.f32 %v7292_v32, %v2702_v15  ;;  %v2976_v5 = vadd.f32 %v6468_v43, %v6463_v62  ;;  %v7296_v36 = vmax.f32 %v6233_v4, %v7295_v16  ;;  %v7299_v15 = vld [vmem:[#allocation78_spill] sm:$0xff]  ;;  %v7302_v62 = vld [vmem:[#allocation41_spill] sm:$0xff] }
 0x6cd   : > { %4427 = vpow2.f32 %v2870_v56  ;;  %3951 = vmatprep.subr.bf16.mxu0 %v3950_v18  ;;  %v2872_v20 = vmul.f32 1.442695, %v2784_v45  ;;  %v2123_v39 = vmul.f32 %v4412_v54, %v7297_v42  ;;  %v7298_v56 = vld [vmem:[#allocation76_spill] sm:$0xff]  ;;  %v7300_v45 = vld [vmem:[#allocation42_spill] sm:$0xff] }
 0x6ce   : > { %v6474_v33 = vpop.eup %4413  ;;  %4429 = vrcp.f32 %v1991_v46  ;;  %v2874_v24 = vmul.f32 1.442695, %v2785_v51  ;;  %3953 = vmatpush1.bf16.xpose.msra.mxu0 %v3952_v19  ;;  %2758 = vmax.xlane.f32.xlu1 %v7296_v36  ;;  %v1994_v13 = vpop.xlane.xlu0 %1993  ;;  %v7301_v51 = vld [vmem:[#allocation39_spill] sm:$0xff] }
 0x6cf   : > { %7293 = vst [vmem:[#allocation51_spill] sm:$0xff] %v6474_v33  ;;  %2977 = vadd.xlane.f32.xlu0 %v2976_v5  ;;  %v6476_v31 = vpop.eup %4415  ;;  %v2705_v29 = vpop.xlane.xlu1 %2704  ;;  %4431 = vpow2.f32 %v2872_v20  ;;  %v2122_v5 = vmul.f32 %v4412_v54, %v7301_v51 }
 0x6d0   : > { %7294 = vst [vmem:[#allocation52_spill] sm:$0xff] %v6476_v31  ;;  %v4418_v10 = vpop.eup %4417  ;;  %v2786_v18 = vsub.f32 %v7298_v56, %v2705_v29  ;;  %v2787_v46 = vsub.f32 %v7299_v15, %v2705_v29  ;;  %v2979_v19 = vadd.f32 %v6476_v31, %v6474_v33  ;;  %4433 = vpow2.f32 %v2874_v24  ;;  %v7304_v24 = vld [vmem:[#allocation80_spill] sm:$0xff]  ;;  %v7305_v31 = vld [vmem:[#allocation82_spill] sm:$0xff] }
 0x6d1   : > { %v2125_v32 = vmul.f32 %v4418_v10, %v7300_v45  ;;  %v2124_v36 = vmul.f32 %v4418_v10, %v7302_v62  ;;  %v6489_v43 = vpop.eup %4419  ;;  %4435 = vrcp.f32 %v1994_v13 }
 0x6d2   : > { %7303 = vst [vmem:[#allocation90_spill] sm:$0xff] %v6489_v43  ;;  %v2876_v58 = vmul.f32 1.442695, %v2786_v18  ;;  %v2878_v42 = vmul.f32 1.442695, %v2787_v46  ;;  %v6491_v35 = vpop.eup %4421  ;;  %2980 = vadd.xlane.f32.xlu1 %v2979_v19  ;;  %v2708_v56 = vpop.xlane.xlu0 %2707 }
 0x6d3   : > { %v3954_v20 = vpack.c.bf16 %v2125_v32, %v2123_v39  ;;  %v1997_v29 = vpop.xlane.xlu1 %1996  ;;  %v3956_v15 = vpack.c.bf16 %v2124_v36, %v2122_v5  ;;  %v4424_v33 = vpop.eup %4423  ;;  %v2788_v45 = vsub.f32 %v7304_v24, %v2708_v56  ;;  %v2789_v54 = vsub.f32 %v7305_v31, %v2708_v56  ;;  %v7307_v31 = vld [vmem:[#allocation84_spill] sm:$0xff]  ;;  %v7308_v5 = vld [vmem:[#allocation86_spill] sm:$0xff]  ;;  %v7310_v56 = vld [vmem:[#allocation43_spill] sm:$0xff] }
 0x6d4   : > { %4437 = vpow2.f32 %v2876_v58  ;;  %v2982_v62 = vadd.f32 %v6491_v35, %v6489_v43  ;;  %v7306_v58 = vld [vmem:[#allocation44_spill] sm:$0xff] }
 0x6d5   : > { %4439 = vpow2.f32 %v2878_v42  ;;  %3955 = vmatprep.subr.bf16.mxu0 %v3954_v20  ;;  %v2880_v13 = vmul.f32 1.442695, %v2788_v45  ;;  %v2882_v18 = vmul.f32 1.442695, %v2789_v54  ;;  %v2127_v19 = vmul.f32 %v4424_v33, %v7306_v58  ;;  %v7309_v20 = vld [vmem:[#allocation101_spill] sm:$0xff]  ;;  %v7311_v24 = vld [vmem:[#allocation100_spill] sm:$0xff] }
 0x6d6   : > { %v6497_v10 = vpop.eup %4425  ;;  %4441 = vrcp.f32 %v1997_v29  ;;  %3957 = vmatpush1.bf16.xpose.msra.mxu0 %v3956_v15  ;;  %2983 = vadd.xlane.f32.xlu0 %v2982_v62  ;;  %v2126_v15 = vmul.f32 %v4424_v33, %v7310_v56 }
 0x6d7   : > { %v6499_v39 = vpop.eup %4427  ;;  %v2711_v46 = vpop.xlane.xlu1 %2710  ;;  %4443 = vpow2.f32 %v2880_v13 }
 0x6d8   : > { %v4430_v32 = vpop.eup %4429  ;;  %v2790_v51 = vsub.f32 %v7307_v31, %v2711_v46  ;;  %v2791_v36 = vsub.f32 %v7308_v5, %v2711_v46  ;;  %v2985_v42 = vadd.f32 %v6499_v39, %v6497_v10  ;;  %4445 = vpow2.f32 %v2882_v18 }
 0x6d9   : > { %v2129_v29 = vmul.f32 %v4430_v32, %v7309_v20  ;;  %v2128_v45 = vmul.f32 %v4430_v32, %v7311_v24  ;;  %v6509_v54 = vpop.eup %4431 }
 0x6da   : > { %v2884_v62 = vmul.f32 1.442695, %v2790_v51  ;;  %v2886_v58 = vmul.f32 1.442695, %v2791_v36  ;;  %2986 = vadd.xlane.f32.xlu1 %v2985_v42  ;;  %v6511_v13 = vpop.eup %4433  ;;  %v7312_v36 = vld [vmem:[#allocation103_spill] sm:$0xff]  ;;  %v7313_v42 = vld [vmem:[#allocation105_spill] sm:$0xff] }
 0x6db   : > { %v3958_v31 = vpack.c.bf16 %v2129_v29, %v2127_v19  ;;  %v3960_v43 = vpack.c.bf16 %v2128_v45, %v2126_v15  ;;  %v2988_v46 = vadd.f32 %v6511_v13, %v6509_v54  ;;  %v4436_v18 = vpop.eup %4435  ;;  %v7314_v29 = vld [vmem:[#allocation102_spill] sm:$0xff]  ;;  %v7315_v15 = vld [vmem:[#allocation104_spill] sm:$0xff] }
 0x6dc   : > { %4447 = vpow2.f32 %v2884_v62  ;;  %v2131_v19 = vmul.f32 %v4436_v18, %v7312_v36  ;;  %v2130_v56 = vmul.f32 %v4436_v18, %v7314_v29 }
 0x6dd   : > { %4449 = vpow2.f32 %v2886_v58  ;;  %3959 = vmatprep.subr.bf16.mxu0 %v3958_v31  ;;  %2989 = vadd.xlane.f32.xlu0 %v2988_v46 }
 0x6de   : > { %v6515_v5 = vpop.eup %4437  ;;  %3961 = vmatpush1.bf16.xpose.msra.mxu0 %v3960_v43 }
 0x6df   : > { %v6517_v33 = vpop.eup %4439 }
 0x6e0   : > { %v4442_v32 = vpop.eup %4441  ;;  %v2991_v51 = vadd.f32 %v6517_v33, %v6515_v5 }
 0x6e1   : > { %v2133_v20 = vmul.f32 %v4442_v32, %v7313_v42  ;;  %v2132_v24 = vmul.f32 %v4442_v32, %v7315_v15  ;;  %v6525_v45 = vpop.eup %4443 }
 0x6e2   : > { %7316 = vst [vmem:[#allocation87_spill] sm:$0xff] %v6525_v45  ;;  %2992 = vadd.xlane.f32.xlu1 %v2991_v51  ;;  %v6527_v62 = vpop.eup %4445 }
 0x6e3   : > { %v3962_v43 = vpack.c.bf16 %v2133_v20, %v2131_v19  ;;  %v3964_v58 = vpack.c.bf16 %v2132_v24, %v2130_v56  ;;  %v2994_v31 = vadd.f32 %v6527_v62, %v6525_v45 }
 0x6e5   : > { %3963 = vmatprep.subr.bf16.mxu0 %v3962_v43  ;;  %2995 = vadd.xlane.f32.xlu0 %v2994_v31 }
 0x6e6   : > { %v6531_v46 = vpop.eup %4447  ;;  %3965 = vmatpush1.bf16.xpose.msra.mxu0 %v3964_v58 }
 0x6e7   : > { %v6533_v36 = vpop.eup %4449 }
 0x6e8   : > { %v2997_v18 = vadd.f32 %v6533_v36, %v6531_v46 }
 0x6ea   : > { %2998 = vadd.xlane.f32.xlu1 %v2997_v18 }
 0x71a   : > { %v2000_v32 = vpop.xlane.xlu0 %1999 }
 0x71b   : > { %4451 = vrcp.f32 %v2000_v32 }
 0x71e   : > { %v2003_v51 = vpop.xlane.xlu1 %2002 }
 0x71f   : > { %4453 = vrcp.f32 %v2003_v51 }
 0x720   : > { %v2714_v42 = vpop.xlane.xlu0 %2713 }
 0x721   : > { %v2792_v19 = vsub.f32 %v5984_v2, %v2714_v42  ;;  %v2793_v20 = vsub.f32 %v5988_v47, %v2714_v42 }
 0x722   : > { %v2717_v24 = vpop.xlane.xlu1 %2716 }
 0x723   : > { %v2888_v29 = vmul.f32 1.442695, %v2792_v19  ;;  %v2890_v56 = vmul.f32 1.442695, %v2793_v20  ;;  %v2794_v43 = vsub.f32 %v6001_v21, %v2717_v24  ;;  %v2795_v58 = vsub.f32 %v6005_v50, %v2717_v24 }
 0x724   : > { %v2006_v15 = vpop.xlane.xlu0 %2005 }
 0x725   : > { %4455 = vpow2.f32 %v2888_v29  ;;  %v2892_v31 = vmul.f32 1.442695, %v2794_v43  ;;  %v2894_v18 = vmul.f32 1.442695, %v2795_v58  ;;  %v4452_v45 = vpop.eup %4451 }
 0x726   : > { %4457 = vpow2.f32 %v2890_v56  ;;  %v2009_v51 = vpop.xlane.xlu1 %2008  ;;  %v2135_v21 = vmul.f32 %v4452_v45, %v6263_v12  ;;  %v2134_v24 = vmul.f32 %v4452_v45, %v6261_v55 }
 0x727   : > { %4459 = vrcp.f32 %v2006_v15 }
 0x728   : > { %v2720_v32 = vpop.xlane.xlu0 %2719  ;;  %4461 = vpow2.f32 %v2892_v31 }
 0x729   : > { %v2796_v2 = vsub.f32 %v6018_v23, %v2720_v32  ;;  %v2797_v47 = vsub.f32 %v6022_v53, %v2720_v32  ;;  %v4454_v42 = vpop.eup %4453  ;;  %4463 = vpow2.f32 %v2894_v18 }
 0x72a   : > { %4465 = vrcp.f32 %v2009_v51  ;;  %v2137_v50 = vmul.f32 %v4454_v42, %v6271_v44  ;;  %v2136_v56 = vmul.f32 %v4454_v42, %v6269_v40 }
 0x72b   : > { %v2896_v19 = vmul.f32 1.442695, %v2796_v2  ;;  %v2898_v20 = vmul.f32 1.442695, %v2797_v47  ;;  %v2723_v15 = vpop.xlane.xlu1 %2722 }
 0x72c   : > { %v2012_v29 = vpop.xlane.xlu0 %2011  ;;  %v2798_v23 = vsub.f32 %v7215_v14, %v2723_v15  ;;  %v2799_v53 = vsub.f32 %v7216_v26, %v2723_v15  ;;  %v3966_v43 = vpack.c.bf16 %v2137_v50, %v2135_v21  ;;  %v3968_v31 = vpack.c.bf16 %v2136_v56, %v2134_v24 }
 0x72d   : > { %4467 = vpow2.f32 %v2896_v19 }
 0x72e   : > { %4469 = vpow2.f32 %v2898_v20  ;;  %v2900_v12 = vmul.f32 1.442695, %v2798_v23  ;;  %v2902_v32 = vmul.f32 1.442695, %v2799_v53  ;;  %3967 = vmatprep.subr.bf16.mxu0 %v3966_v43  ;;  %v7317_v23 = vld [vmem:[#allocation66_spill] sm:$0xff] }
 0x72f   : > { %v6549_v58 = vpop.eup %4455  ;;  %4471 = vrcp.f32 %v2012_v29  ;;  %v2015_v40 = vpop.xlane.xlu1 %2014  ;;  %3969 = vmatpush1.bf16.xpose.msra.mxu0 %v3968_v31 }
 0x730   : > { %v6551_v18 = vpop.eup %4457  ;;  %v2726_v44 = vpop.xlane.xlu0 %2725  ;;  %4473 = vpow2.f32 %v2900_v12 }
 0x731   : > { %v2800_v51 = vsub.f32 %v6052_v9, %v2726_v44  ;;  %v2801_v55 = vsub.f32 %v6056_v61, %v2726_v44  ;;  %v3000_v14 = vadd.f32 %v6551_v18, %v6549_v58  ;;  %v4460_v26 = vpop.eup %4459  ;;  %4475 = vpow2.f32 %v2902_v32 }
 0x732   : > { %v6557_v47 = vpop.eup %4461  ;;  %4477 = vrcp.f32 %v2015_v40  ;;  %v2139_v56 = vmul.f32 %v4460_v26, %v6286_v27  ;;  %v2138_v24 = vmul.f32 %v4460_v26, %v6281_v17 }
 0x733   : > { %v2904_v45 = vmul.f32 1.442695, %v2800_v51  ;;  %v2906_v2 = vmul.f32 1.442695, %v2801_v55  ;;  %3001 = vadd.xlane.f32.xlu0 %v3000_v14  ;;  %v6559_v19 = vpop.eup %4463  ;;  %v2729_v9 = vpop.xlane.xlu1 %2728 }
 0x734   : > { %v2018_v42 = vpop.xlane.xlu0 %2017  ;;  %v4466_v20 = vpop.eup %4465  ;;  %v2802_v61 = vsub.f32 %v6069_v38, %v2729_v9  ;;  %v2803_v29 = vsub.f32 %v6073_v28, %v2729_v9  ;;  %v3003_v21 = vadd.f32 %v6559_v19, %v6557_v47  ;;  %v7319_v9 = vld [vmem:[#allocation99_spill] sm:$0xff] }
 0x735   : > { %4479 = vpow2.f32 %v2904_v45  ;;  %v2141_v15 = vmul.f32 %v4466_v20, %v6294_v1  ;;  %v2140_v53 = vmul.f32 %v4466_v20, %v7317_v23  ;;  %v7322_v23 = vld [vmem:[#allocation61_spill] sm:$0xff] }
 0x736   : > { %4481 = vpow2.f32 %v2906_v2  ;;  %v2908_v31 = vmul.f32 1.442695, %v2802_v61  ;;  %v2910_v38 = vmul.f32 1.442695, %v2803_v29  ;;  %3004 = vadd.xlane.f32.xlu1 %v3003_v21  ;;  %v7318_v2 = vld [vmem:[#allocation34_spill] sm:$0xff]  ;;  %v7320_v21 = vld [vmem:[#allocation64_spill] sm:$0xff] }
 0x737   : > { %v6565_v50 = vpop.eup %4467  ;;  %4483 = vrcp.f32 %v2018_v42  ;;  %v3970_v12 = vpack.c.bf16 %v2141_v15, %v2139_v56  ;;  %v2021_v32 = vpop.xlane.xlu1 %2020  ;;  %v3972_v27 = vpack.c.bf16 %v2140_v53, %v2138_v24  ;;  %v7321_v15 = vld [vmem:[#allocation71_spill] sm:$0xff] }
 0x738   : > { %v6571_v43 = vpop.eup %4469  ;;  %v2732_v28 = vpop.xlane.xlu0 %2731  ;;  %4485 = vpow2.f32 %v2908_v31  ;;  %v7323_v31 = vld [vmem:[#allocation69_spill] sm:$0xff] }
 0x739   : > { %v2804_v44 = vsub.f32 %v6086_v3, %v2732_v28  ;;  %v2805_v40 = vsub.f32 %v7239_v34, %v2732_v28  ;;  %v3006_v17 = vadd.f32 %v6571_v43, %v6565_v50  ;;  %v4472_v1 = vpop.eup %4471  ;;  %4487 = vpow2.f32 %v2910_v38  ;;  %3971 = vmatprep.subr.bf16.mxu0 %v3970_v12 }
 0x73a   : > { %v6577_v14 = vpop.eup %4473  ;;  %4489 = vrcp.f32 %v2021_v32  ;;  %3973 = vmatpush1.bf16.xpose.msra.mxu0 %v3972_v27  ;;  %v2143_v56 = vmul.f32 %v4472_v1, %v7320_v21  ;;  %v2142_v53 = vmul.f32 %v4472_v1, %v7322_v23  ;;  %v7325_v23 = vld [vmem:[#allocation77_spill] sm:$0xff] }
 0x73b   : > { %v2912_v51 = vmul.f32 1.442695, %v2804_v44  ;;  %v2914_v55 = vmul.f32 1.442695, %v2805_v40  ;;  %3007 = vadd.xlane.f32.xlu0 %v3006_v17  ;;  %v6579_v45 = vpop.eup %4475  ;;  %v2735_v3 = vpop.xlane.xlu1 %2734 }
 0x73c   : > { %v2954_v26 = vpop.xlane.xlu0 %2953  ;;  %v4478_v34 = vpop.eup %4477  ;;  %v2806_v42 = vsub.f32 %v7318_v2, %v2735_v3  ;;  %v2807_v20 = vsub.f32 %v7319_v9, %v2735_v3  ;;  %v3009_v61 = vadd.f32 %v6579_v45, %v6577_v14 }
 0x73d   : > { %4491 = vpow2.f32 %v2912_v51  ;;  %v2145_v24 = vmul.f32 %v4478_v34, %v7321_v15  ;;  %v2144_v38 = vmul.f32 %v4478_v34, %v7323_v31  ;;  %v7324_v15 = vld [vmem:[#allocation70_spill] sm:$0xff]  ;;  %v7326_v31 = vld [vmem:[#allocation68_spill] sm:$0xff] }
 0x73e   : > { %4493 = vpow2.f32 %v2914_v55  ;;  %v2916_v12 = vmul.f32 1.442695, %v2806_v42  ;;  %v2918_v32 = vmul.f32 1.442695, %v2807_v20  ;;  %3010 = vadd.xlane.f32.xlu1 %v3009_v61 }
 0x73f   : > { %v6585_v29 = vpop.eup %4479  ;;  %4495 = vrcp.f32 %v2954_v26  ;;  %v3974_v40 = vpack.c.bf16 %v2145_v24, %v2143_v56  ;;  %v2957_v27 = vpop.xlane.xlu1 %2956  ;;  %v3976_v55 = vpack.c.bf16 %v2144_v38, %v2142_v53 }
 0x740   : > { %v6591_v28 = vpop.eup %4481  ;;  %v2738_v44 = vpop.xlane.xlu0 %2737  ;;  %4497 = vpow2.f32 %v2916_v12  ;;  %v7327_v12 = vld [vmem:[#allocation73_spill] sm:$0xff] }
 0x741   : > { %v2808_v17 = vsub.f32 %v6120_v49, %v2738_v44  ;;  %v2809_v51 = vsub.f32 %v6124_v59, %v2738_v44  ;;  %v4484_v3 = vpop.eup %4483  ;;  %v3012_v1 = vadd.f32 %v6591_v28, %v6585_v29  ;;  %4499 = vpow2.f32 %v2918_v32  ;;  %3975 = vmatprep.subr.bf16.mxu0 %v3974_v40 }
 0x742   : > { %v6597_v2 = vpop.eup %4485  ;;  %4501 = vrcp.f32 %v2957_v27  ;;  %3977 = vmatpush1.bf16.xpose.msra.mxu0 %v3976_v55  ;;  %v2147_v24 = vmul.f32 %v4484_v3, %v7324_v15  ;;  %v2146_v38 = vmul.f32 %v4484_v3, %v7326_v31  ;;  %v7329_v31 = vld [vmem:[#allocation46_spill] sm:$0xff] }
 0x743   : > { %v2920_v34 = vmul.f32 1.442695, %v2808_v17  ;;  %v2922_v26 = vmul.f32 1.442695, %v2809_v51  ;;  %3013 = vadd.xlane.f32.xlu0 %v3012_v1  ;;  %v6599_v9 = vpop.eup %4487  ;;  %v2741_v49 = vpop.xlane.xlu1 %2740 }
 0x744   : > { %v2960_v42 = vpop.xlane.xlu0 %2959  ;;  %v4490_v59 = vpop.eup %4489  ;;  %v2810_v20 = vsub.f32 %v6137_v52, %v2741_v49  ;;  %v2811_v61 = vsub.f32 %v6141_v41, %v2741_v49  ;;  %v3015_v21 = vadd.f32 %v6599_v9, %v6597_v2 }
 0x745   : > { %4503 = vpow2.f32 %v2920_v34  ;;  %v2149_v53 = vmul.f32 %v4490_v59, %v7325_v23  ;;  %v2148_v32 = vmul.f32 %v4490_v59, %v7327_v12  ;;  %v7328_v23 = vld [vmem:[#allocation75_spill] sm:$0xff]  ;;  %v7330_v12 = vld [vmem:[#allocation72_spill] sm:$0xff] }
 0x746   : > { %4505 = vpow2.f32 %v2922_v26  ;;  %v2924_v40 = vmul.f32 1.442695, %v2810_v20  ;;  %v2926_v52 = vmul.f32 1.442695, %v2811_v61  ;;  %3016 = vadd.xlane.f32.xlu1 %v3015_v21 }
 0x747   : > { %v6605_v56 = vpop.eup %4491  ;;  %4507 = vrcp.f32 %v2960_v42  ;;  %v3978_v27 = vpack.c.bf16 %v2149_v53, %v2147_v24  ;;  %v2963_v17 = vpop.xlane.xlu1 %2962  ;;  %v3980_v1 = vpack.c.bf16 %v2148_v32, %v2146_v38 }
 0x748   : > { %v6611_v44 = vpop.eup %4493  ;;  %v2744_v41 = vpop.xlane.xlu0 %2743  ;;  %4509 = vpow2.f32 %v2924_v40  ;;  %v7331_v40 = vld [vmem:[#allocation45_spill] sm:$0xff] }
 0x749   : > { %v2812_v51 = vsub.f32 %v6154_v48, %v2744_v41  ;;  %v2813_v55 = vsub.f32 %v6158_v0, %v2744_v41  ;;  %v4496_v34 = vpop.eup %4495  ;;  %v3018_v3 = vadd.f32 %v6611_v44, %v6605_v56  ;;  %4511 = vpow2.f32 %v2926_v52  ;;  %3979 = vmatprep.subr.bf16.mxu0 %v3978_v27 }
 0x74a   : > { %v6617_v49 = vpop.eup %4497  ;;  %4513 = vrcp.f32 %v2963_v17  ;;  %3981 = vmatpush1.bf16.xpose.msra.mxu0 %v3980_v1  ;;  %v3113_v53 = vmul.f32 %v4496_v34, %v7328_v23  ;;  %v3112_v32 = vmul.f32 %v4496_v34, %v7330_v12  ;;  %v7334_v12 = vld [vmem:[#allocation21_spill] sm:$0xff] }
 0x74b   : > { %v2928_v26 = vmul.f32 1.442695, %v2812_v51  ;;  %v2930_v42 = vmul.f32 1.442695, %v2813_v55  ;;  %3019 = vadd.xlane.f32.xlu0 %v3018_v3  ;;  %v6619_v20 = vpop.eup %4499  ;;  %v2747_v48 = vpop.xlane.xlu1 %2746 }
 0x74c   : > { %v2966_v59 = vpop.xlane.xlu0 %2965  ;;  %v4502_v0 = vpop.eup %4501  ;;  %v2814_v61 = vsub.f32 %v6171_v25, %v2747_v48  ;;  %v2815_v21 = vsub.f32 %v6175_v60, %v2747_v48  ;;  %v3021_v15 = vadd.f32 %v6619_v20, %v6617_v49 }
 0x74d   : > { %4515 = vpow2.f32 %v2928_v26  ;;  %v3115_v38 = vmul.f32 %v4502_v0, %v7329_v31  ;;  %v3114_v52 = vmul.f32 %v4502_v0, %v7331_v40 }
 0x74e   : > { %4517 = vpow2.f32 %v2930_v42  ;;  %v2932_v27 = vmul.f32 1.442695, %v2814_v61  ;;  %v2934_v25 = vmul.f32 1.442695, %v2815_v21  ;;  %3022 = vadd.xlane.f32.xlu1 %v3021_v15  ;;  %v7332_v42 = vld [vmem:[#allocation20_spill] sm:$0xff]  ;;  %v7333_v61 = vld [vmem:[#allocation22_spill] sm:$0xff] }
 0x74f   : > { %v6625_v24 = vpop.eup %4503  ;;  %4519 = vrcp.f32 %v2966_v59  ;;  %v3990_v17 = vpack.c.bf16 %v3115_v38, %v3113_v53  ;;  %v2969_v51 = vpop.xlane.xlu1 %2968  ;;  %v3992_v3 = vpack.c.bf16 %v3114_v52, %v3112_v32  ;;  %v7335_v32 = vld [vmem:[#allocation96_spill] sm:$0xff]  ;;  %v7336_v52 = vld [vmem:[#allocation47_spill] sm:$0xff] }
 0x750   : > { %v6631_v41 = vpop.eup %4505  ;;  %v2750_v60 = vpop.xlane.xlu0 %2749  ;;  %4521 = vpow2.f32 %v2932_v27 }
 0x751   : > { %v2816_v55 = vsub.f32 %v6188_v37, %v2750_v60  ;;  %v2817_v1 = vsub.f32 %v6192_v57, %v2750_v60  ;;  %v4508_v26 = vpop.eup %4507  ;;  %v3024_v34 = vadd.f32 %v6631_v41, %v6625_v24  ;;  %4523 = vpow2.f32 %v2934_v25  ;;  %2215 = vmatmul.mubr.f32.vlgmr.msra.gmra.mrb[56].mxu0 %v7332_v42  ;;  %3991 = vmatprep.subr.bf16.mxu0 %v3990_v17  ;;  %v7337_v25 = vld [vmem:[#allocation94_spill] sm:$0xff]  ;;  %v7338_v17 = vld [vmem:[#allocation81_spill] sm:$0xff] }
 0x752   : > { %v6638_v0 = vpop.eup %4509  ;;  %4525 = vrcp.f32 %v2969_v51  ;;  %2220 = vmatprep.mubr.f32.mxu0 %v7333_v61  ;;  %3993 = vmatpush1.bf16.xpose.msra.mxu0 %v3992_v3  ;;  %v3117_v40 = vmul.f32 %v4508_v26, %v7335_v32  ;;  %v3116_v60 = vmul.f32 %v4508_v26, %v7337_v25 }
 0x753   : > { %v2936_v59 = vmul.f32 1.442695, %v2816_v55  ;;  %v2938_v48 = vmul.f32 1.442695, %v2817_v1  ;;  %v6641_v57 = vpop.eup %4511  ;;  %3025 = vadd.xlane.f32.xlu0 %v3024_v34  ;;  %v2753_v21 = vpop.xlane.xlu1 %2752  ;;  %v7339_v1 = vld [vmem:[#allocation24_spill] sm:$0xff] }
 0x754   : > { %v2972_v37 = vpop.xlane.xlu0 %2971  ;;  %v4514_v15 = vpop.eup %4513  ;;  %v2818_v23 = vsub.f32 %v6203_v63, %v2753_v21  ;;  %v2819_v53 = vsub.f32 %v6207_v11, %v2753_v21  ;;  %v3027_v31 = vadd.f32 %v6641_v57, %v6638_v0 }
 0x755   : > { %4527 = vpow2.f32 %v2936_v59  ;;  %2221 = vmatmul.mubr.f32.gmra.mrb[58].mxu0 %v7334_v12  ;;  %v3119_v27 = vmul.f32 %v4514_v15, %v7336_v52  ;;  %v3118_v51 = vmul.f32 %v4514_v15, %v7338_v17  ;;  %v7343_v17 = vld [vmem:[#allocation85_spill] sm:$0xff] }
 0x756   : > { %4529 = vpow2.f32 %v2938_v48  ;;  %v2940_v63 = vmul.f32 1.442695, %v2818_v23  ;;  %v2942_v11 = vmul.f32 1.442695, %v2819_v53  ;;  %2226 = vmatprep.mubr.f32.mxu0 %v7339_v1  ;;  %3028 = vadd.xlane.f32.xlu1 %v3027_v31  ;;  %v7341_v31 = vld [vmem:[#allocation26_spill] sm:$0xff] }
 0x757   : > { %v6647_v38 = vpop.eup %4515  ;;  %4531 = vrcp.f32 %v2972_v37  ;;  %v3994_v34 = vpack.c.bf16 %v3119_v27, %v3117_v40  ;;  %v2975_v42 = vpop.xlane.xlu1 %2974  ;;  %v3996_v61 = vpack.c.bf16 %v3118_v51, %v3116_v60  ;;  %v7340_v37 = vld [vmem:[#allocation23_spill] sm:$0xff]  ;;  %v7342_v60 = vld [vmem:[#allocation25_spill] sm:$0xff] }
 0x758   : > { %v6654_v55 = vpop.eup %4517  ;;  %v2756_v3 = vpop.xlane.xlu0 %2755  ;;  %4533 = vpow2.f32 %v2940_v63 }
 0x759   : > { %v2820_v59 = vsub.f32 %v6218_v30, %v2756_v3  ;;  %v2821_v48 = vsub.f32 %v6222_v22, %v2756_v3  ;;  %v4520_v21 = vpop.eup %4519  ;;  %v3030_v26 = vadd.f32 %v6654_v55, %v6647_v38  ;;  %4535 = vpow2.f32 %v2942_v11  ;;  %2227 = vmatmul.mubr.f32.gmra.mrb[60].mxu0 %v7340_v37  ;;  %3995 = vmatprep.subr.bf16.mxu0 %v3994_v34  ;;  %v7344_v11 = vld [vmem:[#allocation48_spill] sm:$0xff]  ;;  %v7345_v3 = vld [vmem:[#allocation79_spill] sm:$0xff] }
 0x75a   : > { %v6662_v53 = vpop.eup %4521  ;;  %4537 = vrcp.f32 %v2975_v42  ;;  %2232 = vmatprep.mubr.f32.mxu0 %v7341_v31  ;;  %3997 = vmatpush1.bf16.xpose.msra.mxu0 %v3996_v61  ;;  %v3121_v51 = vmul.f32 %v4520_v21, %v7343_v17  ;;  %v3120_v1 = vmul.f32 %v4520_v21, %v7344_v11 }
 0x75b   : > { %v2944_v15 = vmul.f32 1.442695, %v2820_v59  ;;  %v2946_v23 = vmul.f32 1.442695, %v2821_v48  ;;  %v6665_v30 = vpop.eup %4523  ;;  %3031 = vadd.xlane.f32.xlu0 %v3030_v26  ;;  %v2759_v22 = vpop.xlane.xlu1 %2758 }
 0x75c   : > { %v4526_v12 = vpop.eup %4525  ;;  %v2978_v32 = vpop.xlane.xlu0 %2977  ;;  %v2822_v40 = vsub.f32 %v6233_v4, %v2759_v22  ;;  %v2823_v52 = vsub.f32 %v7295_v16, %v2759_v22  ;;  %v3033_v27 = vadd.f32 %v6665_v30, %v6662_v53 }
 0x75d   : > { %4539 = vpow2.f32 %v2944_v15  ;;  %2233 = vmatmul.mubr.f32.gmra.mrb[62].mxu0 %v7342_v60  ;;  %v3123_v63 = vmul.f32 %v4526_v12, %v6424_v8  ;;  %v3122_v34 = vmul.f32 %v4526_v12, %v7345_v3 }
 0x75e   : > { %4541 = vpow2.f32 %v2946_v23  ;;  %v2948_v4 = vmul.f32 1.442695, %v2822_v40  ;;  %v2950_v59 = vmul.f32 1.442695, %v2823_v52  ;;  %3034 = vadd.xlane.f32.xlu1 %v3033_v27  ;;  %v7346_v40 = vld [vmem:[#allocation83_spill] sm:$0xff]  ;;  %v7347_v27 = vld [vmem:[#allocation49_spill] sm:$0xff] }
 0x75f   : > { %v6671_v25 = vpop.eup %4527  ;;  %4543 = vrcp.f32 %v2978_v32  ;;  %v3998_v16 = vpack.c.bf16 %v3123_v63, %v3121_v51  ;;  %v2981_v48 = vpop.xlane.xlu1 %2980  ;;  %v4000_v61 = vpack.c.bf16 %v3122_v34, %v3120_v1 }
 0x760   : > { %v6678_v42 = vpop.eup %4529  ;;  %4545 = vpow2.f32 %v2948_v4 }
 0x761   : > { %v3036_v26 = vadd.f32 %v6678_v42, %v6671_v25  ;;  %v4532_v37 = vpop.eup %4531  ;;  %4547 = vpow2.f32 %v2950_v59  ;;  %3999 = vmatprep.subr.bf16.mxu0 %v3998_v16  ;;  %v7348_v16 = vld [vmem:[#allocation88_spill] sm:$0xff] }
 0x762   : > { %v6682_v8 = vpop.eup %4533  ;;  %4549 = vrcp.f32 %v2981_v48  ;;  %4001 = vmatpush1.bf16.xpose.msra.mxu0 %v4000_v61  ;;  %v3125_v22 = vmul.f32 %v4532_v37, %v6442_v6  ;;  %v3124_v52 = vmul.f32 %v4532_v37, %v7346_v40  ;;  %v7349_v61 = vld [vmem:[#allocation52_spill] sm:$0xff]  ;;  %v7350_v37 = vld [vmem:[#allocation50_spill] sm:$0xff] }
 0x763   : > { %3037 = vadd.xlane.f32.xlu0 %v3036_v26  ;;  %v2984_v21 = vpop.xlane.xlu0 %2983  ;;  %v6684_v15 = vpop.eup %4535 }
 0x764   : > { %v4538_v23 = vpop.eup %4537  ;;  %v3039_v31 = vadd.f32 %v6684_v15, %v6682_v8  ;;  %4551 = vrcp.f32 %v2984_v21 }
 0x765   : > { %v3127_v32 = vmul.f32 %v4538_v23, %v6450_v7  ;;  %v3126_v60 = vmul.f32 %v4538_v23, %v7347_v27  ;;  %v7351_v23 = vld [vmem:[#allocation51_spill] sm:$0xff] }
 0x766   : > { %3040 = vadd.xlane.f32.xlu1 %v3039_v31 }
 0x767   : > { %v6689_v12 = vpop.eup %4539  ;;  %v2987_v51 = vpop.xlane.xlu1 %2986  ;;  %v4002_v63 = vpack.c.bf16 %v3127_v32, %v3125_v22  ;;  %v4004_v11 = vpack.c.bf16 %v3126_v60, %v3124_v52 }
 0x768   : > { %v6694_v17 = vpop.eup %4541  ;;  %4553 = vrcp.f32 %v2987_v51 }
 0x769   : > { %v3042_v1 = vadd.f32 %v6694_v17, %v6689_v12  ;;  %v4544_v6 = vpop.eup %4543  ;;  %4003 = vmatprep.subr.bf16.mxu0 %v4002_v63 }
 0x76a   : > { %v6698_v3 = vpop.eup %4545  ;;  %4005 = vmatpush1.bf16.xpose.msra.mxu0 %v4004_v11  ;;  %v2990_v7 = vpop.xlane.xlu0 %2989  ;;  %v3129_v48 = vmul.f32 %v4544_v6, %v7348_v16  ;;  %v3128_v21 = vmul.f32 %v4544_v6, %v7350_v37  ;;  %v7352_v6 = vld [vmem:[#allocation90_spill] sm:$0xff]  ;;  %v3273_v37 = vld [vmem:[#allocation13] sm:$0xff] }
 0x76b   : > { %3043 = vadd.xlane.f32.xlu0 %v3042_v1  ;;  %v6700_v34 = vpop.eup %4547  ;;  %4555 = vrcp.f32 %v2990_v7 }
 0x76c   : > { %v4550_v4 = vpop.eup %4549  ;;  %v3045_v59 = vadd.f32 %v6700_v34, %v6698_v3 }
 0x76d   : > { %v3131_v26 = vmul.f32 %v4550_v4, %v7349_v61  ;;  %v3130_v31 = vmul.f32 %v4550_v4, %v7351_v23 }
 0x76e   : > { %3046 = vadd.xlane.f32.xlu1 %v3045_v59  ;;  %v4552_v32 = vpop.eup %4551 }
 0x76f   : > { %v2993_v22 = vpop.xlane.xlu1 %2992  ;;  %v4006_v40 = vpack.c.bf16 %v3131_v26, %v3129_v48  ;;  %v4008_v52 = vpack.c.bf16 %v3130_v31, %v3128_v21  ;;  %v3133_v51 = vmul.f32 %v4552_v32, %v6491_v35  ;;  %v3132_v7 = vmul.f32 %v4552_v32, %v7352_v6  ;;  %v3276_v32 = vld [vmem:[#allocation13 + $0x18] sm:$0xff] }
 0x770   : > { %4557 = vrcp.f32 %v2993_v22  ;;  %v3275_v22 = vld [vmem:[#allocation13 + $0x10] sm:$0xff] }
 0x771   : > { %4007 = vmatprep.subr.bf16.mxu0 %v4006_v40 }
 0x772   : > { %v4554_v27 = vpop.eup %4553  ;;  %4009 = vmatpush1.bf16.xpose.msra.mxu0 %v4008_v52  ;;  %v2996_v60 = vpop.xlane.xlu0 %2995  ;;  %v3277_v52 = vld [vmem:[#allocation13 + $0x20] sm:$0xff] }
 0x773   : > { %v3135_v63 = vmul.f32 %v4554_v27, %v6499_v39  ;;  %v3134_v11 = vmul.f32 %v4554_v27, %v6497_v10  ;;  %4559 = vrcp.f32 %v2996_v60  ;;  %v3274_v39 = vld [vmem:[#allocation13 + $0x8] sm:$0xff]  ;;  %v7353_v60 = vld [vmem:[#allocation87_spill] sm:$0xff] }
 0x774   : > { %v3278_v27 = vld [vmem:[#allocation13 + $0x28] sm:$0xff] }
 0x775   : > { %v4010_v1 = vpack.c.bf16 %v3135_v63, %v3133_v51  ;;  %v4012_v59 = vpack.c.bf16 %v3134_v11, %v3132_v7  ;;  %v4556_v16 = vpop.eup %4555  ;;  %v3279_v11 = vld [vmem:[#allocation13 + $0x30] sm:$0xff] }
 0x776   : > { %v3137_v61 = vmul.f32 %v4556_v16, %v6511_v13  ;;  %v3136_v21 = vmul.f32 %v4556_v16, %v6509_v54 }
 0x777   : > { %4011 = vmatprep.subr.bf16.mxu0 %v4010_v1  ;;  %v2999_v4 = vpop.xlane.xlu1 %2998  ;;  %v3280_v1 = vld [vmem:[#allocation13 + $0x38] sm:$0xff] }
 0x778   : > { %4561 = vrcp.f32 %v2999_v4 }
 0x77a   : > { %v4558_v48 = vpop.eup %4557  ;;  %4013 = vmatpush1.bf16.xpose.msra.mxu0 %v4012_v59 }
 0x77b   : > { %v3139_v26 = vmul.f32 %v4558_v48, %v6517_v33  ;;  %v3138_v35 = vmul.f32 %v4558_v48, %v6515_v5 }
 0x77d   : > { %v4014_v10 = vpack.c.bf16 %v3139_v26, %v3137_v61  ;;  %v4016_v23 = vpack.c.bf16 %v3138_v35, %v3136_v21  ;;  %v4560_v31 = vpop.eup %4559 }
 0x77e   : > { %v3141_v13 = vmul.f32 %v4560_v31, %v6527_v62  ;;  %v3140_v51 = vmul.f32 %v4560_v31, %v7353_v60  ;;  %v6720_v62 = vpop.f32.mrb[48].mxu0 }
 0x77f   : > { %4015 = vmatprep.subr.bf16.mxu0 %v4014_v10  ;;  %3288 = vperm.xlu1 %4193, %v3274_v39  }
 0x781   : > { %3283 = vperm.xlu0 %4194, %v3273_v37  }
 0x782   : > { %v4562_v40 = vpop.eup %4561  ;;  %4017 = vmatpush1.bf16.xpose.msra.mxu0 %v4016_v23 }
 0x783   : > { %v3143_v33 = vmul.f32 %v4562_v40, %v6533_v36  ;;  %v3142_v5 = vmul.f32 %v4562_v40, %v6531_v46  ;;  %3293 = vperm.xlu1 %4193, %v3275_v22   ;;  %v1191_v36 = vpop.f32.mrb[49].mxu0 }
 0x784   : > { %3240 = vmatprep.mubr.f32.mxu0 %v1191_v36  ;;  %v6722_v46 = vpop.f32.mrb[50].mxu0 }
 0x785   : > { %3298 = vperm.xlu0 %4194, %v3276_v32   ;;  %v4018_v54 = vpack.c.bf16 %v3143_v33, %v3141_v13  ;;  %v4020_v63 = vpack.c.bf16 %v3142_v5, %v3140_v51  ;;  %v6724_v6 = vpop.f32.mrb[51].mxu0 }
 0x786   : > { %v6726_v7 = vpop.f32.mrb[52].mxu0 }
 0x787   : > { %4019 = vmatprep.subr.bf16.mxu0 %v4018_v54  ;;  %3303 = vperm.xlu1 %4193, %v3277_v52   ;;  %v6728_v4 = vpop.f32.mrb[53].mxu0 }
 0x788   : > { %v6730_v59 = vpop.f32.mrb[54].mxu0 }
 0x789   : > { %3308 = vperm.xlu0 %4194, %v3278_v27   ;;  %v6732_v16 = vpop.f32.mrb[55].mxu0 }
 0x78a   : > { %4021 = vmatpush1.bf16.xpose.msra.mxu0 %v4020_v63 }
 0x78b   : > { %3313 = vperm.xlu1 %4193, %v3279_v11  }
 0x78d   : > { %3318 = vperm.xlu0 %4194, %v3280_v1  }
 0x7c0   : > { %v3002_v48 = vpop.xlane.xlu0 %3001 }
 0x7c1   : > { %4563 = vrcp.f32 %v3002_v48 }
 0x7c3   : > { %v3005_v61 = vpop.xlane.xlu1 %3004 }
 0x7c4   : > { %4565 = vrcp.f32 %v3005_v61 }
 0x7c8   : > { %v3008_v26 = vpop.xlane.xlu0 %3007 }
 0x7c9   : > { %4567 = vrcp.f32 %v3008_v26 }
 0x7cb   : > { %v3011_v35 = vpop.xlane.xlu1 %3010  ;;  %v4564_v39 = vpop.eup %4563 }
 0x7cc   : > { %4569 = vrcp.f32 %v3011_v35  ;;  %v3145_v21 = vmul.f32 %v4564_v39, %v6551_v18  ;;  %v3144_v31 = vmul.f32 %v4564_v39, %v6549_v58 }
 0x7ce   : > { %v4566_v37 = vpop.eup %4565 }
 0x7cf   : > { %v3147_v23 = vmul.f32 %v4566_v37, %v6559_v19  ;;  %v3146_v22 = vmul.f32 %v4566_v37, %v6557_v47 }
 0x7d0   : > { %v3014_v10 = vpop.xlane.xlu0 %3013 }
 0x7d1   : > { %v4022_v32 = vpack.c.bf16 %v3147_v23, %v3145_v21  ;;  %v4024_v40 = vpack.c.bf16 %v3146_v22, %v3144_v31  ;;  %4571 = vrcp.f32 %v3014_v10 }
 0x7d3   : > { %4023 = vmatprep.subr.bf16.mxu0 %v4022_v32  ;;  %v3017_v13 = vpop.xlane.xlu1 %3016  ;;  %v4568_v33 = vpop.eup %4567 }
 0x7d4   : > { %4573 = vrcp.f32 %v3017_v13  ;;  %4025 = vmatpush1.bf16.xpose.msra.mxu0 %v4024_v40  ;;  %v3149_v27 = vmul.f32 %v4568_v33, %v6571_v43  ;;  %v3148_v19 = vmul.f32 %v4568_v33, %v6565_v50 }
 0x7d6   : > { %v4570_v5 = vpop.eup %4569 }
 0x7d7   : > { %v3151_v18 = vmul.f32 %v4570_v5, %v6579_v45  ;;  %v3150_v58 = vmul.f32 %v4570_v5, %v6577_v14 }
 0x7d8   : > { %v3020_v52 = vpop.xlane.xlu0 %3019 }
 0x7d9   : > { %v4026_v54 = vpack.c.bf16 %v3151_v18, %v3149_v27  ;;  %v4028_v47 = vpack.c.bf16 %v3150_v58, %v3148_v19  ;;  %4575 = vrcp.f32 %v3020_v52 }
 0x7db   : > { %4027 = vmatprep.subr.bf16.mxu0 %v4026_v54  ;;  %v3023_v60 = vpop.xlane.xlu1 %3022  ;;  %v4572_v51 = vpop.eup %4571 }
 0x7dc   : > { %4577 = vrcp.f32 %v3023_v60  ;;  %4029 = vmatpush1.bf16.xpose.msra.mxu0 %v4028_v47  ;;  %v3153_v11 = vmul.f32 %v4572_v51, %v6591_v28  ;;  %v3152_v43 = vmul.f32 %v4572_v51, %v6585_v29 }
 0x7de   : > { %v4574_v63 = vpop.eup %4573 }
 0x7df   : > { %v3155_v1 = vmul.f32 %v4574_v63, %v6599_v9  ;;  %v3154_v45 = vmul.f32 %v4574_v63, %v6597_v2 }
 0x7e0   : > { %v3026_v50 = vpop.xlane.xlu0 %3025 }
 0x7e1   : > { %v4030_v36 = vpack.c.bf16 %v3155_v1, %v3153_v11  ;;  %v4032_v14 = vpack.c.bf16 %v3154_v45, %v3152_v43  ;;  %4579 = vrcp.f32 %v3026_v50 }
 0x7e3   : > { %4031 = vmatprep.subr.bf16.mxu0 %v4030_v36  ;;  %v3029_v48 = vpop.xlane.xlu1 %3028  ;;  %v4576_v61 = vpop.eup %4575 }
 0x7e4   : > { %4581 = vrcp.f32 %v3029_v48  ;;  %4033 = vmatpush1.bf16.xpose.msra.mxu0 %v4032_v14  ;;  %v3157_v35 = vmul.f32 %v4576_v61, %v6611_v44  ;;  %v3156_v9 = vmul.f32 %v4576_v61, %v6605_v56 }
 0x7e6   : > { %v4578_v26 = vpop.eup %4577 }
 0x7e7   : > { %v3159_v28 = vmul.f32 %v4578_v26, %v6619_v20  ;;  %v3158_v29 = vmul.f32 %v4578_v26, %v6617_v49 }
 0x7e8   : > { %v3032_v39 = vpop.xlane.xlu0 %3031 }
 0x7e9   : > { %v4034_v2 = vpack.c.bf16 %v3159_v28, %v3157_v35  ;;  %v4036_v37 = vpack.c.bf16 %v3158_v29, %v3156_v9  ;;  %4583 = vrcp.f32 %v3032_v39 }
 0x7eb   : > { %4035 = vmatprep.subr.bf16.mxu0 %v4034_v2  ;;  %v3035_v10 = vpop.xlane.xlu1 %3034  ;;  %v4580_v21 = vpop.eup %4579  ;;  %v3265_v2 = vld [vmem:[#allocation11] sm:$0xff] }
 0x7ec   : > { %4585 = vrcp.f32 %v3035_v10  ;;  %4037 = vmatpush1.bf16.xpose.msra.mxu0 %v4036_v37  ;;  %v3161_v22 = vmul.f32 %v4580_v21, %v6631_v41  ;;  %v3160_v20 = vmul.f32 %v4580_v21, %v6625_v24  ;;  %v3267_v37 = vld [vmem:[#allocation11 + $0x10] sm:$0xff]  ;;  %v3266_v10 = vld [vmem:[#allocation11 + $0x8] sm:$0xff]  ;;  %v3268_v21 = vld [vmem:[#allocation11 + $0x18] sm:$0xff] }
 0x7ee   : > { %v4582_v23 = vpop.eup %4581 }
 0x7ef   : > { %v3163_v44 = vmul.f32 %v4582_v23, %v6641_v57  ;;  %v3162_v56 = vmul.f32 %v4582_v23, %v6638_v0  ;;  %v3269_v23 = vld [vmem:[#allocation11 + $0x20] sm:$0xff] }
 0x7f0   : > { %v3038_v31 = vpop.xlane.xlu0 %3037 }
 0x7f1   : > { %v4038_v49 = vpack.c.bf16 %v3163_v44, %v3161_v22  ;;  %v4040_v32 = vpack.c.bf16 %v3162_v56, %v3160_v20  ;;  %4587 = vrcp.f32 %v3038_v31  ;;  %v3270_v31 = vld [vmem:[#allocation11 + $0x28] sm:$0xff]  ;;  %v3271_v22 = vld [vmem:[#allocation11 + $0x30] sm:$0xff]  ;;  %v3272_v44 = vld [vmem:[#allocation11 + $0x38] sm:$0xff] }
 0x7f3   : > { %4039 = vmatprep.subr.bf16.mxu0 %v4038_v49  ;;  %v3041_v40 = vpop.xlane.xlu1 %3040  ;;  %v4584_v13 = vpop.eup %4583 }
 0x7f4   : > { %4589 = vrcp.f32 %v3041_v40  ;;  %4041 = vmatpush1.bf16.xpose.msra.mxu0 %v4040_v32  ;;  %v3165_v52 = vmul.f32 %v4584_v13, %v6654_v55  ;;  %v3164_v57 = vmul.f32 %v4584_v13, %v6647_v38 }
 0x7f6   : > { %v4586_v33 = vpop.eup %4585 }
 0x7f7   : > { %v3167_v41 = vmul.f32 %v4586_v33, %v6665_v30  ;;  %v3166_v24 = vmul.f32 %v4586_v33, %v6662_v53 }
 0x7f8   : > { %v3044_v5 = vpop.xlane.xlu0 %3043 }
 0x7f9   : > { %v4042_v27 = vpack.c.bf16 %v3167_v41, %v3165_v52  ;;  %v4044_v0 = vpack.c.bf16 %v3166_v24, %v3164_v57  ;;  %4591 = vrcp.f32 %v3044_v5 }
 0x7fb   : > { %4043 = vmatprep.subr.bf16.mxu0 %v4042_v27  ;;  %v3047_v18 = vpop.xlane.xlu1 %3046  ;;  %v4588_v19 = vpop.eup %4587  ;;  %v4595_v27 = vld [vmem:[%s5224_s21] sm:$0xff] }
 0x7fc   : > { %4593 = vrcp.f32 %v3047_v18  ;;  %4045 = vmatpush1.bf16.xpose.msra.mxu0 %v4044_v0  ;;  %v3169_v54 = vmul.f32 %v4588_v19, %v6678_v42  ;;  %v3168_v55 = vmul.f32 %v4588_v19, %v6671_v25  ;;  %v7354_v25 = vmov 0.0   ;;  %v4596_v18 = vld [vmem:[%s5224_s21 + $0x20] sm:$0xff] }
 0x7fe   : > { %v4590_v58 = vpop.eup %4589 }
 0x7ff   : > { %v3171_v47 = vmul.f32 %v4590_v58, %v6684_v15  ;;  %v3170_v30 = vmul.f32 %v4590_v58, %v6682_v8  ;;  %v3289_v20 = vpop.permute.xlu1 %3288  ;;  %v4597_v58 = vld [vmem:[%s5224_s21 + $0x8] sm:$0xff] }
 0x800   : > { %v3284_v56 = vpop.permute.xlu0 %3283 }
 0x801   : > { %v4046_v38 = vpack.c.bf16 %v3171_v47, %v3169_v54  ;;  %v4048_v60 = vpack.c.bf16 %v3170_v30, %v3168_v55  ;;  %v4598_v47 = vld [vmem:[%s5224_s21 + $0x28] sm:$0xff] }
 0x803   : > { %4047 = vmatprep.subr.bf16.mxu0 %v4046_v38  ;;  %v4592_v53 = vpop.eup %4591  ;;  %v3294_v49 = vpop.permute.xlu1 %3293 }
 0x804   : > { %4049 = vmatpush1.bf16.xpose.msra.mxu0 %v4048_v60  ;;  %v3173_v63 = vmul.f32 %v4592_v53, %v6694_v17  ;;  %v3172_v1 = vmul.f32 %v4592_v53, %v6689_v12  ;;  %v3299_v24 = vpop.permute.xlu0 %3298 }
 0x806   : > { %v4594_v51 = vpop.eup %4593 }
 0x807   : > { %v3175_v11 = vmul.f32 %v4594_v51, %v6700_v34  ;;  %v3174_v42 = vmul.f32 %v4594_v51, %v6698_v3 }
 0x809   : > { %v4050_v43 = vpack.c.bf16 %v3175_v11, %v3173_v63  ;;  %v4052_v15 = vpack.c.bf16 %v3174_v42, %v3172_v1  ;;  %v4599_v42 = vld [vmem:[%s5224_s21 + $0x10] sm:$0xff] }
 0x80b   : > { %4051 = vmatprep.subr.bf16.mxu0 %v4050_v43 }
 0x80c   : > { %4053 = vmatpush1.bf16.xpose.msra.mxu0 %v4052_v15  ;;  %v4600_v15 = vld [vmem:[%s5224_s21 + $0x30] sm:$0xff] }
 0x813   : > { %3241 = vmatmul.mubr.f32.vlgmr.msra.gmra.mrb[64].mxu0 %v6720_v62 }
 0x814   : > { %3246 = vmatprep.mubr.f32.mxu0 %v6724_v6 }
 0x817   : > { %3247 = vmatmul.mubr.f32.gmra.mrb[66].mxu0 %v6722_v46 }
 0x818   : > { %3252 = vmatprep.mubr.f32.mxu0 %v6728_v4 }
 0x81b   : > { %3253 = vmatmul.mubr.f32.gmra.mrb[68].mxu0 %v6726_v7 }
 0x81c   : > { %3258 = vmatprep.mubr.f32.mxu0 %v6732_v16 }
 0x81f   : > { %3259 = vmatmul.mubr.f32.gmra.mrb[70].mxu0 %v6730_v59 }
 0x820   : > { %3409 = vmatprep.mubr.f32.mxu0 %v7354_v25 }
 0x824   : > { %v2216_v8 = vpop.f32.mrb[56].mxu0 }
 0x825   : > { %v2218_v12 = vpop.f32.mrb[57].mxu0 }
 0x828   : > { %v2222_v17 = vpop.f32.mrb[58].mxu0 }
 0x829   : > { %v4056_v3 = vpack.c.bf16 %v2222_v17, %v2216_v8  ;;  %v2224_v34 = vpop.f32.mrb[59].mxu0  ;;  %v3304_v8 = vpop.permute.xlu1 %3303 }
 0x82a   : > { %v4054_v62 = vpack.c.bf16 %v2224_v34, %v2218_v12  ;;  %v4601_v12 = vld [vmem:[%s5224_s21 + $0x18] sm:$0xff] }
 0x82c   : > { %v2228_v45 = vpop.f32.mrb[60].mxu0  ;;  %4055 = vmatprep.subr.bf16.mxu0 %v4054_v62  ;;  %4070 = vmatprep.subr.bf16.mxu1 %v4054_v62 }
 0x82d   : > { %v2230_v46 = vpop.f32.mrb[61].mxu0  ;;  %4057 = vmatpush1.bf16.msra.mxu0 %v4056_v3  ;;  %4074 = vmatpush1.bf16.msra.mxu1 %v4056_v3  ;;  %v4602_v3 = vld [vmem:[%s5224_s21 + $0x38] sm:$0xff] }
 0x830   : > { %v2234_v6 = vpop.f32.mrb[62].mxu0 }
 0x831   : > { %v4060_v7 = vpack.c.bf16 %v2234_v6, %v2228_v45  ;;  %v2236_v4 = vpop.f32.mrb[63].mxu0 }
 0x832   : > { %v4058_v16 = vpack.c.bf16 %v2236_v4, %v2230_v46 }
 0x834   : > { %4059 = vmatprep.subr.bf16.mxu0 %v4058_v16  ;;  %4071 = vmatprep.subr.bf16.mxu1 %v4058_v16  ;;  %v3309_v16 = vpop.permute.xlu0 %3308 }
 0x835   : > { %4061 = vmatpush1.bf16.msra.mxu0 %v4060_v7  ;;  %4075 = vmatpush1.bf16.msra.mxu1 %v4060_v7  ;;  %v4603_v7 = vld [vmem:[%s5224_s21 + $0x40] sm:$0xff] }
 0x8e6   : > { %v3242_v59 = vpop.f32.mrb[64].mxu0 }
 0x8e7   : > { %v3244_v50 = vpop.f32.mrb[65].mxu0 }
 0x8ea   : > { %v3248_v36 = vpop.f32.mrb[66].mxu0 }
 0x8eb   : > { %v4064_v14 = vpack.c.bf16 %v3248_v36, %v3242_v59  ;;  %v3250_v48 = vpop.f32.mrb[67].mxu0  ;;  %v4604_v59 = vld [vmem:[%s5224_s21 + $0x48] sm:$0xff] }
 0x8ec   : > { %v4062_v61 = vpack.c.bf16 %v3250_v48, %v3244_v50 }
 0x8ee   : > { %4063 = vmatprep.subr.bf16.mxu0 %v4062_v61  ;;  %4072 = vmatprep.subr.bf16.mxu1 %v4062_v61  ;;  %v3254_v26 = vpop.f32.mrb[68].mxu0 }
 0x8ef   : > { %4065 = vmatpush1.bf16.msra.mxu0 %v4064_v14  ;;  %4076 = vmatpush1.bf16.msra.mxu1 %v4064_v14  ;;  %v3256_v35 = vpop.f32.mrb[69].mxu0 }
 0x8f2   : > { %v3260_v28 = vpop.f32.mrb[70].mxu0 }
 0x8f3   : > { %v4068_v9 = vpack.c.bf16 %v3260_v28, %v3254_v26  ;;  %v3262_v29 = vpop.f32.mrb[71].mxu0  ;;  %v4605_v26 = vld [vmem:[%s5224_s21 + $0x50] sm:$0xff]  ;;  %v3314_v28 = vpop.permute.xlu1 %3313 }
 0x8f4   : > { %v4066_v39 = vpack.c.bf16 %v3262_v29, %v3256_v35 }
 0x8f6   : > { %4067 = vmatprep.subr.bf16.mxu0 %v4066_v39  ;;  %4073 = vmatprep.subr.bf16.mxu1 %v4066_v39 }
 0x8f7   : > { %4069 = vmatpush1.bf16.msra.mxu0 %v4068_v9  ;;  %4077 = vmatpush1.bf16.msra.mxu1 %v4068_v9  ;;  %v4606_v9 = vld [vmem:[%s5224_s21 + $0x58] sm:$0xff] }
 0x8fa   : > { %3759 = vmatmul.mubr.msk.f32.vlgmr.msra.gmra.mrb[72].mxu0 %vm472_vm0, %v3265_v2  ;;  %3761 = vmatmul.mubr.msk.f32.vlgmr.msra.gmra.mrb[136].mxu1 %vm472_vm0, %v3267_v37 }
 0x8fb   : > { %3415 = vmatprep.mubr.f32.mxu0 %v7354_v25  ;;  %3427 = vmatprep.mubr.f32.mxu1 %v7354_v25 }
 0x8fe   : > { %3760 = vmatmul.mubr.msk.f32.gmra.mrb[74].mxu0 %vm472_vm0, %v3266_v10  ;;  %3762 = vmatmul.mubr.msk.f32.gmra.mrb[138].mxu1 %vm472_vm0, %v3268_v21  ;;  %v4607_v21 = vld [vmem:[%s5224_s21 + $0x60] sm:$0xff] }
 0x8ff   : > { %3433 = vmatprep.mubr.f32.mxu1 %v7354_v25 }
 0x902   : > { %3763 = vmatmul.mubr.msk.f32.gmra.mrb[140].mxu1 %vm472_vm0, %v3269_v23 }
 0x903   : > { %3439 = vmatprep.mubr.f32.mxu1 %v7354_v25 }
 0x906   : > { %3764 = vmatmul.mubr.msk.f32.gmra.mrb[142].mxu1 %vm472_vm0, %v3270_v31  ;;  %v3319_v31 = vpop.permute.xlu0 %3318 }
 0x907   : > { %3445 = vmatprep.mubr.f32.mxu1 %v7354_v25 }
 0x90a   : > { %3765 = vmatmul.mubr.msk.f32.gmra.mrb[144].mxu1 %vm472_vm0, %v3271_v22  ;;  %v4608_v22 = vld [vmem:[%s5224_s21 + $0x68] sm:$0xff] }
 0x90b   : > { %3451 = vmatprep.mubr.f32.mxu1 %v7354_v25 }
 0x90e   : > { %3766 = vmatmul.mubr.msk.f32.gmra.mrb[146].mxu1 %vm472_vm0, %v3272_v44 }
 0x9cd   : > { %v3411_v32 = vpop.f32.mrb[72].mxu0  ;;  %v3423_v40 = vpop.f32.mrb[136].mxu1 }
 0x9ce   : > { %v3412_v13 = vadd.f32 %v3411_v32, %v3284_v56  ;;  %v3424_v33 = vadd.f32 %v3423_v40, %v3294_v49  ;;  %v3413_v5 = vpop.f32.mrb[73].mxu0  ;;  %v3425_v52 = vpop.f32.mrb[137].mxu1  ;;  %v4609_v40 = vld [vmem:[%s5224_s21 + $0x70] sm:$0xff] }
 0x9cf   : > { %v3414_v41 = vadd.f32 %v3413_v5, %v3284_v56  ;;  %v3426_v57 = vadd.f32 %v3425_v52, %v3294_v49 }
 0x9d0   : > { %v3458_v0 = vadd.f32 %v4595_v27, %v3412_v13  ;;  %v3462_v19 = vadd.f32 %v4596_v18, %v3424_v33  ;;  %v4610_v33 = vld [vmem:[%s5224_s21 + $0x78] sm:$0xff] }
 0x9d1   : > { %v3459_v54 = vadd.f32 %v4597_v58, %v3414_v41  ;;  %v3463_v55 = vadd.f32 %v4598_v47, %v3426_v57  ;;  %v3417_v30 = vpop.f32.mrb[74].mxu0  ;;  %v3429_v38 = vpop.f32.mrb[138].mxu1 }
 0x9d2   : > { %3474 = vst [vmem:[%s6794_s8] sm:$0xff] %v3458_v0  ;;  %3478 = vst [vmem:[%s6794_s8 + $0x20] sm:$0xff] %v3462_v19  ;;  %v3418_v60 = vadd.f32 %v3417_v30, %v3289_v20  ;;  %v3430_v53 = vadd.f32 %v3429_v38, %v3299_v24  ;;  %v3419_v51 = vpop.f32.mrb[75].mxu0  ;;  %v3431_v63 = vpop.f32.mrb[139].mxu1 }
 0x9d3   : > { %3475 = vst [vmem:[%s6794_s8 + $0x8] sm:$0xff] %v3459_v54  ;;  %3479 = vst [vmem:[%s6794_s8 + $0x28] sm:$0xff] %v3463_v55  ;;  %v3420_v11 = vadd.f32 %v3419_v51, %v3289_v20  ;;  %v3432_v1 = vadd.f32 %v3431_v63, %v3299_v24 }
 0x9d4   : > { %v3460_v43 = vadd.f32 %v4599_v42, %v3418_v60  ;;  %v3464_v25 = vadd.f32 %v4600_v15, %v3430_v53 }
 0x9d5   : > { %v3461_v17 = vadd.f32 %v4601_v12, %v3420_v11  ;;  %v3465_v34 = vadd.f32 %v4602_v3, %v3432_v1  ;;  %v3435_v62 = vpop.f32.mrb[140].mxu1 }
 0x9d6   : > { %3476 = vst [vmem:[%s6794_s8 + $0x10] sm:$0xff] %v3460_v43  ;;  %3480 = vst [vmem:[%s6794_s8 + $0x30] sm:$0xff] %v3464_v25  ;;  %v3436_v45 = vadd.f32 %v3435_v62, %v3304_v8  ;;  %v3437_v46 = vpop.f32.mrb[141].mxu1 }
 0x9d7   : > { %3477 = vst [vmem:[%s6794_s8 + $0x18] sm:$0xff] %v3461_v17  ;;  %3481 = vst [vmem:[%s6794_s8 + $0x38] sm:$0xff] %v3465_v34  ;;  %v3438_v6 = vadd.f32 %v3437_v46, %v3304_v8 }
 0x9d8   : > { %v3466_v4 = vadd.f32 %v4603_v7, %v3436_v45 }
 0x9d9   : > { %v3467_v50 = vadd.f32 %v4604_v59, %v3438_v6  ;;  %v3441_v36 = vpop.f32.mrb[142].mxu1 }
 0x9da   : > { %3482 = vst [vmem:[%s6794_s8 + $0x40] sm:$0xff] %v3466_v4  ;;  %v3442_v14 = vadd.f32 %v3441_v36, %v3309_v16  ;;  %v3443_v48 = vpop.f32.mrb[143].mxu1 }
 0x9db   : > { %3483 = vst [vmem:[%s6794_s8 + $0x48] sm:$0xff] %v3467_v50  ;;  %v3444_v61 = vadd.f32 %v3443_v48, %v3309_v16 }
 0x9dc   : > { %v3468_v35 = vadd.f32 %v4605_v26, %v3442_v14 }
 0x9dd   : > { %v3469_v29 = vadd.f32 %v4606_v9, %v3444_v61  ;;  %v3447_v39 = vpop.f32.mrb[144].mxu1 }
 0x9de   : > { %3484 = vst [vmem:[%s6794_s8 + $0x50] sm:$0xff] %v3468_v35  ;;  %v3448_v2 = vadd.f32 %v3447_v39, %v3314_v28  ;;  %v3449_v37 = vpop.f32.mrb[145].mxu1 }
 0x9df   : > { %3485 = vst [vmem:[%s6794_s8 + $0x58] sm:$0xff] %v3469_v29  ;;  %v3450_v10 = vadd.f32 %v3449_v37, %v3314_v28 }
 0x9e0   : > { %v3470_v23 = vadd.f32 %v4607_v21, %v3448_v2 }
 0x9e1   : > { %v3471_v44 = vadd.f32 %v4608_v22, %v3450_v10  ;;  %v3453_v20 = vpop.f32.mrb[146].mxu1 }
 0x9e2   : > { %3486 = vst [vmem:[%s6794_s8 + $0x60] sm:$0xff] %v3470_v23  ;;  %v3454_v56 = vadd.f32 %v3453_v20, %v3319_v31  ;;  %v3455_v49 = vpop.f32.mrb[147].mxu1 }
 0x9e3   : > { %3487 = vst [vmem:[%s6794_s8 + $0x68] sm:$0xff] %v3471_v44  ;;  %v3456_v32 = vadd.f32 %v3455_v49, %v3319_v31 }
 0x9e4   : > { %v3472_v13 = vadd.f32 %v4609_v40, %v3454_v56 }
 0x9e5   : > { %v3473_v5 = vadd.f32 %v4610_v33, %v3456_v32 }
 0x9e6   : > { %3488 = vst [vmem:[%s6794_s8 + $0x70] sm:$0xff] %v3472_v13 }
 0x9e7   : > { %3489 = vst [vmem:[%s6794_s8 + $0x78] sm:$0xff] %v3473_v5 }
 0x9e8   : > { %4822 = shalt.err (!%p4819_p8)
}
 0x9e9   : > { %s4823_s10 = scalar_lea.hbm %s6826_s13, 2048  ;;  %s4827_s8 = scalar_lea.hbm %s6882_s7, 4096 }
 0x9ea   : > { %p4824_p4 = scmp.ne.s32.totalorder %s6826_s13, %s4823_s10  ;;  %p4828_p3 = scmp.lt.u32.totalorder %s6826_s13, %s6882_s7 }
 0x9eb   : > { %p4829_p5 = scmp.lt.u32.totalorder %s4827_s8, %s4823_s10  ;;  %p4831_p6 = scmp.lt.u32.totalorder %s4823_s10, %s6826_s13 }
 0x9ec   : > { %p4825_p10 = pnand %p4824_p4, %p7355_p9 }
 0x9ed   : > { %p4830_p7 = por %p4829_p5, %p4828_p3 }
 0x9ee   : > { %p4826_p11 = pneg %p4825_p10 }
 0x9ef   : > { %p4832_p12 = por %p4831_p6, %p4830_p7 }
 0x9f1   : > { %p4833_p1 = pnand %p4832_p12, %p4826_p11 }
 0x9f3   : > { %4836 = shalt.err (!%p4833_p1)
}
 0x9f4   : > { %s4903_s11 = smov 256   ;;  %s4904_s17 = smov 16  }
 0x9f5   : > { %4104 = dma.vmem_to_hbm [thread:$0]  (%p7355_p9), %s6828_s14, 2048, %s6826_s13, %s3491_s30, %s4903_s11, %s4903_s11, %s4904_s17  }
 0x9f6 PF: > { %s3519_s18 = sand.u32 1, %s4875_s24   ;;  %p7356_p13 = scmp.ne.s32.totalorder %s7032_s16, 0 }
 0x9f7   : > { %p7357_p0 = scmp.ge.s32.totalorder %s4887_s27, 2  ;;  %s3520_s29 = scalar_lea.sflag [#allocation4], %s3519_s18 }
 0x9f9   : > { %p4130_p2 = pnand %p7357_p0, %p7356_p13 }
 0x9fb   : > { %4870 = dma.done.wait (!%p4130_p2), %s3520_s29, 2048  }
 0x9fc   : > { %4872 = vsyncadd (!%p4130_p2), %s3520_s29, 4294965248  ;;  %p23_p8 = scmp.ge.s32.totalorder %s5139_s19, 4   ;;  %s7358_s24 = smov %s4879_s25 }
 0x9fd   : > { %s7359_s25 = smov %s4883_s26  ;;  %s7360_s26 = smov %s5150_s12 }
 0x9fe   : > { %s7361_s27 = smov %s5139_s19  ;;  %25 = sbr.rel (!%p23_p8) target bundleno = 8 (0x8), region = 117 }
 0xa05   :  { %3525 = vsyncpa [#allocation3], 1 }
 0xa06   :  { %3527 = vsyncpa [#allocation3 + $0x1], 1 }
 0xa07   :  { %3528 = vsyncpa [#allocation6], 1 }
 0xa08   :  { %3529 = vsyncpa [#allocation9], 1 }
 0xa09   :  { %3530 = vsyncpa [#allocation12], 1 }
 0xa0a   :  { %3531 = vsyncpa [#allocation4], 1 }
 0xa0b   :  { %3533 = vsyncpa [#allocation4 + $0x1], 1 }

</bundles_post_ra>
